<compile_context>
chip_gen: v6e
topology: v6e:2x2x1
jax: 0.10.0
libtpu: 0.0.40
codegen_flags: <defaults>
</compile_context>

<pallas_src>
import functools

import jax
import jax.numpy as jnp
from jax import lax
from jax.experimental import pallas as pl
from jax.experimental.pallas import tpu as pltpu


def _lstm_classifier_kernel(embf_ref,               # (Tc*B, E)  bf16, forward chunk
                            embb_ref,               # (Tc*B, E)  bf16, time-reversed chunk
                            wihf_ref, wihb_ref,     # (E, 4H)    bf16, gates (i,f,o,g)
                            bf_ref, bb_ref,         # (1, 4H)    f32, combined b_ih+b_hh
                            whh_ref,                # (2H, 8H)   bf16, block-diag [fwd|bwd]
                            wfc_ref,                # (4H, O)    bf16, rows [max_f|max_b|avg_f|avg_b]
                            bfc_ref,                # (1, O)     f32
                            out_ref,                # (B, O)     f32
                            xgf_ref, xgb_ref,       # (Tc*B, 4H) bf16 scratch (per-chunk gate slabs)
                            st_ref,                 # (8, B, H)  f32 scratch (persistent carries)
                            *, inv_T, unroll):
    chunk = pl.program_id(0)
    n_chunks = pl.num_programs(0)
    B = out_ref.shape[0]
    Tc = embf_ref.shape[0] // B
    H = st_ref.shape[2]
    H2, H3, H4 = 2 * H, 3 * H, 4 * H

    # ---- init persistent carries at first time chunk ----
    @pl.when(chunk == 0)
    def _init():
        st_ref[...] = jnp.zeros((8, B, H), jnp.float32)
        st_ref[3, :, :] = jnp.full((B, H), -jnp.inf, jnp.float32)   # max_f
        st_ref[7, :, :] = jnp.full((B, H), -jnp.inf, jnp.float32)   # max_b

    # ---- per-chunk hoisted input projection, written directly as bf16 slabs ----
    xgf_ref[...] = (jnp.dot(embf_ref[...], wihf_ref[...],
                            preferred_element_type=jnp.float32)
                    + bf_ref[...]).astype(jnp.bfloat16)
    xgb_ref[...] = (jnp.dot(embb_ref[...], wihb_ref[...],
                            preferred_element_type=jnp.float32)
                    + bb_ref[...]).astype(jnp.bfloat16)

    whh = whh_ref[...]                               # (2H, 8H) bf16, block diagonal

    def cell(gates, c):
        # gate columns ordered [i | f | o | g]: one contiguous sigmoid, one tanh
        sig = jax.nn.sigmoid(gates[:, 0:H3])
        g_c = jnp.tanh(gates[:, H3:H4])
        c_new = sig[:, H:H2] * c + sig[:, 0:H] * g_c
        h_new = sig[:, H2:H3] * jnp.tanh(c_new)
        return h_new, c_new

    def step(t, carry):
        hf, cf, sf, mf, hb, cb, sb, mb = carry
        # single fused recurrent matmul: [hf|hb](B,2H) @ block-diag W_hh (2H,8H)
        h_cat = jnp.concatenate([hf, hb], axis=1).astype(jnp.bfloat16)
        rec = jnp.dot(h_cat, whh, preferred_element_type=jnp.float32)   # (B, 8H) f32
        off_f = pl.multiple_of(t * B, B)
        off_b = pl.multiple_of((Tc - 1 - t) * B, B)
        gf = xgf_ref[pl.ds(off_f, B), :] + rec[:, 0:H4]     # bf16 + f32 -> f32
        gb = xgb_ref[pl.ds(off_b, B), :] + rec[:, H4:2 * H4]
        hf, cf = cell(gf, cf)
        hb, cb = cell(gb, cb)
        return (hf, cf, sf + hf, jnp.maximum(mf, hf),
                hb, cb, sb + hb, jnp.maximum(mb, hb))

    carry0 = tuple(st_ref[k] for k in range(8))
    carry = lax.fori_loop(0, Tc, step, carry0, unroll=unroll)
    for k in range(8):
        st_ref[k, :, :] = carry[k]

    # ---- epilogue: pooled features -> single fc matmul, last chunk only ----
    @pl.when(chunk == n_chunks - 1)
    def _finalize():
        hf, cf, sf, mf, hb, cb, sb, mb = carry
        # PyTorch layout: cat(max_pool, avg_pool) with bi-LSTM features = [fwd|bwd]
        pooled = jnp.concatenate(
            [mf, mb, sf * inv_T, sb * inv_T], axis=1).astype(jnp.bfloat16)   # (B, 4H)
        out_ref[...] = (jnp.dot(pooled, wfc_ref[...],
                                preferred_element_type=jnp.float32)
                        + bfc_ref[...])


def _reorder_gates(w, H):
    # PyTorch gate column order [i | f | g | o] -> kernel order [i | f | o | g]
    return jnp.concatenate([w[:, 0:2 * H], w[:, 3 * H:4 * H], w[:, 2 * H:3 * H]], axis=-1)


def _prep_weights(params):
    H = params["w_hh_f"].shape[0]
    wih_f = _reorder_gates(params["w_ih_f"], H).astype(jnp.bfloat16)      # (E, 4H)
    wih_b = _reorder_gates(params["w_ih_b"], H).astype(jnp.bfloat16)      # (E, 4H)
    b_f = _reorder_gates(params["b_f"], H).astype(jnp.float32)            # (1, 4H)
    b_b = _reorder_gates(params["b_b"], H).astype(jnp.float32)            # (1, 4H)
    whh_f = _reorder_gates(params["w_hh_f"], H)
    whh_b = _reorder_gates(params["w_hh_b"], H)
    z = jnp.zeros((H, 4 * H), whh_f.dtype)
    whh_blk = jnp.concatenate(
        [jnp.concatenate([whh_f, z], axis=1),
         jnp.concatenate([z, whh_b], axis=1)], axis=0).astype(jnp.bfloat16)  # (2H, 8H)
    w_fc = params["w_fc"].astype(jnp.bfloat16)                            # (4H, O)
    b_fc = params["b_fc"].astype(jnp.float32)                             # (1, O)
    return wih_f, wih_b, b_f, b_b, whh_blk, w_fc, b_fc


def _pick_time_chunk(T, B_pad, E, H):
    # ~8 MiB budget for chunk-resident buffers:
    #   emb bf16 x 2 dirs x 2 pipeline buffers + 2 bf16 gate slabs
    per_step = B_pad * (8 * E + 16 * H)
    max_steps = max(1, (8 << 20) // per_step)
    for d in range(min(T, max_steps), 0, -1):
        if T % d == 0:
            return d
    return 1


def _pick_unroll(Tc, B_pad):
    # carries are 8 live (B_pad, H) f32 arrays -> cap unroll by vreg pressure
    cap = 8 if B_pad <= 16 else (4 if B_pad <= 32 else 2)
    for u in (8, 4, 2):
        if u <= cap and Tc % u == 0:
            return u
    return 1


def _vmem_limit_bytes(Tc, B_pad, E, H, O):
    bf2, f4 = 2, 4
    emb = 2 * 2 * Tc * B_pad * E * bf2                       # 2 dirs x double buffer
    slabs = 2 * Tc * B_pad * 4 * H * bf2                     # bf16 gate slabs
    weights = (2 * E * 4 * H + 2 * H * 8 * H + 4 * H * O) * bf2 * 2
    biases = (2 * 4 * H + O) * f4 * 2
    state = 8 * B_pad * H * f4
    out = 2 * B_pad * O * f4
    total = emb + slabs + weights + biases + state + out
    # 2x headroom for compiler temporaries; cap for v7x's 64 MiB physical VMEM
    return int(min(max(2 * total + (4 << 20), 16 << 20), 56 << 20))


def lstm_classifier_forward(x_tokens, params):
    B, T = x_tokens.shape
    E = params["embedding"].shape[1]
    H = params["w_hh_f"].shape[0]
    O = params["w_fc"].shape[1]

    # Pad batch to a multiple of 8 sublanes; padded rows are sliced off afterwards.
    B_pad = ((B + 7) // 8) * 8
    if B_pad != B:
        x_tokens = jnp.pad(x_tokens, ((0, B_pad - B), (0, 0)))

    # Embedding gather directly in time-major flat order (T*B_pad, E), bf16 for MXU.
    # (SpatialDropout / LSTM dropout are identity at inference -> no-ops.)
    flat_ids = x_tokens.T.reshape(-1)                                     # (T*B_pad,)
    emb_tm = jnp.take(params["embedding"], flat_ids, axis=0).astype(jnp.bfloat16)

    wih_f, wih_b, b_f, b_b, whh_blk, w_fc, b_fc = _prep_weights(params)

    Tc = _pick_time_chunk(T, B_pad, E, H)
    n_chunks = T // Tc
    unroll = _pick_unroll(Tc, B_pad)

    def _const_spec(shape):
        n = len(shape)
        return pl.BlockSpec(shape, lambda i, n=n: (0,) * n)

    fwd_spec = pl.BlockSpec((Tc * B_pad, E), lambda i: (i, 0))
    bwd_spec = pl.BlockSpec((Tc * B_pad, E), lambda i, n=n_chunks: (n - 1 - i, 0))

    grid_spec = pltpu.PrefetchScalarGridSpec(
        num_scalar_prefetch=0,
        grid=(n_chunks,),
        in_specs=[fwd_spec, bwd_spec,
                  _const_spec((E, 4 * H)), _const_spec((E, 4 * H)),
                  _const_spec((1, 4 * H)), _const_spec((1, 4 * H)),
                  _const_spec((2 * H, 8 * H)),
                  _const_spec((4 * H, O)), _const_spec((1, O))],
        out_specs=pl.BlockSpec((B_pad, O), lambda i: (0, 0)),
        scratch_shapes=[pltpu.VMEM((Tc * B_pad, 4 * H), jnp.bfloat16),
                        pltpu.VMEM((Tc * B_pad, 4 * H), jnp.bfloat16),
                        pltpu.VMEM((8, B_pad, H), jnp.float32)])

    out = pl.pallas_call(
        functools.partial(_lstm_classifier_kernel, inv_T=1.0 / T, unroll=unroll),
        out_shape=jax.ShapeDtypeStruct((B_pad, O), jnp.float32),
        grid_spec=grid_spec,
        compiler_params=pltpu.CompilerParams(
            dimension_semantics=("arbitrary",),
            vmem_limit_bytes=_vmem_limit_bytes(Tc, B_pad, E, H, O)),
    )(emb_tm, emb_tm, wih_f, wih_b, b_f, b_b, whh_blk, w_fc, b_fc)
    return out[:B]


def init_params(key, vocab_size, embed_size, lstm_units, output_size):
    H = lstm_units
    ks = jax.random.split(key, 9)
    scale = 0.1
    # Stored in PyTorch-equivalent layout: pre-transposed matrices, gate order (i,f,g,o),
    # combined b_ih + b_hh bias; the wrapper reorders/concats/casts host-side.
    return {
        "embedding": jax.random.normal(ks[0], (vocab_size, embed_size), jnp.float32) * scale,
        "w_ih_f": jax.random.normal(ks[1], (embed_size, 4 * H), jnp.float32) * scale,
        "w_hh_f": jax.random.normal(ks[2], (H, 4 * H), jnp.float32) * scale,
        "b_f":    jax.random.normal(ks[3], (1, 4 * H), jnp.float32) * scale,
        "w_ih_b": jax.random.normal(ks[4], (embed_size, 4 * H), jnp.float32) * scale,
        "w_hh_b": jax.random.normal(ks[5], (H, 4 * H), jnp.float32) * scale,
        "b_b":    jax.random.normal(ks[6], (1, 4 * H), jnp.float32) * scale,
        "w_fc":   jax.random.normal(ks[7], (4 * H, output_size), jnp.float32) * scale,
        "b_fc":   jax.random.normal(ks[8], (1, output_size), jnp.float32) * scale,
    }


if __name__ == "__main__":
    B, T = 2, 8
    VOCAB, EMBED, HIDDEN, OUT = 100, 128, 128, 128

    key = jax.random.PRNGKey(0)
    k_params, k_x = jax.random.split(key)
    params = init_params(k_params, VOCAB, EMBED, HIDDEN, OUT)
    x = jax.random.randint(k_x, (B, T), 0, VOCAB, dtype=jnp.int32)

    out = lstm_classifier_forward(x, params)
    out = jax.block_until_ready(out)
    assert out.shape == (B, OUT) and out.dtype == jnp.float32
    assert bool(jnp.all(jnp.isfinite(out)))
    print("KERNEL_OK")
</pallas_src>

<mosaic_0001>
module attributes {stable_mosaic.version = 11 : i64} {
  func.func @_lstm_classifier_kernel(%arg0: i32, %arg1: memref<64x128xbf16, #tpu.memory_space<vmem>>, %arg2: memref<64x128xbf16, #tpu.memory_space<vmem>>, %arg3: memref<128x512xbf16, #tpu.memory_space<vmem>>, %arg4: memref<128x512xbf16, #tpu.memory_space<vmem>>, %arg5: memref<1x512xf32, #tpu.memory_space<vmem>>, %arg6: memref<1x512xf32, #tpu.memory_space<vmem>>, %arg7: memref<256x1024xbf16, #tpu.memory_space<vmem>>, %arg8: memref<512x128xbf16, #tpu.memory_space<vmem>>, %arg9: memref<1x128xf32, #tpu.memory_space<vmem>>, %arg10: memref<8x128xf32, #tpu.memory_space<vmem>>, %arg11: memref<64x512xbf16, #tpu.memory_space<vmem>>, %arg12: memref<64x512xbf16, #tpu.memory_space<vmem>>, %arg13: memref<8x8x128xf32, #tpu.memory_space<vmem>>) attributes {dimension_semantics = [#tpu.dimension_semantics<arbitrary>], iteration_bounds = array<i64: 1>, scalar_prefetch = 0 : i64, scratch_operands = 3 : i64, tpu.core_type = #tpu.core_type<tc>, window_params = [{transform_indices = @transform_0, window_bounds = array<i64: 64, 128>}, {transform_indices = @transform_1, window_bounds = array<i64: 64, 128>}, {pipeline_mode = #tpu.pipeline_mode<synchronous>, transform_indices = @transform_2, window_bounds = array<i64: 128, 512>}, {pipeline_mode = #tpu.pipeline_mode<synchronous>, transform_indices = @transform_3, window_bounds = array<i64: 128, 512>}, {pipeline_mode = #tpu.pipeline_mode<synchronous>, transform_indices = @transform_4, window_bounds = array<i64: 1, 512>}, {pipeline_mode = #tpu.pipeline_mode<synchronous>, transform_indices = @transform_5, window_bounds = array<i64: 1, 512>}, {pipeline_mode = #tpu.pipeline_mode<synchronous>, transform_indices = @transform_6, window_bounds = array<i64: 256, 1024>}, {pipeline_mode = #tpu.pipeline_mode<synchronous>, transform_indices = @transform_7, window_bounds = array<i64: 512, 128>}, {pipeline_mode = #tpu.pipeline_mode<synchronous>, transform_indices = @transform_8, window_bounds = array<i64: 1, 128>}, {pipeline_mode = #tpu.pipeline_mode<synchronous>, transform_indices = @transform_9, window_bounds = array<i64: 8, 128>}]} {
    %c0_i32 = arith.constant 0 : i32
    %0 = arith.cmpi eq, %arg0, %c0_i32 : i32
    %1 = arith.extui %0 : i1 to i32
    %c0_i32_0 = arith.constant 0 : i32
    %2 = arith.cmpi ne, %1, %c0_i32_0 : i32
    scf.if %2 {
      %cst_127 = arith.constant 0.000000e+00 : f32
      %495 = vector.broadcast %cst_127 : f32 to vector<8x8x128xf32>
      %c0_128 = arith.constant 0 : index
      %c0_129 = arith.constant 0 : index
      %c0_130 = arith.constant 0 : index
      %496 = vector.load %arg13[%c0_128, %c0_129, %c0_130] : memref<8x8x128xf32, #tpu.memory_space<vmem>>, vector<8x8x128xf32>
      tpu.vector_store %arg13[%c0_128, %c0_129, %c0_130], %495 {strides = array<i32>} : memref<8x8x128xf32, #tpu.memory_space<vmem>>, vector<8x8x128xf32>,
      %cst_131 = arith.constant 0xFF800000 : f32
      %497 = vector.broadcast %cst_131 : f32 to vector<8x128xf32>
      %c3_132 = arith.constant 3 : index
      %c0_133 = arith.constant 0 : index
      %c0_134 = arith.constant 0 : index
      %498 = vector.load %arg13[%c3_132, %c0_133, %c0_134] : memref<8x8x128xf32, #tpu.memory_space<vmem>>, vector<1x8x128xf32>
      %499 = vector.shape_cast %498 : vector<1x8x128xf32> to vector<8x128xf32>
      %500 = vector.shape_cast %497 : vector<8x128xf32> to vector<1x8x128xf32>
      tpu.vector_store %arg13[%c3_132, %c0_133, %c0_134], %500 {strides = array<i32>} : memref<8x8x128xf32, #tpu.memory_space<vmem>>, vector<1x8x128xf32>,
      %cst_135 = arith.constant 0xFF800000 : f32
      %501 = vector.broadcast %cst_135 : f32 to vector<8x128xf32>
      %c7_136 = arith.constant 7 : index
      %c0_137 = arith.constant 0 : index
      %c0_138 = arith.constant 0 : index
      %502 = vector.load %arg13[%c7_136, %c0_137, %c0_138] : memref<8x8x128xf32, #tpu.memory_space<vmem>>, vector<1x8x128xf32>
      %503 = vector.shape_cast %502 : vector<1x8x128xf32> to vector<8x128xf32>
      %504 = vector.shape_cast %501 : vector<8x128xf32> to vector<1x8x128xf32>
      tpu.vector_store %arg13[%c7_136, %c0_137, %c0_138], %504 {strides = array<i32>} : memref<8x8x128xf32, #tpu.memory_space<vmem>>, vector<1x8x128xf32>,
    } else {
    }
    %c0 = arith.constant 0 : index
    %c0_1 = arith.constant 0 : index
    %3 = vector.load %arg1[%c0, %c0_1] : memref<64x128xbf16, #tpu.memory_space<vmem>>, vector<64x128xbf16>
    %c0_2 = arith.constant 0 : index
    %c0_3 = arith.constant 0 : index
    %4 = vector.load %arg3[%c0_2, %c0_3] : memref<128x512xbf16, #tpu.memory_space<vmem>>, vector<128x512xbf16>
    %cst = arith.constant dense<0.000000e+00> : vector<64x512xf32>
    %5 = tpu.matmul %3, %4, %cst {dimension_numbers = #tpu.dot_dimension_numbers<[1], [0], [0], [1], [0, 0, 1, 1], [], []>} : vector<64x128xbf16>, vector<128x512xbf16>, vector<64x512xf32> -> vector<64x512xf32>
    %c0_4 = arith.constant 0 : index
    %c0_5 = arith.constant 0 : index
    %6 = vector.load %arg5[%c0_4, %c0_5] : memref<1x512xf32, #tpu.memory_space<vmem>>, vector<1x512xf32>
    %7 = vector.broadcast %6 : vector<1x512xf32> to vector<64x512xf32>
    %8 = arith.addf %5, %7 : vector<64x512xf32>
    %9 = arith.truncf %8 : vector<64x512xf32> to vector<64x512xbf16>
    %c0_6 = arith.constant 0 : index
    %c0_7 = arith.constant 0 : index
    %10 = vector.load %arg11[%c0_6, %c0_7] : memref<64x512xbf16, #tpu.memory_space<vmem>>, vector<64x512xbf16>
    tpu.vector_store %arg11[%c0_6, %c0_7], %9 {strides = array<i32>} : memref<64x512xbf16, #tpu.memory_space<vmem>>, vector<64x512xbf16>,
    %c0_8 = arith.constant 0 : index
    %c0_9 = arith.constant 0 : index
    %11 = vector.load %arg2[%c0_8, %c0_9] : memref<64x128xbf16, #tpu.memory_space<vmem>>, vector<64x128xbf16>
    %c0_10 = arith.constant 0 : index
    %c0_11 = arith.constant 0 : index
    %12 = vector.load %arg4[%c0_10, %c0_11] : memref<128x512xbf16, #tpu.memory_space<vmem>>, vector<128x512xbf16>
    %cst_12 = arith.constant dense<0.000000e+00> : vector<64x512xf32>
    %13 = tpu.matmul %11, %12, %cst_12 {dimension_numbers = #tpu.dot_dimension_numbers<[1], [0], [0], [1], [0, 0, 1, 1], [], []>} : vector<64x128xbf16>, vector<128x512xbf16>, vector<64x512xf32> -> vector<64x512xf32>
    %c0_13 = arith.constant 0 : index
    %c0_14 = arith.constant 0 : index
    %14 = vector.load %arg6[%c0_13, %c0_14] : memref<1x512xf32, #tpu.memory_space<vmem>>, vector<1x512xf32>
    %15 = vector.broadcast %14 : vector<1x512xf32> to vector<64x512xf32>
    %16 = arith.addf %13, %15 : vector<64x512xf32>
    %17 = arith.truncf %16 : vector<64x512xf32> to vector<64x512xbf16>
    %c0_15 = arith.constant 0 : index
    %c0_16 = arith.constant 0 : index
    %18 = vector.load %arg12[%c0_15, %c0_16] : memref<64x512xbf16, #tpu.memory_space<vmem>>, vector<64x512xbf16>
    tpu.vector_store %arg12[%c0_15, %c0_16], %17 {strides = array<i32>} : memref<64x512xbf16, #tpu.memory_space<vmem>>, vector<64x512xbf16>,
    %c0_17 = arith.constant 0 : index
    %c0_18 = arith.constant 0 : index
    %19 = vector.load %arg7[%c0_17, %c0_18] : memref<256x1024xbf16, #tpu.memory_space<vmem>>, vector<256x1024xbf16>
    %c0_19 = arith.constant 0 : index
    %c0_20 = arith.constant 0 : index
    %c0_21 = arith.constant 0 : index
    %20 = vector.load %arg13[%c0_19, %c0_20, %c0_21] : memref<8x8x128xf32, #tpu.memory_space<vmem>>, vector<1x8x128xf32>
    %21 = vector.shape_cast %20 : vector<1x8x128xf32> to vector<8x128xf32>
    %c1 = arith.constant 1 : index
    %c0_22 = arith.constant 0 : index
    %c0_23 = arith.constant 0 : index
    %22 = vector.load %arg13[%c1, %c0_22, %c0_23] : memref<8x8x128xf32, #tpu.memory_space<vmem>>, vector<1x8x128xf32>
    %23 = vector.shape_cast %22 : vector<1x8x128xf32> to vector<8x128xf32>
    %c2 = arith.constant 2 : index
    %c0_24 = arith.constant 0 : index
    %c0_25 = arith.constant 0 : index
    %24 = vector.load %arg13[%c2, %c0_24, %c0_25] : memref<8x8x128xf32, #tpu.memory_space<vmem>>, vector<1x8x128xf32>
    %25 = vector.shape_cast %24 : vector<1x8x128xf32> to vector<8x128xf32>
    %c3 = arith.constant 3 : index
    %c0_26 = arith.constant 0 : index
    %c0_27 = arith.constant 0 : index
    %26 = vector.load %arg13[%c3, %c0_26, %c0_27] : memref<8x8x128xf32, #tpu.memory_space<vmem>>, vector<1x8x128xf32>
    %27 = vector.shape_cast %26 : vector<1x8x128xf32> to vector<8x128xf32>
    %c4 = arith.constant 4 : index
    %c0_28 = arith.constant 0 : index
    %c0_29 = arith.constant 0 : index
    %28 = vector.load %arg13[%c4, %c0_28, %c0_29] : memref<8x8x128xf32, #tpu.memory_space<vmem>>, vector<1x8x128xf32>
    %29 = vector.shape_cast %28 : vector<1x8x128xf32> to vector<8x128xf32>
    %c5 = arith.constant 5 : index
    %c0_30 = arith.constant 0 : index
    %c0_31 = arith.constant 0 : index
    %30 = vector.load %arg13[%c5, %c0_30, %c0_31] : memref<8x8x128xf32, #tpu.memory_space<vmem>>, vector<1x8x128xf32>
    %31 = vector.shape_cast %30 : vector<1x8x128xf32> to vector<8x128xf32>
    %c6 = arith.constant 6 : index
    %c0_32 = arith.constant 0 : index
    %c0_33 = arith.constant 0 : index
    %32 = vector.load %arg13[%c6, %c0_32, %c0_33] : memref<8x8x128xf32, #tpu.memory_space<vmem>>, vector<1x8x128xf32>
    %33 = vector.shape_cast %32 : vector<1x8x128xf32> to vector<8x128xf32>
    %c7 = arith.constant 7 : index
    %c0_34 = arith.constant 0 : index
    %c0_35 = arith.constant 0 : index
    %34 = vector.load %arg13[%c7, %c0_34, %c0_35] : memref<8x8x128xf32, #tpu.memory_space<vmem>>, vector<1x8x128xf32>
    %35 = vector.shape_cast %34 : vector<1x8x128xf32> to vector<8x128xf32>
    %c0_i32_36 = arith.constant 0 : i32
    %36 = tpu.concatenate %21, %29 in 1 : vector<8x128xf32>, vector<8x128xf32> -> vector<8x256xf32>
    %37 = arith.truncf %36 : vector<8x256xf32> to vector<8x256xbf16>
    %cst_37 = arith.constant dense<0.000000e+00> : vector<8x1024xf32>
    %38 = tpu.matmul %37, %19, %cst_37 {dimension_numbers = #tpu.dot_dimension_numbers<[1], [0], [0], [1], [0, 0, 1, 1], [], []>} : vector<8x256xbf16>, vector<256x1024xbf16>, vector<8x1024xf32> -> vector<8x1024xf32>
    %c8_i32 = arith.constant 8 : i32
    %39 = arith.muli %c0_i32_36, %c8_i32 : i32
    %40 = tpu.assume_multiple %39, 8 : i32
    %c7_i32 = arith.constant 7 : i32
    %41 = arith.subi %c7_i32, %c0_i32_36 : i32
    %c8_i32_38 = arith.constant 8 : i32
    %42 = arith.muli %41, %c8_i32_38 : i32
    %43 = tpu.assume_multiple %42, 8 : i32
    %44 = arith.index_cast %40 : i32 to index
    %c0_39 = arith.constant 0 : index
    %45 = vector.load %arg11[%44, %c0_39] : memref<64x512xbf16, #tpu.memory_space<vmem>>, vector<8x512xbf16>
    %46 = vector.extract_strided_slice %38 {offsets = [0, 0], sizes = [8, 512], strides = [1, 1]} : vector<8x1024xf32> to vector<8x512xf32>
    %47 = arith.extf %45 : vector<8x512xbf16> to vector<8x512xf32>
    %48 = arith.addf %47, %46 : vector<8x512xf32>
    %49 = arith.index_cast %43 : i32 to index
    %c0_40 = arith.constant 0 : index
    %50 = vector.load %arg12[%49, %c0_40] : memref<64x512xbf16, #tpu.memory_space<vmem>>, vector<8x512xbf16>
    %51 = vector.extract_strided_slice %38 {offsets = [0, 512], sizes = [8, 512], strides = [1, 1]} : vector<8x1024xf32> to vector<8x512xf32>
    %52 = arith.extf %50 : vector<8x512xbf16> to vector<8x512xf32>
    %53 = arith.addf %52, %51 : vector<8x512xf32>
    %54 = vector.extract_strided_slice %48 {offsets = [0, 0], sizes = [8, 384], strides = [1, 1]} : vector<8x512xf32> to vector<8x384xf32>
    %55 = arith.negf %54 : vector<8x384xf32>
    %56 = math.exp %55 : vector<8x384xf32>
    %cst_41 = arith.constant 1.000000e+00 : f32
    %57 = vector.broadcast %cst_41 : f32 to vector<8x384xf32>
    %58 = arith.addf %57, %56 : vector<8x384xf32>
    %59 = arith.divf %57, %58 : vector<8x384xf32>
    %60 = vector.extract_strided_slice %48 {offsets = [0, 384], sizes = [8, 128], strides = [1, 1]} : vector<8x512xf32> to vector<8x128xf32>
    %61 = math.tanh %60 : vector<8x128xf32>
    %62 = vector.extract_strided_slice %59 {offsets = [0, 128], sizes = [8, 128], strides = [1, 1]} : vector<8x384xf32> to vector<8x128xf32>
    %63 = arith.mulf %62, %23 : vector<8x128xf32>
    %64 = vector.extract_strided_slice %59 {offsets = [0, 0], sizes = [8, 128], strides = [1, 1]} : vector<8x384xf32> to vector<8x128xf32>
    %65 = arith.mulf %64, %61 : vector<8x128xf32>
    %66 = arith.addf %63, %65 : vector<8x128xf32>
    %67 = vector.extract_strided_slice %59 {offsets = [0, 256], sizes = [8, 128], strides = [1, 1]} : vector<8x384xf32> to vector<8x128xf32>
    %68 = math.tanh %66 : vector<8x128xf32>
    %69 = arith.mulf %67, %68 : vector<8x128xf32>
    %70 = vector.extract_strided_slice %53 {offsets = [0, 0], sizes = [8, 384], strides = [1, 1]} : vector<8x512xf32> to vector<8x384xf32>
    %71 = arith.negf %70 : vector<8x384xf32>
    %72 = math.exp %71 : vector<8x384xf32>
    %cst_42 = arith.constant 1.000000e+00 : f32
    %73 = vector.broadcast %cst_42 : f32 to vector<8x384xf32>
    %74 = arith.addf %73, %72 : vector<8x384xf32>
    %75 = arith.divf %73, %74 : vector<8x384xf32>
    %76 = vector.extract_strided_slice %53 {offsets = [0, 384], sizes = [8, 128], strides = [1, 1]} : vector<8x512xf32> to vector<8x128xf32>
    %77 = math.tanh %76 : vector<8x128xf32>
    %78 = vector.extract_strided_slice %75 {offsets = [0, 128], sizes = [8, 128], strides = [1, 1]} : vector<8x384xf32> to vector<8x128xf32>
    %79 = arith.mulf %78, %31 : vector<8x128xf32>
    %80 = vector.extract_strided_slice %75 {offsets = [0, 0], sizes = [8, 128], strides = [1, 1]} : vector<8x384xf32> to vector<8x128xf32>
    %81 = arith.mulf %80, %77 : vector<8x128xf32>
    %82 = arith.addf %79, %81 : vector<8x128xf32>
    %83 = vector.extract_strided_slice %75 {offsets = [0, 256], sizes = [8, 128], strides = [1, 1]} : vector<8x384xf32> to vector<8x128xf32>
    %84 = math.tanh %82 : vector<8x128xf32>
    %85 = arith.mulf %83, %84 : vector<8x128xf32>
    %86 = arith.addf %25, %69 : vector<8x128xf32>
    %87 = arith.maximumf %27, %69 : vector<8x128xf32>
    %88 = arith.addf %33, %85 : vector<8x128xf32>
    %89 = arith.maximumf %35, %85 : vector<8x128xf32>
    %c1_i32 = arith.constant 1 : i32
    %90 = tpu.concatenate %69, %85 in 1 : vector<8x128xf32>, vector<8x128xf32> -> vector<8x256xf32>
    %91 = arith.truncf %90 : vector<8x256xf32> to vector<8x256xbf16>
    %cst_43 = arith.constant dense<0.000000e+00> : vector<8x1024xf32>
    %92 = tpu.matmul %91, %19, %cst_43 {dimension_numbers = #tpu.dot_dimension_numbers<[1], [0], [0], [1], [0, 0, 1, 1], [], []>} : vector<8x256xbf16>, vector<256x1024xbf16>, vector<8x1024xf32> -> vector<8x1024xf32>
    %c8_i32_44 = arith.constant 8 : i32
    %93 = arith.muli %c1_i32, %c8_i32_44 : i32
    %94 = tpu.assume_multiple %93, 8 : i32
    %c7_i32_45 = arith.constant 7 : i32
    %95 = arith.subi %c7_i32_45, %c1_i32 : i32
    %c8_i32_46 = arith.constant 8 : i32
    %96 = arith.muli %95, %c8_i32_46 : i32
    %97 = tpu.assume_multiple %96, 8 : i32
    %98 = arith.index_cast %94 : i32 to index
    %c0_47 = arith.constant 0 : index
    %99 = vector.load %arg11[%98, %c0_47] : memref<64x512xbf16, #tpu.memory_space<vmem>>, vector<8x512xbf16>
    %100 = vector.extract_strided_slice %92 {offsets = [0, 0], sizes = [8, 512], strides = [1, 1]} : vector<8x1024xf32> to vector<8x512xf32>
    %101 = arith.extf %99 : vector<8x512xbf16> to vector<8x512xf32>
    %102 = arith.addf %101, %100 : vector<8x512xf32>
    %103 = arith.index_cast %97 : i32 to index
    %c0_48 = arith.constant 0 : index
    %104 = vector.load %arg12[%103, %c0_48] : memref<64x512xbf16, #tpu.memory_space<vmem>>, vector<8x512xbf16>
    %105 = vector.extract_strided_slice %92 {offsets = [0, 512], sizes = [8, 512], strides = [1, 1]} : vector<8x1024xf32> to vector<8x512xf32>
    %106 = arith.extf %104 : vector<8x512xbf16> to vector<8x512xf32>
    %107 = arith.addf %106, %105 : vector<8x512xf32>
    %108 = vector.extract_strided_slice %102 {offsets = [0, 0], sizes = [8, 384], strides = [1, 1]} : vector<8x512xf32> to vector<8x384xf32>
    %109 = arith.negf %108 : vector<8x384xf32>
    %110 = math.exp %109 : vector<8x384xf32>
    %cst_49 = arith.constant 1.000000e+00 : f32
    %111 = vector.broadcast %cst_49 : f32 to vector<8x384xf32>
    %112 = arith.addf %111, %110 : vector<8x384xf32>
    %113 = arith.divf %111, %112 : vector<8x384xf32>
    %114 = vector.extract_strided_slice %102 {offsets = [0, 384], sizes = [8, 128], strides = [1, 1]} : vector<8x512xf32> to vector<8x128xf32>
    %115 = math.tanh %114 : vector<8x128xf32>
    %116 = vector.extract_strided_slice %113 {offsets = [0, 128], sizes = [8, 128], strides = [1, 1]} : vector<8x384xf32> to vector<8x128xf32>
    %117 = arith.mulf %116, %66 : vector<8x128xf32>
    %118 = vector.extract_strided_slice %113 {offsets = [0, 0], sizes = [8, 128], strides = [1, 1]} : vector<8x384xf32> to vector<8x128xf32>
    %119 = arith.mulf %118, %115 : vector<8x128xf32>
    %120 = arith.addf %117, %119 : vector<8x128xf32>
    %121 = vector.extract_strided_slice %113 {offsets = [0, 256], sizes = [8, 128], strides = [1, 1]} : vector<8x384xf32> to vector<8x128xf32>
    %122 = math.tanh %120 : vector<8x128xf32>
    %123 = arith.mulf %121, %122 : vector<8x128xf32>
    %124 = vector.extract_strided_slice %107 {offsets = [0, 0], sizes = [8, 384], strides = [1, 1]} : vector<8x512xf32> to vector<8x384xf32>
    %125 = arith.negf %124 : vector<8x384xf32>
    %126 = math.exp %125 : vector<8x384xf32>
    %cst_50 = arith.constant 1.000000e+00 : f32
    %127 = vector.broadcast %cst_50 : f32 to vector<8x384xf32>
    %128 = arith.addf %127, %126 : vector<8x384xf32>
    %129 = arith.divf %127, %128 : vector<8x384xf32>
    %130 = vector.extract_strided_slice %107 {offsets = [0, 384], sizes = [8, 128], strides = [1, 1]} : vector<8x512xf32> to vector<8x128xf32>
    %131 = math.tanh %130 : vector<8x128xf32>
    %132 = vector.extract_strided_slice %129 {offsets = [0, 128], sizes = [8, 128], strides = [1, 1]} : vector<8x384xf32> to vector<8x128xf32>
    %133 = arith.mulf %132, %82 : vector<8x128xf32>
    %134 = vector.extract_strided_slice %129 {offsets = [0, 0], sizes = [8, 128], strides = [1, 1]} : vector<8x384xf32> to vector<8x128xf32>
    %135 = arith.mulf %134, %131 : vector<8x128xf32>
    %136 = arith.addf %133, %135 : vector<8x128xf32>
    %137 = vector.extract_strided_slice %129 {offsets = [0, 256], sizes = [8, 128], strides = [1, 1]} : vector<8x384xf32> to vector<8x128xf32>
    %138 = math.tanh %136 : vector<8x128xf32>
    %139 = arith.mulf %137, %138 : vector<8x128xf32>
    %140 = arith.addf %86, %123 : vector<8x128xf32>
    %141 = arith.maximumf %87, %123 : vector<8x128xf32>
    %142 = arith.addf %88, %139 : vector<8x128xf32>
    %143 = arith.maximumf %89, %139 : vector<8x128xf32>
    %c2_i32 = arith.constant 2 : i32
    %144 = tpu.concatenate %123, %139 in 1 : vector<8x128xf32>, vector<8x128xf32> -> vector<8x256xf32>
    %145 = arith.truncf %144 : vector<8x256xf32> to vector<8x256xbf16>
    %cst_51 = arith.constant dense<0.000000e+00> : vector<8x1024xf32>
    %146 = tpu.matmul %145, %19, %cst_51 {dimension_numbers = #tpu.dot_dimension_numbers<[1], [0], [0], [1], [0, 0, 1, 1], [], []>} : vector<8x256xbf16>, vector<256x1024xbf16>, vector<8x1024xf32> -> vector<8x1024xf32>
    %c8_i32_52 = arith.constant 8 : i32
    %147 = arith.muli %c2_i32, %c8_i32_52 : i32
    %148 = tpu.assume_multiple %147, 8 : i32
    %c7_i32_53 = arith.constant 7 : i32
    %149 = arith.subi %c7_i32_53, %c2_i32 : i32
    %c8_i32_54 = arith.constant 8 : i32
    %150 = arith.muli %149, %c8_i32_54 : i32
    %151 = tpu.assume_multiple %150, 8 : i32
    %152 = arith.index_cast %148 : i32 to index
    %c0_55 = arith.constant 0 : index
    %153 = vector.load %arg11[%152, %c0_55] : memref<64x512xbf16, #tpu.memory_space<vmem>>, vector<8x512xbf16>
    %154 = vector.extract_strided_slice %146 {offsets = [0, 0], sizes = [8, 512], strides = [1, 1]} : vector<8x1024xf32> to vector<8x512xf32>
    %155 = arith.extf %153 : vector<8x512xbf16> to vector<8x512xf32>
    %156 = arith.addf %155, %154 : vector<8x512xf32>
    %157 = arith.index_cast %151 : i32 to index
    %c0_56 = arith.constant 0 : index
    %158 = vector.load %arg12[%157, %c0_56] : memref<64x512xbf16, #tpu.memory_space<vmem>>, vector<8x512xbf16>
    %159 = vector.extract_strided_slice %146 {offsets = [0, 512], sizes = [8, 512], strides = [1, 1]} : vector<8x1024xf32> to vector<8x512xf32>
    %160 = arith.extf %158 : vector<8x512xbf16> to vector<8x512xf32>
    %161 = arith.addf %160, %159 : vector<8x512xf32>
    %162 = vector.extract_strided_slice %156 {offsets = [0, 0], sizes = [8, 384], strides = [1, 1]} : vector<8x512xf32> to vector<8x384xf32>
    %163 = arith.negf %162 : vector<8x384xf32>
    %164 = math.exp %163 : vector<8x384xf32>
    %cst_57 = arith.constant 1.000000e+00 : f32
    %165 = vector.broadcast %cst_57 : f32 to vector<8x384xf32>
    %166 = arith.addf %165, %164 : vector<8x384xf32>
    %167 = arith.divf %165, %166 : vector<8x384xf32>
    %168 = vector.extract_strided_slice %156 {offsets = [0, 384], sizes = [8, 128], strides = [1, 1]} : vector<8x512xf32> to vector<8x128xf32>
    %169 = math.tanh %168 : vector<8x128xf32>
    %170 = vector.extract_strided_slice %167 {offsets = [0, 128], sizes = [8, 128], strides = [1, 1]} : vector<8x384xf32> to vector<8x128xf32>
    %171 = arith.mulf %170, %120 : vector<8x128xf32>
    %172 = vector.extract_strided_slice %167 {offsets = [0, 0], sizes = [8, 128], strides = [1, 1]} : vector<8x384xf32> to vector<8x128xf32>
    %173 = arith.mulf %172, %169 : vector<8x128xf32>
    %174 = arith.addf %171, %173 : vector<8x128xf32>
    %175 = vector.extract_strided_slice %167 {offsets = [0, 256], sizes = [8, 128], strides = [1, 1]} : vector<8x384xf32> to vector<8x128xf32>
    %176 = math.tanh %174 : vector<8x128xf32>
    %177 = arith.mulf %175, %176 : vector<8x128xf32>
    %178 = vector.extract_strided_slice %161 {offsets = [0, 0], sizes = [8, 384], strides = [1, 1]} : vector<8x512xf32> to vector<8x384xf32>
    %179 = arith.negf %178 : vector<8x384xf32>
    %180 = math.exp %179 : vector<8x384xf32>
    %cst_58 = arith.constant 1.000000e+00 : f32
    %181 = vector.broadcast %cst_58 : f32 to vector<8x384xf32>
    %182 = arith.addf %181, %180 : vector<8x384xf32>
    %183 = arith.divf %181, %182 : vector<8x384xf32>
    %184 = vector.extract_strided_slice %161 {offsets = [0, 384], sizes = [8, 128], strides = [1, 1]} : vector<8x512xf32> to vector<8x128xf32>
    %185 = math.tanh %184 : vector<8x128xf32>
    %186 = vector.extract_strided_slice %183 {offsets = [0, 128], sizes = [8, 128], strides = [1, 1]} : vector<8x384xf32> to vector<8x128xf32>
    %187 = arith.mulf %186, %136 : vector<8x128xf32>
    %188 = vector.extract_strided_slice %183 {offsets = [0, 0], sizes = [8, 128], strides = [1, 1]} : vector<8x384xf32> to vector<8x128xf32>
    %189 = arith.mulf %188, %185 : vector<8x128xf32>
    %190 = arith.addf %187, %189 : vector<8x128xf32>
    %191 = vector.extract_strided_slice %183 {offsets = [0, 256], sizes = [8, 128], strides = [1, 1]} : vector<8x384xf32> to vector<8x128xf32>
    %192 = math.tanh %190 : vector<8x128xf32>
    %193 = arith.mulf %191, %192 : vector<8x128xf32>
    %194 = arith.addf %140, %177 : vector<8x128xf32>
    %195 = arith.maximumf %141, %177 : vector<8x128xf32>
    %196 = arith.addf %142, %193 : vector<8x128xf32>
    %197 = arith.maximumf %143, %193 : vector<8x128xf32>
    %c3_i32 = arith.constant 3 : i32
    %198 = tpu.concatenate %177, %193 in 1 : vector<8x128xf32>, vector<8x128xf32> -> vector<8x256xf32>
    %199 = arith.truncf %198 : vector<8x256xf32> to vector<8x256xbf16>
    %cst_59 = arith.constant dense<0.000000e+00> : vector<8x1024xf32>
    %200 = tpu.matmul %199, %19, %cst_59 {dimension_numbers = #tpu.dot_dimension_numbers<[1], [0], [0], [1], [0, 0, 1, 1], [], []>} : vector<8x256xbf16>, vector<256x1024xbf16>, vector<8x1024xf32> -> vector<8x1024xf32>
    %c8_i32_60 = arith.constant 8 : i32
    %201 = arith.muli %c3_i32, %c8_i32_60 : i32
    %202 = tpu.assume_multiple %201, 8 : i32
    %c7_i32_61 = arith.constant 7 : i32
    %203 = arith.subi %c7_i32_61, %c3_i32 : i32
    %c8_i32_62 = arith.constant 8 : i32
    %204 = arith.muli %203, %c8_i32_62 : i32
    %205 = tpu.assume_multiple %204, 8 : i32
    %206 = arith.index_cast %202 : i32 to index
    %c0_63 = arith.constant 0 : index
    %207 = vector.load %arg11[%206, %c0_63] : memref<64x512xbf16, #tpu.memory_space<vmem>>, vector<8x512xbf16>
    %208 = vector.extract_strided_slice %200 {offsets = [0, 0], sizes = [8, 512], strides = [1, 1]} : vector<8x1024xf32> to vector<8x512xf32>
    %209 = arith.extf %207 : vector<8x512xbf16> to vector<8x512xf32>
    %210 = arith.addf %209, %208 : vector<8x512xf32>
    %211 = arith.index_cast %205 : i32 to index
    %c0_64 = arith.constant 0 : index
    %212 = vector.load %arg12[%211, %c0_64] : memref<64x512xbf16, #tpu.memory_space<vmem>>, vector<8x512xbf16>
    %213 = vector.extract_strided_slice %200 {offsets = [0, 512], sizes = [8, 512], strides = [1, 1]} : vector<8x1024xf32> to vector<8x512xf32>
    %214 = arith.extf %212 : vector<8x512xbf16> to vector<8x512xf32>
    %215 = arith.addf %214, %213 : vector<8x512xf32>
    %216 = vector.extract_strided_slice %210 {offsets = [0, 0], sizes = [8, 384], strides = [1, 1]} : vector<8x512xf32> to vector<8x384xf32>
    %217 = arith.negf %216 : vector<8x384xf32>
    %218 = math.exp %217 : vector<8x384xf32>
    %cst_65 = arith.constant 1.000000e+00 : f32
    %219 = vector.broadcast %cst_65 : f32 to vector<8x384xf32>
    %220 = arith.addf %219, %218 : vector<8x384xf32>
    %221 = arith.divf %219, %220 : vector<8x384xf32>
    %222 = vector.extract_strided_slice %210 {offsets = [0, 384], sizes = [8, 128], strides = [1, 1]} : vector<8x512xf32> to vector<8x128xf32>
    %223 = math.tanh %222 : vector<8x128xf32>
    %224 = vector.extract_strided_slice %221 {offsets = [0, 128], sizes = [8, 128], strides = [1, 1]} : vector<8x384xf32> to vector<8x128xf32>
    %225 = arith.mulf %224, %174 : vector<8x128xf32>
    %226 = vector.extract_strided_slice %221 {offsets = [0, 0], sizes = [8, 128], strides = [1, 1]} : vector<8x384xf32> to vector<8x128xf32>
    %227 = arith.mulf %226, %223 : vector<8x128xf32>
    %228 = arith.addf %225, %227 : vector<8x128xf32>
    %229 = vector.extract_strided_slice %221 {offsets = [0, 256], sizes = [8, 128], strides = [1, 1]} : vector<8x384xf32> to vector<8x128xf32>
    %230 = math.tanh %228 : vector<8x128xf32>
    %231 = arith.mulf %229, %230 : vector<8x128xf32>
    %232 = vector.extract_strided_slice %215 {offsets = [0, 0], sizes = [8, 384], strides = [1, 1]} : vector<8x512xf32> to vector<8x384xf32>
    %233 = arith.negf %232 : vector<8x384xf32>
    %234 = math.exp %233 : vector<8x384xf32>
    %cst_66 = arith.constant 1.000000e+00 : f32
    %235 = vector.broadcast %cst_66 : f32 to vector<8x384xf32>
    %236 = arith.addf %235, %234 : vector<8x384xf32>
    %237 = arith.divf %235, %236 : vector<8x384xf32>
    %238 = vector.extract_strided_slice %215 {offsets = [0, 384], sizes = [8, 128], strides = [1, 1]} : vector<8x512xf32> to vector<8x128xf32>
    %239 = math.tanh %238 : vector<8x128xf32>
    %240 = vector.extract_strided_slice %237 {offsets = [0, 128], sizes = [8, 128], strides = [1, 1]} : vector<8x384xf32> to vector<8x128xf32>
    %241 = arith.mulf %240, %190 : vector<8x128xf32>
    %242 = vector.extract_strided_slice %237 {offsets = [0, 0], sizes = [8, 128], strides = [1, 1]} : vector<8x384xf32> to vector<8x128xf32>
    %243 = arith.mulf %242, %239 : vector<8x128xf32>
    %244 = arith.addf %241, %243 : vector<8x128xf32>
    %245 = vector.extract_strided_slice %237 {offsets = [0, 256], sizes = [8, 128], strides = [1, 1]} : vector<8x384xf32> to vector<8x128xf32>
    %246 = math.tanh %244 : vector<8x128xf32>
    %247 = arith.mulf %245, %246 : vector<8x128xf32>
    %248 = arith.addf %194, %231 : vector<8x128xf32>
    %249 = arith.maximumf %195, %231 : vector<8x128xf32>
    %250 = arith.addf %196, %247 : vector<8x128xf32>
    %251 = arith.maximumf %197, %247 : vector<8x128xf32>
    %c4_i32 = arith.constant 4 : i32
    %252 = tpu.concatenate %231, %247 in 1 : vector<8x128xf32>, vector<8x128xf32> -> vector<8x256xf32>
    %253 = arith.truncf %252 : vector<8x256xf32> to vector<8x256xbf16>
    %cst_67 = arith.constant dense<0.000000e+00> : vector<8x1024xf32>
    %254 = tpu.matmul %253, %19, %cst_67 {dimension_numbers = #tpu.dot_dimension_numbers<[1], [0], [0], [1], [0, 0, 1, 1], [], []>} : vector<8x256xbf16>, vector<256x1024xbf16>, vector<8x1024xf32> -> vector<8x1024xf32>
    %c8_i32_68 = arith.constant 8 : i32
    %255 = arith.muli %c4_i32, %c8_i32_68 : i32
    %256 = tpu.assume_multiple %255, 8 : i32
    %c7_i32_69 = arith.constant 7 : i32
    %257 = arith.subi %c7_i32_69, %c4_i32 : i32
    %c8_i32_70 = arith.constant 8 : i32
    %258 = arith.muli %257, %c8_i32_70 : i32
    %259 = tpu.assume_multiple %258, 8 : i32
    %260 = arith.index_cast %256 : i32 to index
    %c0_71 = arith.constant 0 : index
    %261 = vector.load %arg11[%260, %c0_71] : memref<64x512xbf16, #tpu.memory_space<vmem>>, vector<8x512xbf16>
    %262 = vector.extract_strided_slice %254 {offsets = [0, 0], sizes = [8, 512], strides = [1, 1]} : vector<8x1024xf32> to vector<8x512xf32>
    %263 = arith.extf %261 : vector<8x512xbf16> to vector<8x512xf32>
    %264 = arith.addf %263, %262 : vector<8x512xf32>
    %265 = arith.index_cast %259 : i32 to index
    %c0_72 = arith.constant 0 : index
    %266 = vector.load %arg12[%265, %c0_72] : memref<64x512xbf16, #tpu.memory_space<vmem>>, vector<8x512xbf16>
    %267 = vector.extract_strided_slice %254 {offsets = [0, 512], sizes = [8, 512], strides = [1, 1]} : vector<8x1024xf32> to vector<8x512xf32>
    %268 = arith.extf %266 : vector<8x512xbf16> to vector<8x512xf32>
    %269 = arith.addf %268, %267 : vector<8x512xf32>
    %270 = vector.extract_strided_slice %264 {offsets = [0, 0], sizes = [8, 384], strides = [1, 1]} : vector<8x512xf32> to vector<8x384xf32>
    %271 = arith.negf %270 : vector<8x384xf32>
    %272 = math.exp %271 : vector<8x384xf32>
    %cst_73 = arith.constant 1.000000e+00 : f32
    %273 = vector.broadcast %cst_73 : f32 to vector<8x384xf32>
    %274 = arith.addf %273, %272 : vector<8x384xf32>
    %275 = arith.divf %273, %274 : vector<8x384xf32>
    %276 = vector.extract_strided_slice %264 {offsets = [0, 384], sizes = [8, 128], strides = [1, 1]} : vector<8x512xf32> to vector<8x128xf32>
    %277 = math.tanh %276 : vector<8x128xf32>
    %278 = vector.extract_strided_slice %275 {offsets = [0, 128], sizes = [8, 128], strides = [1, 1]} : vector<8x384xf32> to vector<8x128xf32>
    %279 = arith.mulf %278, %228 : vector<8x128xf32>
    %280 = vector.extract_strided_slice %275 {offsets = [0, 0], sizes = [8, 128], strides = [1, 1]} : vector<8x384xf32> to vector<8x128xf32>
    %281 = arith.mulf %280, %277 : vector<8x128xf32>
    %282 = arith.addf %279, %281 : vector<8x128xf32>
    %283 = vector.extract_strided_slice %275 {offsets = [0, 256], sizes = [8, 128], strides = [1, 1]} : vector<8x384xf32> to vector<8x128xf32>
    %284 = math.tanh %282 : vector<8x128xf32>
    %285 = arith.mulf %283, %284 : vector<8x128xf32>
    %286 = vector.extract_strided_slice %269 {offsets = [0, 0], sizes = [8, 384], strides = [1, 1]} : vector<8x512xf32> to vector<8x384xf32>
    %287 = arith.negf %286 : vector<8x384xf32>
    %288 = math.exp %287 : vector<8x384xf32>
    %cst_74 = arith.constant 1.000000e+00 : f32
    %289 = vector.broadcast %cst_74 : f32 to vector<8x384xf32>
    %290 = arith.addf %289, %288 : vector<8x384xf32>
    %291 = arith.divf %289, %290 : vector<8x384xf32>
    %292 = vector.extract_strided_slice %269 {offsets = [0, 384], sizes = [8, 128], strides = [1, 1]} : vector<8x512xf32> to vector<8x128xf32>
    %293 = math.tanh %292 : vector<8x128xf32>
    %294 = vector.extract_strided_slice %291 {offsets = [0, 128], sizes = [8, 128], strides = [1, 1]} : vector<8x384xf32> to vector<8x128xf32>
    %295 = arith.mulf %294, %244 : vector<8x128xf32>
    %296 = vector.extract_strided_slice %291 {offsets = [0, 0], sizes = [8, 128], strides = [1, 1]} : vector<8x384xf32> to vector<8x128xf32>
    %297 = arith.mulf %296, %293 : vector<8x128xf32>
    %298 = arith.addf %295, %297 : vector<8x128xf32>
    %299 = vector.extract_strided_slice %291 {offsets = [0, 256], sizes = [8, 128], strides = [1, 1]} : vector<8x384xf32> to vector<8x128xf32>
    %300 = math.tanh %298 : vector<8x128xf32>
    %301 = arith.mulf %299, %300 : vector<8x128xf32>
    %302 = arith.addf %248, %285 : vector<8x128xf32>
    %303 = arith.maximumf %249, %285 : vector<8x128xf32>
    %304 = arith.addf %250, %301 : vector<8x128xf32>
    %305 = arith.maximumf %251, %301 : vector<8x128xf32>
    %c5_i32 = arith.constant 5 : i32
    %306 = tpu.concatenate %285, %301 in 1 : vector<8x128xf32>, vector<8x128xf32> -> vector<8x256xf32>
    %307 = arith.truncf %306 : vector<8x256xf32> to vector<8x256xbf16>
    %cst_75 = arith.constant dense<0.000000e+00> : vector<8x1024xf32>
    %308 = tpu.matmul %307, %19, %cst_75 {dimension_numbers = #tpu.dot_dimension_numbers<[1], [0], [0], [1], [0, 0, 1, 1], [], []>} : vector<8x256xbf16>, vector<256x1024xbf16>, vector<8x1024xf32> -> vector<8x1024xf32>
    %c8_i32_76 = arith.constant 8 : i32
    %309 = arith.muli %c5_i32, %c8_i32_76 : i32
    %310 = tpu.assume_multiple %309, 8 : i32
    %c7_i32_77 = arith.constant 7 : i32
    %311 = arith.subi %c7_i32_77, %c5_i32 : i32
    %c8_i32_78 = arith.constant 8 : i32
    %312 = arith.muli %311, %c8_i32_78 : i32
    %313 = tpu.assume_multiple %312, 8 : i32
    %314 = arith.index_cast %310 : i32 to index
    %c0_79 = arith.constant 0 : index
    %315 = vector.load %arg11[%314, %c0_79] : memref<64x512xbf16, #tpu.memory_space<vmem>>, vector<8x512xbf16>
    %316 = vector.extract_strided_slice %308 {offsets = [0, 0], sizes = [8, 512], strides = [1, 1]} : vector<8x1024xf32> to vector<8x512xf32>
    %317 = arith.extf %315 : vector<8x512xbf16> to vector<8x512xf32>
    %318 = arith.addf %317, %316 : vector<8x512xf32>
    %319 = arith.index_cast %313 : i32 to index
    %c0_80 = arith.constant 0 : index
    %320 = vector.load %arg12[%319, %c0_80] : memref<64x512xbf16, #tpu.memory_space<vmem>>, vector<8x512xbf16>
    %321 = vector.extract_strided_slice %308 {offsets = [0, 512], sizes = [8, 512], strides = [1, 1]} : vector<8x1024xf32> to vector<8x512xf32>
    %322 = arith.extf %320 : vector<8x512xbf16> to vector<8x512xf32>
    %323 = arith.addf %322, %321 : vector<8x512xf32>
    %324 = vector.extract_strided_slice %318 {offsets = [0, 0], sizes = [8, 384], strides = [1, 1]} : vector<8x512xf32> to vector<8x384xf32>
    %325 = arith.negf %324 : vector<8x384xf32>
    %326 = math.exp %325 : vector<8x384xf32>
    %cst_81 = arith.constant 1.000000e+00 : f32
    %327 = vector.broadcast %cst_81 : f32 to vector<8x384xf32>
    %328 = arith.addf %327, %326 : vector<8x384xf32>
    %329 = arith.divf %327, %328 : vector<8x384xf32>
    %330 = vector.extract_strided_slice %318 {offsets = [0, 384], sizes = [8, 128], strides = [1, 1]} : vector<8x512xf32> to vector<8x128xf32>
    %331 = math.tanh %330 : vector<8x128xf32>
    %332 = vector.extract_strided_slice %329 {offsets = [0, 128], sizes = [8, 128], strides = [1, 1]} : vector<8x384xf32> to vector<8x128xf32>
    %333 = arith.mulf %332, %282 : vector<8x128xf32>
    %334 = vector.extract_strided_slice %329 {offsets = [0, 0], sizes = [8, 128], strides = [1, 1]} : vector<8x384xf32> to vector<8x128xf32>
    %335 = arith.mulf %334, %331 : vector<8x128xf32>
    %336 = arith.addf %333, %335 : vector<8x128xf32>
    %337 = vector.extract_strided_slice %329 {offsets = [0, 256], sizes = [8, 128], strides = [1, 1]} : vector<8x384xf32> to vector<8x128xf32>
    %338 = math.tanh %336 : vector<8x128xf32>
    %339 = arith.mulf %337, %338 : vector<8x128xf32>
    %340 = vector.extract_strided_slice %323 {offsets = [0, 0], sizes = [8, 384], strides = [1, 1]} : vector<8x512xf32> to vector<8x384xf32>
    %341 = arith.negf %340 : vector<8x384xf32>
    %342 = math.exp %341 : vector<8x384xf32>
    %cst_82 = arith.constant 1.000000e+00 : f32
    %343 = vector.broadcast %cst_82 : f32 to vector<8x384xf32>
    %344 = arith.addf %343, %342 : vector<8x384xf32>
    %345 = arith.divf %343, %344 : vector<8x384xf32>
    %346 = vector.extract_strided_slice %323 {offsets = [0, 384], sizes = [8, 128], strides = [1, 1]} : vector<8x512xf32> to vector<8x128xf32>
    %347 = math.tanh %346 : vector<8x128xf32>
    %348 = vector.extract_strided_slice %345 {offsets = [0, 128], sizes = [8, 128], strides = [1, 1]} : vector<8x384xf32> to vector<8x128xf32>
    %349 = arith.mulf %348, %298 : vector<8x128xf32>
    %350 = vector.extract_strided_slice %345 {offsets = [0, 0], sizes = [8, 128], strides = [1, 1]} : vector<8x384xf32> to vector<8x128xf32>
    %351 = arith.mulf %350, %347 : vector<8x128xf32>
    %352 = arith.addf %349, %351 : vector<8x128xf32>
    %353 = vector.extract_strided_slice %345 {offsets = [0, 256], sizes = [8, 128], strides = [1, 1]} : vector<8x384xf32> to vector<8x128xf32>
    %354 = math.tanh %352 : vector<8x128xf32>
    %355 = arith.mulf %353, %354 : vector<8x128xf32>
    %356 = arith.addf %302, %339 : vector<8x128xf32>
    %357 = arith.maximumf %303, %339 : vector<8x128xf32>
    %358 = arith.addf %304, %355 : vector<8x128xf32>
    %359 = arith.maximumf %305, %355 : vector<8x128xf32>
    %c6_i32 = arith.constant 6 : i32
    %360 = tpu.concatenate %339, %355 in 1 : vector<8x128xf32>, vector<8x128xf32> -> vector<8x256xf32>
    %361 = arith.truncf %360 : vector<8x256xf32> to vector<8x256xbf16>
    %cst_83 = arith.constant dense<0.000000e+00> : vector<8x1024xf32>
    %362 = tpu.matmul %361, %19, %cst_83 {dimension_numbers = #tpu.dot_dimension_numbers<[1], [0], [0], [1], [0, 0, 1, 1], [], []>} : vector<8x256xbf16>, vector<256x1024xbf16>, vector<8x1024xf32> -> vector<8x1024xf32>
    %c8_i32_84 = arith.constant 8 : i32
    %363 = arith.muli %c6_i32, %c8_i32_84 : i32
    %364 = tpu.assume_multiple %363, 8 : i32
    %c7_i32_85 = arith.constant 7 : i32
    %365 = arith.subi %c7_i32_85, %c6_i32 : i32
    %c8_i32_86 = arith.constant 8 : i32
    %366 = arith.muli %365, %c8_i32_86 : i32
    %367 = tpu.assume_multiple %366, 8 : i32
    %368 = arith.index_cast %364 : i32 to index
    %c0_87 = arith.constant 0 : index
    %369 = vector.load %arg11[%368, %c0_87] : memref<64x512xbf16, #tpu.memory_space<vmem>>, vector<8x512xbf16>
    %370 = vector.extract_strided_slice %362 {offsets = [0, 0], sizes = [8, 512], strides = [1, 1]} : vector<8x1024xf32> to vector<8x512xf32>
    %371 = arith.extf %369 : vector<8x512xbf16> to vector<8x512xf32>
    %372 = arith.addf %371, %370 : vector<8x512xf32>
    %373 = arith.index_cast %367 : i32 to index
    %c0_88 = arith.constant 0 : index
    %374 = vector.load %arg12[%373, %c0_88] : memref<64x512xbf16, #tpu.memory_space<vmem>>, vector<8x512xbf16>
    %375 = vector.extract_strided_slice %362 {offsets = [0, 512], sizes = [8, 512], strides = [1, 1]} : vector<8x1024xf32> to vector<8x512xf32>
    %376 = arith.extf %374 : vector<8x512xbf16> to vector<8x512xf32>
    %377 = arith.addf %376, %375 : vector<8x512xf32>
    %378 = vector.extract_strided_slice %372 {offsets = [0, 0], sizes = [8, 384], strides = [1, 1]} : vector<8x512xf32> to vector<8x384xf32>
    %379 = arith.negf %378 : vector<8x384xf32>
    %380 = math.exp %379 : vector<8x384xf32>
    %cst_89 = arith.constant 1.000000e+00 : f32
    %381 = vector.broadcast %cst_89 : f32 to vector<8x384xf32>
    %382 = arith.addf %381, %380 : vector<8x384xf32>
    %383 = arith.divf %381, %382 : vector<8x384xf32>
    %384 = vector.extract_strided_slice %372 {offsets = [0, 384], sizes = [8, 128], strides = [1, 1]} : vector<8x512xf32> to vector<8x128xf32>
    %385 = math.tanh %384 : vector<8x128xf32>
    %386 = vector.extract_strided_slice %383 {offsets = [0, 128], sizes = [8, 128], strides = [1, 1]} : vector<8x384xf32> to vector<8x128xf32>
    %387 = arith.mulf %386, %336 : vector<8x128xf32>
    %388 = vector.extract_strided_slice %383 {offsets = [0, 0], sizes = [8, 128], strides = [1, 1]} : vector<8x384xf32> to vector<8x128xf32>
    %389 = arith.mulf %388, %385 : vector<8x128xf32>
    %390 = arith.addf %387, %389 : vector<8x128xf32>
    %391 = vector.extract_strided_slice %383 {offsets = [0, 256], sizes = [8, 128], strides = [1, 1]} : vector<8x384xf32> to vector<8x128xf32>
    %392 = math.tanh %390 : vector<8x128xf32>
    %393 = arith.mulf %391, %392 : vector<8x128xf32>
    %394 = vector.extract_strided_slice %377 {offsets = [0, 0], sizes = [8, 384], strides = [1, 1]} : vector<8x512xf32> to vector<8x384xf32>
    %395 = arith.negf %394 : vector<8x384xf32>
    %396 = math.exp %395 : vector<8x384xf32>
    %cst_90 = arith.constant 1.000000e+00 : f32
    %397 = vector.broadcast %cst_90 : f32 to vector<8x384xf32>
    %398 = arith.addf %397, %396 : vector<8x384xf32>
    %399 = arith.divf %397, %398 : vector<8x384xf32>
    %400 = vector.extract_strided_slice %377 {offsets = [0, 384], sizes = [8, 128], strides = [1, 1]} : vector<8x512xf32> to vector<8x128xf32>
    %401 = math.tanh %400 : vector<8x128xf32>
    %402 = vector.extract_strided_slice %399 {offsets = [0, 128], sizes = [8, 128], strides = [1, 1]} : vector<8x384xf32> to vector<8x128xf32>
    %403 = arith.mulf %402, %352 : vector<8x128xf32>
    %404 = vector.extract_strided_slice %399 {offsets = [0, 0], sizes = [8, 128], strides = [1, 1]} : vector<8x384xf32> to vector<8x128xf32>
    %405 = arith.mulf %404, %401 : vector<8x128xf32>
    %406 = arith.addf %403, %405 : vector<8x128xf32>
    %407 = vector.extract_strided_slice %399 {offsets = [0, 256], sizes = [8, 128], strides = [1, 1]} : vector<8x384xf32> to vector<8x128xf32>
    %408 = math.tanh %406 : vector<8x128xf32>
    %409 = arith.mulf %407, %408 : vector<8x128xf32>
    %410 = arith.addf %356, %393 : vector<8x128xf32>
    %411 = arith.maximumf %357, %393 : vector<8x128xf32>
    %412 = arith.addf %358, %409 : vector<8x128xf32>
    %413 = arith.maximumf %359, %409 : vector<8x128xf32>
    %c7_i32_91 = arith.constant 7 : i32
    %414 = tpu.concatenate %393, %409 in 1 : vector<8x128xf32>, vector<8x128xf32> -> vector<8x256xf32>
    %415 = arith.truncf %414 : vector<8x256xf32> to vector<8x256xbf16>
    %cst_92 = arith.constant dense<0.000000e+00> : vector<8x1024xf32>
    %416 = tpu.matmul %415, %19, %cst_92 {dimension_numbers = #tpu.dot_dimension_numbers<[1], [0], [0], [1], [0, 0, 1, 1], [], []>} : vector<8x256xbf16>, vector<256x1024xbf16>, vector<8x1024xf32> -> vector<8x1024xf32>
    %c8_i32_93 = arith.constant 8 : i32
    %417 = arith.muli %c7_i32_91, %c8_i32_93 : i32
    %418 = tpu.assume_multiple %417, 8 : i32
    %c7_i32_94 = arith.constant 7 : i32
    %419 = arith.subi %c7_i32_94, %c7_i32_91 : i32
    %c8_i32_95 = arith.constant 8 : i32
    %420 = arith.muli %419, %c8_i32_95 : i32
    %421 = tpu.assume_multiple %420, 8 : i32
    %422 = arith.index_cast %418 : i32 to index
    %c0_96 = arith.constant 0 : index
    %423 = vector.load %arg11[%422, %c0_96] : memref<64x512xbf16, #tpu.memory_space<vmem>>, vector<8x512xbf16>
    %424 = vector.extract_strided_slice %416 {offsets = [0, 0], sizes = [8, 512], strides = [1, 1]} : vector<8x1024xf32> to vector<8x512xf32>
    %425 = arith.extf %423 : vector<8x512xbf16> to vector<8x512xf32>
    %426 = arith.addf %425, %424 : vector<8x512xf32>
    %427 = arith.index_cast %421 : i32 to index
    %c0_97 = arith.constant 0 : index
    %428 = vector.load %arg12[%427, %c0_97] : memref<64x512xbf16, #tpu.memory_space<vmem>>, vector<8x512xbf16>
    %429 = vector.extract_strided_slice %416 {offsets = [0, 512], sizes = [8, 512], strides = [1, 1]} : vector<8x1024xf32> to vector<8x512xf32>
    %430 = arith.extf %428 : vector<8x512xbf16> to vector<8x512xf32>
    %431 = arith.addf %430, %429 : vector<8x512xf32>
    %432 = vector.extract_strided_slice %426 {offsets = [0, 0], sizes = [8, 384], strides = [1, 1]} : vector<8x512xf32> to vector<8x384xf32>
    %433 = arith.negf %432 : vector<8x384xf32>
    %434 = math.exp %433 : vector<8x384xf32>
    %cst_98 = arith.constant 1.000000e+00 : f32
    %435 = vector.broadcast %cst_98 : f32 to vector<8x384xf32>
    %436 = arith.addf %435, %434 : vector<8x384xf32>
    %437 = arith.divf %435, %436 : vector<8x384xf32>
    %438 = vector.extract_strided_slice %426 {offsets = [0, 384], sizes = [8, 128], strides = [1, 1]} : vector<8x512xf32> to vector<8x128xf32>
    %439 = math.tanh %438 : vector<8x128xf32>
    %440 = vector.extract_strided_slice %437 {offsets = [0, 128], sizes = [8, 128], strides = [1, 1]} : vector<8x384xf32> to vector<8x128xf32>
    %441 = arith.mulf %440, %390 : vector<8x128xf32>
    %442 = vector.extract_strided_slice %437 {offsets = [0, 0], sizes = [8, 128], strides = [1, 1]} : vector<8x384xf32> to vector<8x128xf32>
    %443 = arith.mulf %442, %439 : vector<8x128xf32>
    %444 = arith.addf %441, %443 : vector<8x128xf32>
    %445 = vector.extract_strided_slice %437 {offsets = [0, 256], sizes = [8, 128], strides = [1, 1]} : vector<8x384xf32> to vector<8x128xf32>
    %446 = math.tanh %444 : vector<8x128xf32>
    %447 = arith.mulf %445, %446 : vector<8x128xf32>
    %448 = vector.extract_strided_slice %431 {offsets = [0, 0], sizes = [8, 384], strides = [1, 1]} : vector<8x512xf32> to vector<8x384xf32>
    %449 = arith.negf %448 : vector<8x384xf32>
    %450 = math.exp %449 : vector<8x384xf32>
    %cst_99 = arith.constant 1.000000e+00 : f32
    %451 = vector.broadcast %cst_99 : f32 to vector<8x384xf32>
    %452 = arith.addf %451, %450 : vector<8x384xf32>
    %453 = arith.divf %451, %452 : vector<8x384xf32>
    %454 = vector.extract_strided_slice %431 {offsets = [0, 384], sizes = [8, 128], strides = [1, 1]} : vector<8x512xf32> to vector<8x128xf32>
    %455 = math.tanh %454 : vector<8x128xf32>
    %456 = vector.extract_strided_slice %453 {offsets = [0, 128], sizes = [8, 128], strides = [1, 1]} : vector<8x384xf32> to vector<8x128xf32>
    %457 = arith.mulf %456, %406 : vector<8x128xf32>
    %458 = vector.extract_strided_slice %453 {offsets = [0, 0], sizes = [8, 128], strides = [1, 1]} : vector<8x384xf32> to vector<8x128xf32>
    %459 = arith.mulf %458, %455 : vector<8x128xf32>
    %460 = arith.addf %457, %459 : vector<8x128xf32>
    %461 = vector.extract_strided_slice %453 {offsets = [0, 256], sizes = [8, 128], strides = [1, 1]} : vector<8x384xf32> to vector<8x128xf32>
    %462 = math.tanh %460 : vector<8x128xf32>
    %463 = arith.mulf %461, %462 : vector<8x128xf32>
    %464 = arith.addf %410, %447 : vector<8x128xf32>
    %465 = arith.maximumf %411, %447 : vector<8x128xf32>
    %466 = arith.addf %412, %463 : vector<8x128xf32>
    %467 = arith.maximumf %413, %463 : vector<8x128xf32>
    %c8_i32_100 = arith.constant 8 : i32
    %c0_101 = arith.constant 0 : index
    %c0_102 = arith.constant 0 : index
    %c0_103 = arith.constant 0 : index
    %468 = vector.load %arg13[%c0_101, %c0_102, %c0_103] : memref<8x8x128xf32, #tpu.memory_space<vmem>>, vector<1x8x128xf32>
    %469 = vector.shape_cast %468 : vector<1x8x128xf32> to vector<8x128xf32>
    %470 = vector.shape_cast %447 : vector<8x128xf32> to vector<1x8x128xf32>
    tpu.vector_store %arg13[%c0_101, %c0_102, %c0_103], %470 {strides = array<i32>} : memref<8x8x128xf32, #tpu.memory_space<vmem>>, vector<1x8x128xf32>,
    %c1_104 = arith.constant 1 : index
    %c0_105 = arith.constant 0 : index
    %c0_106 = arith.constant 0 : index
    %471 = vector.load %arg13[%c1_104, %c0_105, %c0_106] : memref<8x8x128xf32, #tpu.memory_space<vmem>>, vector<1x8x128xf32>
    %472 = vector.shape_cast %471 : vector<1x8x128xf32> to vector<8x128xf32>
    %473 = vector.shape_cast %444 : vector<8x128xf32> to vector<1x8x128xf32>
    tpu.vector_store %arg13[%c1_104, %c0_105, %c0_106], %473 {strides = array<i32>} : memref<8x8x128xf32, #tpu.memory_space<vmem>>, vector<1x8x128xf32>,
    %c2_107 = arith.constant 2 : index
    %c0_108 = arith.constant 0 : index
    %c0_109 = arith.constant 0 : index
    %474 = vector.load %arg13[%c2_107, %c0_108, %c0_109] : memref<8x8x128xf32, #tpu.memory_space<vmem>>, vector<1x8x128xf32>
    %475 = vector.shape_cast %474 : vector<1x8x128xf32> to vector<8x128xf32>
    %476 = vector.shape_cast %464 : vector<8x128xf32> to vector<1x8x128xf32>
    tpu.vector_store %arg13[%c2_107, %c0_108, %c0_109], %476 {strides = array<i32>} : memref<8x8x128xf32, #tpu.memory_space<vmem>>, vector<1x8x128xf32>,
    %c3_110 = arith.constant 3 : index
    %c0_111 = arith.constant 0 : index
    %c0_112 = arith.constant 0 : index
    %477 = vector.load %arg13[%c3_110, %c0_111, %c0_112] : memref<8x8x128xf32, #tpu.memory_space<vmem>>, vector<1x8x128xf32>
    %478 = vector.shape_cast %477 : vector<1x8x128xf32> to vector<8x128xf32>
    %479 = vector.shape_cast %465 : vector<8x128xf32> to vector<1x8x128xf32>
    tpu.vector_store %arg13[%c3_110, %c0_111, %c0_112], %479 {strides = array<i32>} : memref<8x8x128xf32, #tpu.memory_space<vmem>>, vector<1x8x128xf32>,
    %c4_113 = arith.constant 4 : index
    %c0_114 = arith.constant 0 : index
    %c0_115 = arith.constant 0 : index
    %480 = vector.load %arg13[%c4_113, %c0_114, %c0_115] : memref<8x8x128xf32, #tpu.memory_space<vmem>>, vector<1x8x128xf32>
    %481 = vector.shape_cast %480 : vector<1x8x128xf32> to vector<8x128xf32>
    %482 = vector.shape_cast %463 : vector<8x128xf32> to vector<1x8x128xf32>
    tpu.vector_store %arg13[%c4_113, %c0_114, %c0_115], %482 {strides = array<i32>} : memref<8x8x128xf32, #tpu.memory_space<vmem>>, vector<1x8x128xf32>,
    %c5_116 = arith.constant 5 : index
    %c0_117 = arith.constant 0 : index
    %c0_118 = arith.constant 0 : index
    %483 = vector.load %arg13[%c5_116, %c0_117, %c0_118] : memref<8x8x128xf32, #tpu.memory_space<vmem>>, vector<1x8x128xf32>
    %484 = vector.shape_cast %483 : vector<1x8x128xf32> to vector<8x128xf32>
    %485 = vector.shape_cast %460 : vector<8x128xf32> to vector<1x8x128xf32>
    tpu.vector_store %arg13[%c5_116, %c0_117, %c0_118], %485 {strides = array<i32>} : memref<8x8x128xf32, #tpu.memory_space<vmem>>, vector<1x8x128xf32>,
    %c6_119 = arith.constant 6 : index
    %c0_120 = arith.constant 0 : index
    %c0_121 = arith.constant 0 : index
    %486 = vector.load %arg13[%c6_119, %c0_120, %c0_121] : memref<8x8x128xf32, #tpu.memory_space<vmem>>, vector<1x8x128xf32>
    %487 = vector.shape_cast %486 : vector<1x8x128xf32> to vector<8x128xf32>
    %488 = vector.shape_cast %466 : vector<8x128xf32> to vector<1x8x128xf32>
    tpu.vector_store %arg13[%c6_119, %c0_120, %c0_121], %488 {strides = array<i32>} : memref<8x8x128xf32, #tpu.memory_space<vmem>>, vector<1x8x128xf32>,
    %c7_122 = arith.constant 7 : index
    %c0_123 = arith.constant 0 : index
    %c0_124 = arith.constant 0 : index
    %489 = vector.load %arg13[%c7_122, %c0_123, %c0_124] : memref<8x8x128xf32, #tpu.memory_space<vmem>>, vector<1x8x128xf32>
    %490 = vector.shape_cast %489 : vector<1x8x128xf32> to vector<8x128xf32>
    %491 = vector.shape_cast %467 : vector<8x128xf32> to vector<1x8x128xf32>
    tpu.vector_store %arg13[%c7_122, %c0_123, %c0_124], %491 {strides = array<i32>} : memref<8x8x128xf32, #tpu.memory_space<vmem>>, vector<1x8x128xf32>,
    %c0_i32_125 = arith.constant 0 : i32
    %492 = arith.cmpi eq, %arg0, %c0_i32_125 : i32
    %493 = arith.extui %492 : i1 to i32
    %c0_i32_126 = arith.constant 0 : i32
    %494 = arith.cmpi ne, %493, %c0_i32_126 : i32
    scf.if %494 {
      %cst_127 = arith.constant 1.250000e-01 : f32
      %495 = vector.broadcast %cst_127 : f32 to vector<8x128xf32>
      %496 = arith.mulf %464, %495 : vector<8x128xf32>
      %cst_128 = arith.constant 1.250000e-01 : f32
      %497 = vector.broadcast %cst_128 : f32 to vector<8x128xf32>
      %498 = arith.mulf %466, %497 : vector<8x128xf32>
      %499 = tpu.concatenate %465, %467, %496, %498 in 1 : vector<8x128xf32>, vector<8x128xf32>, vector<8x128xf32>, vector<8x128xf32> -> vector<8x512xf32>
      %500 = arith.truncf %499 : vector<8x512xf32> to vector<8x512xbf16>
      %c0_129 = arith.constant 0 : index
      %c0_130 = arith.constant 0 : index
      %501 = vector.load %arg8[%c0_129, %c0_130] : memref<512x128xbf16, #tpu.memory_space<vmem>>, vector<512x128xbf16>
      %cst_131 = arith.constant dense<0.000000e+00> : vector<8x128xf32>
      %502 = tpu.matmul %500, %501, %cst_131 {dimension_numbers = #tpu.dot_dimension_numbers<[1], [0], [0], [1], [0, 0, 1, 1], [], []>} : vector<8x512xbf16>, vector<512x128xbf16>, vector<8x128xf32> -> vector<8x128xf32>
      %c0_132 = arith.constant 0 : index
      %c0_133 = arith.constant 0 : index
      %503 = vector.load %arg9[%c0_132, %c0_133] : memref<1x128xf32, #tpu.memory_space<vmem>>, vector<1x128xf32>
      %504 = vector.broadcast %503 : vector<1x128xf32> to vector<8x128xf32>
      %505 = arith.addf %502, %504 : vector<8x128xf32>
      %c0_134 = arith.constant 0 : index
      %c0_135 = arith.constant 0 : index
      %506 = vector.load %arg10[%c0_134, %c0_135] : memref<8x128xf32, #tpu.memory_space<vmem>>, vector<8x128xf32>
      tpu.vector_store %arg10[%c0_134, %c0_135], %505 {strides = array<i32>} : memref<8x128xf32, #tpu.memory_space<vmem>>, vector<8x128xf32>,
    } else {
    }
    return
  }
  func.func @transform_0(%arg0: i32) -> (i32, i32) {
    %c0_i32 = arith.constant 0 : i32
    %c0_i32_0 = arith.constant 0 : i32
    return %arg0, %c0_i32 : i32, i32
  }
  func.func @transform_1(%arg0: i32) -> (i32, i32) {
    %c0_i32 = arith.constant 0 : i32
    %0 = arith.subi %c0_i32, %arg0 : i32
    %c0_i32_0 = arith.constant 0 : i32
    %c0_i32_1 = arith.constant 0 : i32
    return %0, %c0_i32_0 : i32, i32
  }
  func.func @transform_2(%arg0: i32) -> (i32, i32) {
    %c0_i32 = arith.constant 0 : i32
    %c0_i32_0 = arith.constant 0 : i32
    %c0_i32_1 = arith.constant 0 : i32
    return %c0_i32, %c0_i32_0 : i32, i32
  }
  func.func @transform_3(%arg0: i32) -> (i32, i32) {
    %c0_i32 = arith.constant 0 : i32
    %c0_i32_0 = arith.constant 0 : i32
    %c0_i32_1 = arith.constant 0 : i32
    return %c0_i32, %c0_i32_0 : i32, i32
  }
  func.func @transform_4(%arg0: i32) -> (i32, i32) {
    %c0_i32 = arith.constant 0 : i32
    %c0_i32_0 = arith.constant 0 : i32
    %c0_i32_1 = arith.constant 0 : i32
    return %c0_i32, %c0_i32_0 : i32, i32
  }
  func.func @transform_5(%arg0: i32) -> (i32, i32) {
    %c0_i32 = arith.constant 0 : i32
    %c0_i32_0 = arith.constant 0 : i32
    %c0_i32_1 = arith.constant 0 : i32
    return %c0_i32, %c0_i32_0 : i32, i32
  }
  func.func @transform_6(%arg0: i32) -> (i32, i32) {
    %c0_i32 = arith.constant 0 : i32
    %c0_i32_0 = arith.constant 0 : i32
    %c0_i32_1 = arith.constant 0 : i32
    return %c0_i32, %c0_i32_0 : i32, i32
  }
  func.func @transform_7(%arg0: i32) -> (i32, i32) {
    %c0_i32 = arith.constant 0 : i32
    %c0_i32_0 = arith.constant 0 : i32
    %c0_i32_1 = arith.constant 0 : i32
    return %c0_i32, %c0_i32_0 : i32, i32
  }
  func.func @transform_8(%arg0: i32) -> (i32, i32) {
    %c0_i32 = arith.constant 0 : i32
    %c0_i32_0 = arith.constant 0 : i32
    %c0_i32_1 = arith.constant 0 : i32
    return %c0_i32, %c0_i32_0 : i32, i32
  }
  func.func @transform_9(%arg0: i32) -> (i32, i32) {
    %c0_i32 = arith.constant 0 : i32
    %c0_i32_0 = arith.constant 0 : i32
    %c0_i32_1 = arith.constant 0 : i32
    return %c0_i32, %c0_i32_0 : i32, i32
  }
}

</mosaic_0001>

<bundles_post_ra>
// kernel: tpu_custom_call.1
= control target key start
LH: loop header
LB: loop body
LE: loop exit
PB: predicated region body
PF: predicated region fallthrough
CT: control target
= control target key end

     0   :  { %14 = vsyncpa [#allocation6], 0  ;;  %s7050_s0 = inlined_call_operand.hbm [shape: bf16[64,128], index: 0, kind: input, shape index: {}]   ;;  %s7051_s1 = inlined_call_operand.hbm [shape: bf16[64,128], index: 1, kind: input, shape index: {}]   ;;  %s7052_s2 = inlined_call_operand.hbm [shape: bf16[128,512], index: 2, kind: input, shape index: {}]   ;;  %s7053_s3 = inlined_call_operand.hbm [shape: bf16[128,512], index: 3, kind: input, shape index: {}]   ;;  %s7054_s4 = inlined_call_operand.vmem [shape: f32[1,512], index: 4, kind: input, shape index: {}]   ;;  %s7055_s5 = inlined_call_operand.vmem [shape: f32[1,512], index: 5, kind: input, shape index: {}]   ;;  %s7056_s6 = inlined_call_operand.hbm [shape: bf16[256,1024], index: 6, kind: input, shape index: {}]   ;;  %s7057_s7 = inlined_call_operand.hbm [shape: bf16[512,128], index: 7, kind: input, shape index: {}]   ;;  %s7058_s8 = inlined_call_operand.vmem [shape: f32[1,128], index: 8, kind: input, shape index: {}]   ;;  %s7059_s9 = inlined_call_operand.hbm [shape: f32[8,128], index: 9, kind: output, shape index: {}]  }
   0x1   :  { %15 = vsyncpa [#allocation9], 0 }
   0x2   :  { %16 = vsyncpa [#allocation12], 0 }
   0x3   :  { %17 = vsyncpa [#allocation15], 0 }
   0x4   :  { %18 = vsyncpa [#allocation7], 0  ;;  %s5214_s30 = smov [#allocation8]  }
   0x5   :  { %s40_s10 = sshll.u32 %s5214_s30, 4  ;;  %s41_s10 = int_to_ptr.vmem [resolvable:$true] %s40_s10 }
   0x6   :  { %s5072_s11 = scalar_lea.vmem %s41_s10, 512  ;;  %p5077_p1 = scmp.lt.s32.totalorder %s41_s10, %s41_s10 }
   0x7   :  { %p5073_p0 = scmp.ne.s32.totalorder %s41_s10, %s5072_s11  ;;  %p5078_p2 = scmp.lt.s32.totalorder %s5072_s11, %s5072_s11 }
   0x9   :  { %p5079_p3 = por %p5078_p2, %p5077_p1 }
   0xb   :  { %p5080_p4 = pnand %p5079_p3, %p5073_p0 }
   0xd   :  { %5083 = shalt.err (!%p5080_p4)
}
   0xe   :  { %s5215_s12 = smov 64   ;;  %s5216_s13 = smov 4  }
   0xf   :  { %46 = dma.hbm_to_vmem [thread:$0]  %s7051_s1, 512, %s41_s10, [#allocation9], %s5215_s12, %s5215_s12, %s5216_s13  }
  0x10   :  { %s5217_s16 = smov [#allocation11]   ;;  %s5218_s18 = smov [#allocation5]  }
  0x11   :  { %s64_s17 = sshll.u32 %s5217_s16, 4  ;;  %s24_s19 = sshll.u32 %s5218_s18, 4  ;;  %s65_s17 = int_to_ptr.vmem [resolvable:$true] %s64_s17  ;;  %s25_s19 = int_to_ptr.vmem [resolvable:$true] %s24_s19 }
  0x12   :  { %s5092_s20 = scalar_lea.vmem %s65_s17, 4096  ;;  %p5097_p6 = scmp.lt.s32.totalorder %s65_s17, %s65_s17 }
  0x13   :  { %p5093_p5 = scmp.ne.s32.totalorder %s65_s17, %s5092_s20  ;;  %p5098_p7 = scmp.lt.s32.totalorder %s5092_s20, %s5092_s20 }
  0x15   :  { %p5099_p8 = por %p5098_p7, %p5097_p6 }
  0x17   :  { %p5100_p9 = pnand %p5099_p8, %p5093_p5 }
  0x19   :  { %5103 = shalt.err (!%p5100_p9)
}
  0x1a   :  { %s5219_s21 = smov 256   ;;  %s5220_s22 = smov 16  }
  0x1b   :  { %70 = dma.hbm_to_vmem [thread:$0]  %s7053_s3, 4096, %s65_s17, [#allocation12], %s5219_s21, %s5219_s21, %s5220_s22  }
  0x1c   :  { %s5112_s1 = scalar_lea.vmem %s25_s19, 512  ;;  %p5117_p11 = scmp.lt.s32.totalorder %s25_s19, %s25_s19 }
  0x1d   :  { %p5113_p10 = scmp.ne.s32.totalorder %s25_s19, %s5112_s1  ;;  %p5118_p12 = scmp.lt.s32.totalorder %s5112_s1, %s5112_s1 }
  0x1f   :  { %p5119_p13 = por %p5118_p12, %p5117_p11 }
  0x21   :  { %p5120_p0 = pnand %p5119_p13, %p5113_p10 }
  0x23   :  { %5123 = shalt.err (!%p5120_p0)
}
  0x24   :  { %30 = dma.hbm_to_vmem [thread:$0]  %s7050_s0, 512, %s25_s19, [#allocation6], %s5215_s12, %s5215_s12, %s5216_s13  }
  0x25   :  { %s5221_s27 = smov [#allocation10]   ;;  %s5222_s29 = smov [#allocation13]  }
  0x26   :  { %s52_s28 = sshll.u32 %s5221_s27, 4  ;;  %s80_s3 = sshll.u32 %s5222_s29, 4  ;;  %s53_s28 = int_to_ptr.vmem [resolvable:$true] %s52_s28  ;;  %s81_s3 = int_to_ptr.vmem [resolvable:$true] %s80_s3 }
  0x27   :  { %s5132_s30 = scalar_lea.vmem %s53_s28, 4096  ;;  %p5137_p2 = scmp.lt.s32.totalorder %s53_s28, %s53_s28 }
  0x28   :  { %p5133_p1 = scmp.ne.s32.totalorder %s53_s28, %s5132_s30  ;;  %p5138_p3 = scmp.lt.s32.totalorder %s5132_s30, %s5132_s30 }
  0x2a   :  { %p5139_p4 = por %p5138_p3, %p5137_p2 }
  0x2c   :  { %p5140_p5 = pnand %p5139_p4, %p5133_p1 }
  0x2e   :  { %5143 = shalt.err (!%p5140_p5)
}
  0x2f   :  { %58 = dma.hbm_to_vmem [thread:$0]  %s7052_s2, 4096, %s53_s28, [#allocation9], %s5219_s21, %s5219_s21, %s5220_s22  }
  0x30   :  { %s5152_s14 = scalar_lea.vmem %s81_s3, 16384  ;;  %p5157_p7 = scmp.lt.s32.totalorder %s81_s3, %s81_s3 }
  0x31   :  { %p5153_p6 = scmp.ne.s32.totalorder %s81_s3, %s5152_s14  ;;  %p5158_p8 = scmp.lt.s32.totalorder %s5152_s14, %s5152_s14 }
  0x33   :  { %p5159_p9 = por %p5158_p8, %p5157_p7 }
  0x35   :  { %p5160_p10 = pnand %p5159_p9, %p5153_p6 }
  0x37   :  { %5163 = shalt.err (!%p5160_p10)
}
  0x38   :  { %s5223_s0 = smov 512   ;;  %s5224_s15 = smov 32  }
  0x39   :  { %86 = dma.hbm_to_vmem [thread:$0]  %s7056_s6, 16384, %s81_s3, [#allocation12], %s5223_s0, %s5223_s0, %s5224_s15  }
  0x3a   :  { %s5225_s18 = smov [#allocation14]  }
  0x3b   :  { %s92_s19 = sshll.u32 %s5225_s18, 4  ;;  %s93_s19 = int_to_ptr.vmem [resolvable:$true] %s92_s19 }
  0x3c   :  { %s5172_s20 = scalar_lea.vmem %s93_s19, 4096  ;;  %p5177_p12 = scmp.lt.s32.totalorder %s93_s19, %s93_s19 }
  0x3d   :  { %p5173_p11 = scmp.ne.s32.totalorder %s93_s19, %s5172_s20  ;;  %p5178_p13 = scmp.lt.s32.totalorder %s5172_s20, %s5172_s20 }
  0x3f   :  { %p5179_p0 = por %p5178_p13, %p5177_p12 }
  0x41   :  { %p5180_p1 = pnand %p5179_p0, %p5173_p11 }
  0x43   :  { %5183 = shalt.err (!%p5180_p1)
}
  0x44   :  { %98 = dma.hbm_to_vmem [thread:$0]  %s7057_s7, 4096, %s93_s19, [#allocation15], %s5215_s12, %s5215_s12, %s5216_s13  }
  0x45   :  { %5204 = dma.done.wait [#allocation6], 512  }
  0x46   :  { %5205 = vsyncadd [#allocation6], 4294966784 }
  0x47   :  { %5206 = dma.done.wait [#allocation9], 4608  }
  0x48   :  { %5207 = vsyncadd [#allocation9], 4294962688 }
  0x49   :  { %5208 = dma.done.wait [#allocation12], 20480  }
  0x4a   :  { %5209 = vsyncadd [#allocation12], 4294946816 }
  0x4b   :  { %5210 = dma.done.wait [#allocation15], 4096  }
  0x4c   :  { %5211 = vsyncadd [#allocation15], 4294963200  ;;  %v5226_v0 = vmov 0   ;;  %v4672_v1 = vld [vmem:[#allocation10 + $0xe4] ss:$16 sps:$4 sm:$0xff]   ;;  %v4733_v44 = vld [vmem:[#allocation5 + $0x8] sm:$0xff]  }
  0x4d   :  { %416 = vmatprep.mubr.bf16.mxu0 %v5226_v0  ;;  %489 = vmatprep.mubr.bf16.mxu1 %v5226_v0  ;;  %v4674_v2 = vld [vmem:[#allocation10 + $0xec] ss:$16 sps:$4 sm:$0xff]   ;;  %v4676_v3 = vld [vmem:[#allocation10 + $0xe0] ss:$16 sps:$4 sm:$0xff]   ;;  %v4677_v4 = vld [vmem:[#allocation10 + $0xe8] ss:$16 sps:$4 sm:$0xff]  }
  0x4e   :  { %384 = vmatprep.subr.bf16.mxu0 %v4672_v1  ;;  %457 = vmatprep.subr.bf16.mxu1 %v4674_v2  ;;  %v4678_v5 = vld [vmem:[#allocation10 + $0xc4] ss:$16 sps:$4 sm:$0xff]   ;;  %v4680_v6 = vld [vmem:[#allocation10 + $0xcc] ss:$16 sps:$4 sm:$0xff]   ;;  %v4682_v7 = vld [vmem:[#allocation10 + $0xc0] ss:$16 sps:$4 sm:$0xff]  }
  0x4f   :  { %385 = vmatpush1.bf16.msra.mxu0 %v4676_v3  ;;  %458 = vmatpush1.bf16.msra.mxu1 %v4677_v4  ;;  %v4683_v8 = vld [vmem:[#allocation10 + $0xc8] ss:$16 sps:$4 sm:$0xff]   ;;  %v4684_v9 = vld [vmem:[#allocation10 + $0xa4] ss:$16 sps:$4 sm:$0xff]   ;;  %v4686_v10 = vld [vmem:[#allocation10 + $0xac] ss:$16 sps:$4 sm:$0xff]  }
  0x50   :  { %386 = vmatprep.subr.bf16.mxu0 %v4678_v5  ;;  %459 = vmatprep.subr.bf16.mxu1 %v4680_v6  ;;  %v4688_v11 = vld [vmem:[#allocation10 + $0xa0] ss:$16 sps:$4 sm:$0xff]   ;;  %v4689_v12 = vld [vmem:[#allocation10 + $0xa8] ss:$16 sps:$4 sm:$0xff]   ;;  %v4690_v13 = vld [vmem:[#allocation10 + $0x84] ss:$16 sps:$4 sm:$0xff]  }
  0x51   :  { %v4692_v14 = vld [vmem:[#allocation10 + $0x8c] ss:$16 sps:$4 sm:$0xff]   ;;  %v4694_v15 = vld [vmem:[#allocation10 + $0x80] ss:$16 sps:$4 sm:$0xff]   ;;  %v4695_v16 = vld [vmem:[#allocation10 + $0x88] ss:$16 sps:$4 sm:$0xff]  }
  0x52   :  { %v4696_v17 = vld [vmem:[#allocation10 + $0x64] ss:$16 sps:$4 sm:$0xff]   ;;  %v4698_v18 = vld [vmem:[#allocation10 + $0x6c] ss:$16 sps:$4 sm:$0xff]   ;;  %v4700_v19 = vld [vmem:[#allocation10 + $0x60] ss:$16 sps:$4 sm:$0xff]  }
  0x53   :  { %387 = vmatpush1.bf16.msra.mxu0 %v4682_v7  ;;  %460 = vmatpush1.bf16.msra.mxu1 %v4683_v8  ;;  %v4701_v20 = vld [vmem:[#allocation10 + $0x68] ss:$16 sps:$4 sm:$0xff]   ;;  %v4702_v21 = vld [vmem:[#allocation10 + $0x44] ss:$16 sps:$4 sm:$0xff]   ;;  %v4704_v22 = vld [vmem:[#allocation10 + $0x4c] ss:$16 sps:$4 sm:$0xff]  }
  0x54   :  { %388 = vmatprep.subr.bf16.mxu0 %v4684_v9  ;;  %461 = vmatprep.subr.bf16.mxu1 %v4686_v10  ;;  %v4706_v23 = vld [vmem:[#allocation10 + $0x40] ss:$16 sps:$4 sm:$0xff]   ;;  %v4707_v24 = vld [vmem:[#allocation10 + $0x48] ss:$16 sps:$4 sm:$0xff]   ;;  %v4708_v25 = vld [vmem:[#allocation10 + $0x24] ss:$16 sps:$4 sm:$0xff]  }
  0x55   :  { %v4710_v26 = vld [vmem:[#allocation10 + $0x2c] ss:$16 sps:$4 sm:$0xff]   ;;  %v4712_v27 = vld [vmem:[#allocation10 + $0x20] ss:$16 sps:$4 sm:$0xff]   ;;  %v4713_v28 = vld [vmem:[#allocation10 + $0x28] ss:$16 sps:$4 sm:$0xff]  }
  0x56   :  { %v4714_v29 = vld [vmem:[#allocation10 + $0x4] ss:$16 sps:$4 sm:$0xff]   ;;  %v4716_v30 = vld [vmem:[#allocation10 + $0xc] ss:$16 sps:$4 sm:$0xff]   ;;  %v4718_v31 = vld [vmem:[#allocation10] ss:$16 sps:$4 sm:$0xff]  }
  0x57   :  { %389 = vmatpush1.bf16.msra.mxu0 %v4688_v11  ;;  %462 = vmatpush1.bf16.msra.mxu1 %v4689_v12  ;;  %v4719_v32 = vld [vmem:[#allocation10 + $0x8] ss:$16 sps:$4 sm:$0xff]   ;;  %v4723_v33 = vld [vmem:[#allocation11 + $0xe4] ss:$16 sps:$4 sm:$0xff]   ;;  %v4726_v34 = vld [vmem:[#allocation11 + $0xec] ss:$16 sps:$4 sm:$0xff]  }
  0x58   :  { %390 = vmatprep.subr.bf16.mxu0 %v4690_v13  ;;  %463 = vmatprep.subr.bf16.mxu1 %v4692_v14  ;;  %v4720_v35 = vld [vmem:[#allocation5] sm:$0xff]   ;;  %v4724_v37 = vld [vmem:[#allocation11 + $0xe8] ss:$16 sps:$4 sm:$0xff]   ;;  %v4732_v39 = vld [vmem:[#allocation11 + $0xcc] ss:$16 sps:$4 sm:$0xff]   ;;  %s5228_s22 = smov [#allocation16]  }
  0x59   :  { %v4721_v36 = vld [vmem:[#allocation11 + $0xe0] ss:$16 sps:$4 sm:$0xff]   ;;  %v4729_v38 = vld [vmem:[#allocation11 + $0xc4] ss:$16 sps:$4 sm:$0xff]   ;;  %v4730_v41 = vld [vmem:[#allocation11 + $0xc8] ss:$16 sps:$4 sm:$0xff]  }
  0x5a   :  { %v4727_v40 = vld [vmem:[#allocation11 + $0xc0] ss:$16 sps:$4 sm:$0xff]   ;;  %v4736_v42 = vld [vmem:[#allocation11 + $0xa4] ss:$16 sps:$4 sm:$0xff]   ;;  %v4739_v43 = vld [vmem:[#allocation11 + $0xac] ss:$16 sps:$4 sm:$0xff]  }
  0x5b   :  { %391 = vmatpush1.bf16.msra.mxu0 %v4694_v15  ;;  %464 = vmatpush1.bf16.msra.mxu1 %v4695_v16  ;;  %v4734_v45 = vld [vmem:[#allocation11 + $0xa0] ss:$16 sps:$4 sm:$0xff]   ;;  %v4737_v46 = vld [vmem:[#allocation11 + $0xa8] ss:$16 sps:$4 sm:$0xff]   ;;  %v4742_v47 = vld [vmem:[#allocation11 + $0x84] ss:$16 sps:$4 sm:$0xff]  }
  0x5c   :  { %392 = vmatprep.subr.bf16.mxu0 %v4696_v17  ;;  %465 = vmatprep.subr.bf16.mxu1 %v4698_v18  ;;  %v4745_v48 = vld [vmem:[#allocation11 + $0x8c] ss:$16 sps:$4 sm:$0xff]   ;;  %v4740_v49 = vld [vmem:[#allocation11 + $0x80] ss:$16 sps:$4 sm:$0xff]   ;;  %v4743_v50 = vld [vmem:[#allocation11 + $0x88] ss:$16 sps:$4 sm:$0xff]  }
  0x5d   :  { %v4749_v51 = vld [vmem:[#allocation11 + $0x64] ss:$16 sps:$4 sm:$0xff]   ;;  %v4752_v52 = vld [vmem:[#allocation11 + $0x6c] ss:$16 sps:$4 sm:$0xff]   ;;  %v4747_v54 = vld [vmem:[#allocation11 + $0x60] ss:$16 sps:$4 sm:$0xff]  }
  0x5e   :  { %v4746_v53 = vld [vmem:[#allocation5 + $0x10] sm:$0xff]   ;;  %v4750_v55 = vld [vmem:[#allocation11 + $0x68] ss:$16 sps:$4 sm:$0xff]   ;;  %v4758_v57 = vld [vmem:[#allocation11 + $0x4c] ss:$16 sps:$4 sm:$0xff]   ;;  %s4240_s23 = sshll.u32 %s5228_s22, 4  ;;  %s4241_s23 = int_to_ptr.vmem [resolvable:$true] %s4240_s23 }
  0x5f   :  { %393 = vmatpush1.bf16.msra.mxu0 %v4700_v19  ;;  %466 = vmatpush1.bf16.msra.mxu1 %v4701_v20  ;;  %v4755_v56 = vld [vmem:[#allocation11 + $0x44] ss:$16 sps:$4 sm:$0xff]   ;;  %v4753_v58 = vld [vmem:[#allocation11 + $0x40] ss:$16 sps:$4 sm:$0xff]   ;;  %v4756_v59 = vld [vmem:[#allocation11 + $0x48] ss:$16 sps:$4 sm:$0xff]   ;;  %p5189_p3 = scmp.lt.s32.totalorder %s4241_s23, %s4241_s23 }
  0x60   :  { %394 = vmatprep.subr.bf16.mxu0 %v4702_v21  ;;  %467 = vmatprep.subr.bf16.mxu1 %v4704_v22  ;;  %v4762_v60 = vld [vmem:[#allocation11 + $0x24] ss:$16 sps:$4 sm:$0xff]   ;;  %v4765_v61 = vld [vmem:[#allocation11 + $0x2c] ss:$16 sps:$4 sm:$0xff]   ;;  %v4760_v63 = vld [vmem:[#allocation11 + $0x20] ss:$16 sps:$4 sm:$0xff]  }
  0x61   :  { %v4759_v62 = vld [vmem:[#allocation5 + $0x18] sm:$0xff]   ;;  %v4768_v2 = vld [vmem:[#allocation11 + $0x4] ss:$16 sps:$4 sm:$0xff]   ;;  %v1203_v6 = vld [vmem:[#allocation13 + $0x1c8] sm:$0xff]  ;;  %s5184_s24 = scalar_lea.vmem %s4241_s23, 128 }
  0x62   :  { %v4763_v1 = vld [vmem:[#allocation11 + $0x28] ss:$16 sps:$4 sm:$0xff]   ;;  %v4771_v3 = vld [vmem:[#allocation11 + $0xc] ss:$16 sps:$4 sm:$0xff]   ;;  %v1202_v4 = vld [vmem:[#allocation13 + $0x1c0] sm:$0xff]  ;;  %p5185_p2 = scmp.ne.s32.totalorder %s4241_s23, %s5184_s24  ;;  %p5190_p4 = scmp.lt.s32.totalorder %s5184_s24, %s5184_s24 }
  0x63   :  { %395 = vmatpush1.bf16.msra.mxu0 %v4706_v23  ;;  %468 = vmatpush1.bf16.msra.mxu1 %v4707_v24  ;;  %v1206_v5 = vld [vmem:[#allocation13 + $0x1e0] sm:$0xff]  ;;  %v1207_v7 = vld [vmem:[#allocation13 + $0x1e8] sm:$0xff] }
  0x64   :  { %396 = vmatprep.subr.bf16.mxu0 %v4708_v25  ;;  %469 = vmatprep.subr.bf16.mxu1 %v4710_v26  ;;  %v4766_v8 = vld [vmem:[#allocation11] ss:$16 sps:$4 sm:$0xff]   ;;  %v4769_v9 = vld [vmem:[#allocation11 + $0x8] ss:$16 sps:$4 sm:$0xff]   ;;  %v5314_v10 = vcombine.high %v1202_v4, %v1206_v5  ;;  %v5316_v11 = vcombine.high %v1203_v6, %v1207_v7  ;;  %v5320_v17 = vcombine.low %v1202_v4, %v1206_v5  ;;  %p5191_p5 = por %p5190_p4, %p5189_p3 }
  0x65   :  { %v1194_v12 = vld [vmem:[#allocation13 + $0x180] sm:$0xff]  ;;  %v1195_v14 = vld [vmem:[#allocation13 + $0x188] sm:$0xff]  ;;  %v5322_v18 = vcombine.low %v1203_v6, %v1207_v7  ;;  %v4775_v4 = vld [vmem:[#allocation8 + $0x18] sm:$0xff]  }
  0x66   :  { %7371 = vst [vmem:[#allocation22_spill] sm:$0xff] %v5314_v10  ;;  %7372 = vst [vmem:[#allocation23_spill] sm:$0xff] %v5316_v11  ;;  %v1198_v13 = vld [vmem:[#allocation13 + $0x1a0] sm:$0xff]  ;;  %v1199_v15 = vld [vmem:[#allocation13 + $0x1a8] sm:$0xff]  ;;  %p5192_p6 = pnand %p5191_p5, %p5185_p2 }
  0x67   :  { %397 = vmatpush1.bf16.msra.mxu0 %v4712_v27  ;;  %470 = vmatpush1.bf16.msra.mxu1 %v4713_v28  ;;  %v4772_v16 = vld [vmem:[#allocation8] sm:$0xff]   ;;  %7373 = vst [vmem:[#allocation24_spill] sm:$0xff] %v5320_v17  ;;  %7374 = vst [vmem:[#allocation25_spill] sm:$0xff] %v5322_v18  ;;  %v5326_v19 = vcombine.high %v1194_v12, %v1198_v13  ;;  %v5328_v20 = vcombine.high %v1195_v14, %v1199_v15  ;;  %v1187_v23 = vld [vmem:[#allocation13 + $0x148] sm:$0xff] }
  0x68   :  { %398 = vmatprep.subr.bf16.mxu0 %v4714_v29  ;;  %471 = vmatprep.subr.bf16.mxu1 %v4716_v30  ;;  %v1186_v21 = vld [vmem:[#allocation13 + $0x140] sm:$0xff]  ;;  %v1191_v24 = vld [vmem:[#allocation13 + $0x168] sm:$0xff]  ;;  %v5332_v25 = vcombine.low %v1194_v12, %v1198_v13  ;;  %v5334_v26 = vcombine.low %v1195_v14, %v1199_v15 }
  0x69   :  { %7375 = vst [vmem:[#allocation26_spill] sm:$0xff] %v5326_v19  ;;  %7376 = vst [vmem:[#allocation27_spill] sm:$0xff] %v5328_v20  ;;  %v1190_v22 = vld [vmem:[#allocation13 + $0x160] sm:$0xff]  ;;  %v5340_v28 = vcombine.high %v1187_v23, %v1191_v24  ;;  %v1271_v13 = vld [vmem:[#allocation13 + $0x3e8] sm:$0xff] }
  0x6a   :  { %7377 = vst [vmem:[#allocation28_spill] sm:$0xff] %v5332_v25  ;;  %7378 = vst [vmem:[#allocation29_spill] sm:$0xff] %v5334_v26  ;;  %v5338_v27 = vcombine.high %v1186_v21, %v1190_v22  ;;  %v1178_v29 = vld [vmem:[#allocation13 + $0x100] sm:$0xff] }
  0x6b   :  { %399 = vmatpush1.bf16.msra.mxu0 %v4718_v31  ;;  %472 = vmatpush1.bf16.msra.mxu1 %v4719_v32  ;;  %7380 = vst [vmem:[#allocation31_spill] sm:$0xff] %v5340_v28  ;;  %v1182_v30 = vld [vmem:[#allocation13 + $0x120] sm:$0xff]  ;;  %v1179_v31 = vld [vmem:[#allocation13 + $0x108] sm:$0xff] }
  0x6c   :  { %888 = vmatprep.subr.bf16.mxu0 %v4723_v33  ;;  %961 = vmatprep.subr.bf16.mxu1 %v4726_v34  ;;  %7379 = vst [vmem:[#allocation30_spill] sm:$0xff] %v5338_v27  ;;  %v1183_v32 = vld [vmem:[#allocation13 + $0x128] sm:$0xff]  ;;  %v5346_v34 = vcombine.low %v1186_v21, %v1190_v22  ;;  %v1270_v12 = vld [vmem:[#allocation13 + $0x3e0] sm:$0xff] }
  0x6d   :  { %v4773_v33 = vld [vmem:[#allocation8 + $0x8] sm:$0xff]   ;;  %v1262_v21 = vld [vmem:[#allocation13 + $0x3a0] sm:$0xff] }
  0x6e   :  { %417 = vmatmul.mubr.bf16.vlgmr.msra.gmra.mxu0 %v4720_v35  ;;  %490 = vmatmul.mubr.bf16.vlgmr.msra.gmra.mxu1 %v4720_v35  ;;  %7381 = vst [vmem:[#allocation32_spill] sm:$0xff] %v5346_v34  ;;  %v5348_v35 = vcombine.low %v1187_v23, %v1191_v24  ;;  %v1259_v24 = vld [vmem:[#allocation13 + $0x388] sm:$0xff] }
  0x6f   :  { %889 = vmatpush1.bf16.msra.mxu0 %v4721_v36  ;;  %962 = vmatpush1.bf16.msra.mxu1 %v4724_v37  ;;  %v5352_v36 = vcombine.high %v1178_v29, %v1182_v30  ;;  %v5354_v37 = vcombine.high %v1179_v31, %v1183_v32 }
  0x70   :  { %890 = vmatprep.subr.bf16.mxu0 %v4729_v38  ;;  %963 = vmatprep.subr.bf16.mxu1 %v4732_v39  ;;  %7382 = vst [vmem:[#allocation33_spill] sm:$0xff] %v5348_v35  ;;  %v1170_v38 = vld [vmem:[#allocation13 + $0xc0] sm:$0xff] }
  0x71   :  { %426 = vmatprep.mubr.bf16.mxu0 %v5226_v0  ;;  %499 = vmatprep.mubr.bf16.mxu1 %v5226_v0  ;;  %7383 = vst [vmem:[#allocation34_spill] sm:$0xff] %v5352_v36  ;;  %7384 = vst [vmem:[#allocation35_spill] sm:$0xff] %v5354_v37  ;;  %v1174_v39 = vld [vmem:[#allocation13 + $0xe0] sm:$0xff] }
  0x73   :  { %891 = vmatpush1.bf16.msra.mxu0 %v4727_v40  ;;  %964 = vmatpush1.bf16.msra.mxu1 %v4730_v41  ;;  %v1171_v40 = vld [vmem:[#allocation13 + $0xc8] sm:$0xff] }
  0x74   :  { %892 = vmatprep.subr.bf16.mxu0 %v4736_v42  ;;  %965 = vmatprep.subr.bf16.mxu1 %v4739_v43  ;;  %v1175_v41 = vld [vmem:[#allocation13 + $0xe8] sm:$0xff]  ;;  %v5358_v42 = vcombine.low %v1178_v29, %v1182_v30  ;;  %v5360_v43 = vcombine.low %v1179_v31, %v1183_v32  ;;  %v7060_v30 = vmov 0.0|0.0  }
  0x75   :  { %v1263_v29 = vld [vmem:[#allocation13 + $0x3a8] sm:$0xff] }
  0x76   :  { %427 = vmatmul.mubr.bf16.gmra.mxu0 %v4733_v44  ;;  %500 = vmatmul.mubr.bf16.gmra.mxu1 %v4733_v44  ;;  %7385 = vst [vmem:[#allocation36_spill] sm:$0xff] %v5358_v42  ;;  %7386 = vst [vmem:[#allocation37_spill] sm:$0xff] %v5360_v43  ;;  %v5364_v44 = vcombine.high %v1170_v38, %v1174_v39 }
  0x77   :  { %893 = vmatpush1.bf16.msra.mxu0 %v4734_v45  ;;  %966 = vmatpush1.bf16.msra.mxu1 %v4737_v46  ;;  %v5366_v45 = vcombine.high %v1171_v40, %v1175_v41  ;;  %v1162_v46 = vld [vmem:[#allocation13 + $0x80] sm:$0xff] }
  0x78   :  { %894 = vmatprep.subr.bf16.mxu0 %v4742_v47  ;;  %967 = vmatprep.subr.bf16.mxu1 %v4745_v48  ;;  %7387 = vst [vmem:[#allocation38_spill] sm:$0xff] %v5364_v44  ;;  %v1166_v47 = vld [vmem:[#allocation13 + $0xa0] sm:$0xff]  ;;  %v1163_v48 = vld [vmem:[#allocation13 + $0x88] sm:$0xff] }
  0x79   :  { %436 = vmatprep.mubr.bf16.mxu0 %v5226_v0  ;;  %509 = vmatprep.mubr.bf16.mxu1 %v5226_v0  ;;  %7388 = vst [vmem:[#allocation39_spill] sm:$0xff] %v5366_v45 }
  0x7b   :  { %895 = vmatpush1.bf16.msra.mxu0 %v4740_v49  ;;  %968 = vmatpush1.bf16.msra.mxu1 %v4743_v50  ;;  %v1167_v49 = vld [vmem:[#allocation13 + $0xa8] sm:$0xff]  ;;  %v4774_v50 = vld [vmem:[#allocation8 + $0x10] sm:$0xff]  }
  0x7c   :  { %896 = vmatprep.subr.bf16.mxu0 %v4749_v51  ;;  %969 = vmatprep.subr.bf16.mxu1 %v4752_v52  ;;  %v5372_v51 = vcombine.low %v1170_v38, %v1174_v39  ;;  %v5374_v52 = vcombine.low %v1171_v40, %v1175_v41  ;;  %v1254_v38 = vld [vmem:[#allocation13 + $0x360] sm:$0xff]  ;;  %v1251_v39 = vld [vmem:[#allocation13 + $0x348] sm:$0xff]  ;;  %v5432_v41 = vcombine.high %v1259_v24, %v1263_v29 }
  0x7e   :  { %437 = vmatmul.mubr.bf16.gmra.mxu0 %v4746_v53  ;;  %510 = vmatmul.mubr.bf16.gmra.mxu1 %v4746_v53  ;;  %7389 = vst [vmem:[#allocation40_spill] sm:$0xff] %v5372_v51  ;;  %7390 = vst [vmem:[#allocation41_spill] sm:$0xff] %v5374_v52  ;;  %v5378_v53 = vcombine.high %v1162_v46, %v1166_v47 }
  0x7f   :  { %897 = vmatpush1.bf16.msra.mxu0 %v4747_v54  ;;  %970 = vmatpush1.bf16.msra.mxu1 %v4750_v55  ;;  %v5380_v54 = vcombine.high %v1163_v48, %v1167_v49  ;;  %v1154_v55 = vld [vmem:[#allocation13 + $0x40] sm:$0xff]  ;;  %7408 = vst [vmem:[#allocation59_spill] sm:$0xff] %v5432_v41 }
  0x80   :  { %898 = vmatprep.subr.bf16.mxu0 %v4755_v56  ;;  %971 = vmatprep.subr.bf16.mxu1 %v4758_v57  ;;  %7391 = vst [vmem:[#allocation42_spill] sm:$0xff] %v5378_v53  ;;  %v1158_v56 = vld [vmem:[#allocation13 + $0x60] sm:$0xff]  ;;  %v1155_v57 = vld [vmem:[#allocation13 + $0x48] sm:$0xff] }
  0x81   :  { %446 = vmatprep.mubr.bf16.mxu0 %v5226_v0  ;;  %519 = vmatprep.mubr.bf16.mxu1 %v5226_v0  ;;  %7392 = vst [vmem:[#allocation43_spill] sm:$0xff] %v5380_v54  ;;  %v5398_v5 = vcombine.low %v1154_v55, %v1158_v56 }
  0x83   :  { %899 = vmatpush1.bf16.msra.mxu0 %v4753_v58  ;;  %972 = vmatpush1.bf16.msra.mxu1 %v4756_v59  ;;  %v1159_v58 = vld [vmem:[#allocation13 + $0x68] sm:$0xff]  ;;  %v5384_v59 = vcombine.low %v1162_v46, %v1166_v47  ;;  %7397 = vst [vmem:[#allocation48_spill] sm:$0xff] %v5398_v5 }
  0x84   :  { %900 = vmatprep.subr.bf16.mxu0 %v4762_v60  ;;  %973 = vmatprep.subr.bf16.mxu1 %v4765_v61  ;;  %v5386_v60 = vcombine.low %v1163_v48, %v1167_v49  ;;  %v5390_v61 = vcombine.high %v1154_v55, %v1158_v56  ;;  %v5400_v6 = vcombine.low %v1155_v57, %v1159_v58  ;;  %v1255_v46 = vld [vmem:[#allocation13 + $0x368] sm:$0xff]  ;;  %v1242_v49 = vld [vmem:[#allocation13 + $0x300] sm:$0xff] }
  0x85   :  { %7393 = vst [vmem:[#allocation44_spill] sm:$0xff] %v5384_v59  ;;  %v5438_v48 = vcombine.low %v1259_v24, %v1263_v29  ;;  %v1243_v55 = vld [vmem:[#allocation13 + $0x308] sm:$0xff]  ;;  %v1230_v24 = vld [vmem:[#allocation13 + $0x2a0] sm:$0xff] }
  0x86   :  { %447 = vmatmul.mubr.bf16.gmra.mxu0 %v4759_v62  ;;  %520 = vmatmul.mubr.bf16.gmra.mxu1 %v4759_v62  ;;  %7394 = vst [vmem:[#allocation45_spill] sm:$0xff] %v5386_v60  ;;  %7395 = vst [vmem:[#allocation46_spill] sm:$0xff] %v5390_v61  ;;  %v5392_v62 = vcombine.high %v1155_v57, %v1159_v58  ;;  %v1247_v56 = vld [vmem:[#allocation13 + $0x328] sm:$0xff]  ;;  %v5444_v58 = vcombine.high %v1251_v39, %v1255_v46 }
  0x87   :  { %901 = vmatpush1.bf16.msra.mxu0 %v4760_v63  ;;  %974 = vmatpush1.bf16.msra.mxu1 %v4763_v1  ;;  %v1146_v63 = vld [vmem:[#allocation13] sm:$0xff]  ;;  %7398 = vst [vmem:[#allocation49_spill] sm:$0xff] %v5400_v6  ;;  %7410 = vst [vmem:[#allocation61_spill] sm:$0xff] %v5438_v48  ;;  %v1227_v29 = vld [vmem:[#allocation13 + $0x288] sm:$0xff] }
  0x88   :  { %902 = vmatprep.subr.bf16.mxu0 %v4768_v2  ;;  %975 = vmatprep.subr.bf16.mxu1 %v4771_v3  ;;  %7396 = vst [vmem:[#allocation47_spill] sm:$0xff] %v5392_v62  ;;  %v1150_v1 = vld [vmem:[#allocation13 + $0x20] sm:$0xff]  ;;  %v1147_v2 = vld [vmem:[#allocation13 + $0x8] sm:$0xff]  ;;  %7412 = vst [vmem:[#allocation63_spill] sm:$0xff] %v5444_v58 }
  0x89   :  { %920 = vmatprep.mubr.bf16.mxu0 %v5226_v0  ;;  %993 = vmatprep.mubr.bf16.mxu1 %v5226_v0  ;;  %v1151_v3 = vld [vmem:[#allocation13 + $0x28] sm:$0xff]  ;;  %v5404_v7 = vcombine.high %v1146_v63, %v1150_v1  ;;  %v5410_v14 = vcombine.low %v1146_v63, %v1150_v1  ;;  %v5450_v1 = vcombine.low %v1251_v39, %v1255_v46 }
  0x8a   :  { %v5412_v15 = vcombine.low %v1147_v2, %v1151_v3 }
  0x8b   :  { %903 = vmatpush1.bf16.msra.mxu0 %v4766_v8  ;;  %976 = vmatpush1.bf16.msra.mxu1 %v4769_v9  ;;  %7399 = vst [vmem:[#allocation50_spill] sm:$0xff] %v5404_v7  ;;  %v5406_v8 = vcombine.high %v1147_v2, %v1151_v3  ;;  %v1266_v9 = vld [vmem:[#allocation13 + $0x3c0] sm:$0xff]  ;;  %7401 = vst [vmem:[#allocation52_spill] sm:$0xff] %v5410_v14 }
  0x8c   :  { %1931 = vmatprep.subr.bf16.mxu0 %v5314_v10  ;;  %1972 = vmatprep.subr.bf16.mxu1 %v5316_v11  ;;  %7402 = vst [vmem:[#allocation53_spill] sm:$0xff] %v5412_v15  ;;  %v5416_v22 = vcombine.high %v1266_v9, %v1270_v12  ;;  %v5424_v31 = vcombine.low %v1266_v9, %v1270_v12  ;;  %7414 = vst [vmem:[#allocation65_spill] sm:$0xff] %v5450_v1  ;;  %v1234_v2 = vld [vmem:[#allocation13 + $0x2c0] sm:$0xff]  ;;  %v1239_v9 = vld [vmem:[#allocation13 + $0x2e8] sm:$0xff] }
  0x8d   :  { %7400 = vst [vmem:[#allocation51_spill] sm:$0xff] %v5406_v8  ;;  %v1238_v3 = vld [vmem:[#allocation13 + $0x2e0] sm:$0xff] }
  0x8e   :  { %921 = vmatmul.mubr.bf16.vlgmr.msra.gmra.mxu0 %v4772_v16  ;;  %994 = vmatmul.mubr.bf16.vlgmr.msra.gmra.mxu1 %v4772_v16  ;;  %v1258_v16 = vld [vmem:[#allocation13 + $0x380] sm:$0xff]  ;;  %7403 = vst [vmem:[#allocation54_spill] sm:$0xff] %v5416_v22  ;;  %7405 = vst [vmem:[#allocation56_spill] sm:$0xff] %v5424_v31  ;;  %v5472_v46 = vcombine.low %v1234_v2, %v1238_v3 }
  0x8f   :  { %1932 = vmatpush1.bf16.msra.mxu0 %v5320_v17  ;;  %1973 = vmatpush1.bf16.msra.mxu1 %v5322_v18  ;;  %v5430_v40 = vcombine.high %v1258_v16, %v1262_v21  ;;  %v5436_v47 = vcombine.low %v1258_v16, %v1262_v21  ;;  %v5462_v16 = vcombine.low %v1243_v55, %v1247_v56  ;;  %v1226_v21 = vld [vmem:[#allocation13 + $0x280] sm:$0xff] }
  0x90   :  { %1933 = vmatprep.subr.bf16.mxu0 %v5326_v19  ;;  %1974 = vmatprep.subr.bf16.mxu1 %v5328_v20  ;;  %7421 = vst [vmem:[#allocation72_spill] sm:$0xff] %v5472_v46 }
  0x91   :  { %930 = vmatprep.mubr.bf16.mxu0 %v5226_v0  ;;  %1003 = vmatprep.mubr.bf16.mxu1 %v5226_v0  ;;  %7407 = vst [vmem:[#allocation58_spill] sm:$0xff] %v5430_v40  ;;  %7409 = vst [vmem:[#allocation60_spill] sm:$0xff] %v5436_v47 }
  0x92   :  { %7418 = vst [vmem:[#allocation69_spill] sm:$0xff] %v5462_v16 }
  0x93   :  { %1934 = vmatpush1.bf16.msra.mxu0 %v5332_v25  ;;  %1975 = vmatpush1.bf16.msra.mxu1 %v5334_v26 }
  0x94   :  { %1935 = vmatprep.subr.bf16.mxu0 %v5338_v27  ;;  %1976 = vmatprep.subr.bf16.mxu1 %v5340_v28 }
  0x96   :  { %931 = vmatmul.mubr.bf16.gmra.mxu0 %v4773_v33  ;;  %1004 = vmatmul.mubr.bf16.gmra.mxu1 %v4773_v33  ;;  %v1250_v33 = vld [vmem:[#allocation13 + $0x340] sm:$0xff] }
  0x97   :  { %1936 = vmatpush1.bf16.msra.mxu0 %v5346_v34  ;;  %1977 = vmatpush1.bf16.msra.mxu1 %v5348_v35  ;;  %v5442_v57 = vcombine.high %v1250_v33, %v1254_v38  ;;  %v5448_v63 = vcombine.low %v1250_v33, %v1254_v38  ;;  %v1231_v33 = vld [vmem:[#allocation13 + $0x2a8] sm:$0xff]  ;;  %v5466_v38 = vcombine.high %v1234_v2, %v1238_v3 }
  0x98   :  { %1937 = vmatprep.subr.bf16.mxu0 %v5352_v36  ;;  %1978 = vmatprep.subr.bf16.mxu1 %v5354_v37  ;;  %v5484_v2 = vcombine.low %v1226_v21, %v1230_v24  ;;  %v5486_v3 = vcombine.low %v1227_v29, %v1231_v33 }
  0x99   :  { %940 = vmatprep.mubr.bf16.mxu0 %v5226_v0  ;;  %1013 = vmatprep.mubr.bf16.mxu1 %v5226_v0  ;;  %7411 = vst [vmem:[#allocation62_spill] sm:$0xff] %v5442_v57  ;;  %7413 = vst [vmem:[#allocation64_spill] sm:$0xff] %v5448_v63 }
  0x9a   :  { %7419 = vst [vmem:[#allocation70_spill] sm:$0xff] %v5466_v38  ;;  %7425 = vst [vmem:[#allocation76_spill] sm:$0xff] %v5484_v2 }
  0x9b   :  { %1938 = vmatpush1.bf16.msra.mxu0 %v5358_v42  ;;  %1979 = vmatpush1.bf16.msra.mxu1 %v5360_v43  ;;  %7426 = vst [vmem:[#allocation77_spill] sm:$0xff] %v5486_v3 }
  0x9c   :  { %1939 = vmatprep.subr.bf16.mxu0 %v5364_v44  ;;  %1980 = vmatprep.subr.bf16.mxu1 %v5366_v45 }
  0x9e   :  { %941 = vmatmul.mubr.bf16.gmra.mxu0 %v4774_v50  ;;  %1014 = vmatmul.mubr.bf16.gmra.mxu1 %v4774_v50  ;;  %v1246_v50 = vld [vmem:[#allocation13 + $0x320] sm:$0xff] }
  0x9f   :  { %1940 = vmatpush1.bf16.msra.mxu0 %v5372_v51  ;;  %1981 = vmatpush1.bf16.msra.mxu1 %v5374_v52  ;;  %v5454_v12 = vcombine.high %v1242_v49, %v1246_v50 }
  0xa0   :  { %1941 = vmatprep.subr.bf16.mxu0 %v5378_v53  ;;  %1982 = vmatprep.subr.bf16.mxu1 %v5380_v54 }
  0xa1   :  { %950 = vmatprep.mubr.bf16.mxu0 %v5226_v0  ;;  %1023 = vmatprep.mubr.bf16.mxu1 %v5226_v0  ;;  %v1267_v0 = vld [vmem:[#allocation13 + $0x3c8] sm:$0xff]  ;;  %7415 = vst [vmem:[#allocation66_spill] sm:$0xff] %v5454_v12 }
  0xa2   :  { %v5418_v23 = vcombine.high %v1267_v0, %v1271_v13  ;;  %v5426_v32 = vcombine.low %v1267_v0, %v1271_v13  ;;  %v5456_v0 = vcombine.high %v1243_v55, %v1247_v56  ;;  %v5460_v13 = vcombine.low %v1242_v49, %v1246_v50  ;;  %v1218_v50 = vld [vmem:[#allocation13 + $0x240] sm:$0xff]  ;;  %v1219_v56 = vld [vmem:[#allocation13 + $0x248] sm:$0xff] }
  0xa3   :  { %1942 = vmatpush1.bf16.msra.mxu0 %v5384_v59  ;;  %1983 = vmatpush1.bf16.msra.mxu1 %v5386_v60  ;;  %v1222_v55 = vld [vmem:[#allocation13 + $0x260] sm:$0xff] }
  0xa4   :  { %1943 = vmatprep.subr.bf16.mxu0 %v5390_v61  ;;  %1984 = vmatprep.subr.bf16.mxu1 %v5392_v62  ;;  %7404 = vst [vmem:[#allocation55_spill] sm:$0xff] %v5418_v23  ;;  %7406 = vst [vmem:[#allocation57_spill] sm:$0xff] %v5426_v32 }
  0xa5   :  { %7416 = vst [vmem:[#allocation67_spill] sm:$0xff] %v5456_v0  ;;  %7417 = vst [vmem:[#allocation68_spill] sm:$0xff] %v5460_v13 }
  0xa6   :  { %951 = vmatmul.mubr.bf16.gmra.mxu0 %v4775_v4  ;;  %1024 = vmatmul.mubr.bf16.gmra.mxu1 %v4775_v4  ;;  %v1235_v4 = vld [vmem:[#allocation13 + $0x2c8] sm:$0xff] }
  0xa7   :  { %1944 = vmatpush1.bf16.msra.mxu0 %v5398_v5  ;;  %1985 = vmatpush1.bf16.msra.mxu1 %v5400_v6  ;;  %v5468_v39 = vcombine.high %v1235_v4, %v1239_v9  ;;  %v5474_v49 = vcombine.low %v1235_v4, %v1239_v9  ;;  %v5490_v4 = vcombine.high %v1218_v50, %v1222_v55 }
  0xa8   :  { %1945 = vmatprep.subr.bf16.mxu0 %v5404_v7  ;;  %1986 = vmatprep.subr.bf16.mxu1 %v5406_v8 }
  0xa9   :  { %1963 = vmatprep.mubr.bf16.mxu0 %v7060_v30  ;;  %2004 = vmatprep.mubr.bf16.mxu1 %v7060_v30  ;;  %7420 = vst [vmem:[#allocation71_spill] sm:$0xff] %v5468_v39  ;;  %7422 = vst [vmem:[#allocation73_spill] sm:$0xff] %v5474_v49  ;;  %v1223_v30 = vld [vmem:[#allocation13 + $0x268] sm:$0xff] }
  0xaa   :  { %7427 = vst [vmem:[#allocation78_spill] sm:$0xff] %v5490_v4  ;;  %v5492_v9 = vcombine.high %v1219_v56, %v1223_v30 }
  0xab   :  { %1946 = vmatpush1.bf16.msra.mxu0 %v5410_v14  ;;  %1987 = vmatpush1.bf16.msra.mxu1 %v5412_v15 }
  0xac   :  { %1947 = vmatprep.subr.bf16.mxu0 %v5416_v22  ;;  %1988 = vmatprep.subr.bf16.mxu1 %v5418_v23  ;;  %7428 = vst [vmem:[#allocation79_spill] sm:$0xff] %v5492_v9 }
  0xaf   :  { %1948 = vmatpush2.bf16.msra.mxu0 %v5424_v31  ;;  %1989 = vmatpush2.bf16.msra.mxu1 %v5426_v32 }
  0xb0   :  { %1949 = vmatprep.subr.bf16.mxu0 %v5430_v40  ;;  %1990 = vmatprep.subr.bf16.mxu1 %v5432_v41 }
  0xb3   :  { %1950 = vmatpush2.bf16.msra.mxu0 %v5436_v47  ;;  %1991 = vmatpush2.bf16.msra.mxu1 %v5438_v48 }
  0xb4   :  { %1951 = vmatprep.subr.bf16.mxu0 %v5442_v57  ;;  %1992 = vmatprep.subr.bf16.mxu1 %v5444_v58 }
  0xb7   :  { %1952 = vmatpush2.bf16.msra.mxu0 %v5448_v63  ;;  %1993 = vmatpush2.bf16.msra.mxu1 %v5450_v1  ;;  %v7441_v1 = vmov 0.0|0.0  }
  0xb8   :  { %1953 = vmatprep.subr.bf16.mxu0 %v5454_v12  ;;  %1994 = vmatprep.subr.bf16.mxu1 %v5456_v0  ;;  %v5478_v0 = vcombine.high %v1226_v21, %v1230_v24  ;;  %v5480_v12 = vcombine.high %v1227_v29, %v1231_v33  ;;  %v5496_v21 = vcombine.low %v1218_v50, %v1222_v55 }
  0xb9   :  { %v5498_v24 = vcombine.low %v1219_v56, %v1223_v30 }
  0xba   :  { %7423 = vst [vmem:[#allocation74_spill] sm:$0xff] %v5478_v0  ;;  %7424 = vst [vmem:[#allocation75_spill] sm:$0xff] %v5480_v12 }
  0xbb   :  { %1954 = vmatpush2.bf16.msra.mxu0 %v5460_v13  ;;  %1995 = vmatpush2.bf16.msra.mxu1 %v5462_v16  ;;  %v1211_v16 = vld [vmem:[#allocation13 + $0x208] sm:$0xff]  ;;  %7429 = vst [vmem:[#allocation80_spill] sm:$0xff] %v5496_v21  ;;  %7430 = vst [vmem:[#allocation81_spill] sm:$0xff] %v5498_v24 }
  0xbc   :  { %1955 = vmatprep.subr.bf16.mxu0 %v5466_v38  ;;  %1996 = vmatprep.subr.bf16.mxu1 %v5468_v39  ;;  %v1210_v39 = vld [vmem:[#allocation13 + $0x200] sm:$0xff]  ;;  %v1215_v13 = vld [vmem:[#allocation13 + $0x228] sm:$0xff] }
  0xbd   :  { %v1214_v38 = vld [vmem:[#allocation13 + $0x220] sm:$0xff]  ;;  %v5504_v33 = vcombine.high %v1211_v16, %v1215_v13  ;;  %v5510_v30 = vcombine.low %v1211_v16, %v1215_v13 }
  0xbe   :  { %v5502_v29 = vcombine.high %v1210_v39, %v1214_v38  ;;  %v5508_v50 = vcombine.low %v1210_v39, %v1214_v38 }
  0xbf   :  { %1956 = vmatpush2.bf16.msra.mxu0 %v5472_v46  ;;  %1997 = vmatpush2.bf16.msra.mxu1 %v5474_v49  ;;  %7432 = vst [vmem:[#allocation83_spill] sm:$0xff] %v5504_v33  ;;  %v1205_v49 = vld [vmem:[#allocation13 + $0x1d8] sm:$0xff]  ;;  %7434 = vst [vmem:[#allocation85_spill] sm:$0xff] %v5510_v30 }
  0xc0   :  { %1957 = vmatprep.subr.bf16.mxu0 %v5478_v0  ;;  %1998 = vmatprep.subr.bf16.mxu1 %v5480_v12  ;;  %7431 = vst [vmem:[#allocation82_spill] sm:$0xff] %v5502_v29  ;;  %v1204_v12 = vld [vmem:[#allocation13 + $0x1d0] sm:$0xff]  ;;  %v1209_v46 = vld [vmem:[#allocation13 + $0x1f8] sm:$0xff]  ;;  %7433 = vst [vmem:[#allocation84_spill] sm:$0xff] %v5508_v50 }
  0xc1   :  { %v1208_v0 = vld [vmem:[#allocation13 + $0x1f0] sm:$0xff]  ;;  %v5516_v56 = vcombine.high %v1205_v49, %v1209_v46  ;;  %v5522_v13 = vcombine.low %v1205_v49, %v1209_v46 }
  0xc2   :  { %v5514_v55 = vcombine.high %v1204_v12, %v1208_v0  ;;  %v5520_v38 = vcombine.low %v1204_v12, %v1208_v0 }
  0xc3   :  { %1958 = vmatpush2.bf16.msra.mxu0 %v5484_v2  ;;  %1999 = vmatpush2.bf16.msra.mxu1 %v5486_v3  ;;  %7436 = vst [vmem:[#allocation87_spill] sm:$0xff] %v5516_v56  ;;  %v1197_v3 = vld [vmem:[#allocation13 + $0x198] sm:$0xff]  ;;  %7438 = vst [vmem:[#allocation89_spill] sm:$0xff] %v5522_v13 }
  0xc4   :  { %1959 = vmatprep.subr.bf16.mxu0 %v5490_v4  ;;  %2000 = vmatprep.subr.bf16.mxu1 %v5492_v9  ;;  %7435 = vst [vmem:[#allocation86_spill] sm:$0xff] %v5514_v55  ;;  %v1196_v9 = vld [vmem:[#allocation13 + $0x190] sm:$0xff]  ;;  %v1201_v2 = vld [vmem:[#allocation13 + $0x1b8] sm:$0xff]  ;;  %7437 = vst [vmem:[#allocation88_spill] sm:$0xff] %v5520_v38 }
  0xc5   :  { %v1200_v4 = vld [vmem:[#allocation13 + $0x1b0] sm:$0xff]  ;;  %v5528_v39 = vcombine.high %v1197_v3, %v1201_v2  ;;  %v5536_v0 = vcombine.low %v1197_v3, %v1201_v2 }
  0xc6   :  { %v5526_v16 = vcombine.high %v1196_v9, %v1200_v4  ;;  %v5534_v12 = vcombine.low %v1196_v9, %v1200_v4 }
  0xc7   :  { %1960 = vmatpush2.bf16.msra.mxu0 %v5496_v21  ;;  %2001 = vmatpush2.bf16.msra.mxu1 %v5498_v24  ;;  %7440 = vst [vmem:[#allocation91_spill] sm:$0xff] %v5528_v39  ;;  %v1189_v24 = vld [vmem:[#allocation13 + $0x158] sm:$0xff]  ;;  %7443 = vst [vmem:[#allocation93_spill] sm:$0xff] %v5536_v0 }
  0xc8   :  { %1961 = vmatprep.subr.bf16.mxu0 %v5502_v29  ;;  %2002 = vmatprep.subr.bf16.mxu1 %v5504_v33  ;;  %7439 = vst [vmem:[#allocation90_spill] sm:$0xff] %v5526_v16  ;;  %v1188_v33 = vld [vmem:[#allocation13 + $0x150] sm:$0xff]  ;;  %v1193_v21 = vld [vmem:[#allocation13 + $0x178] sm:$0xff]  ;;  %7442 = vst [vmem:[#allocation92_spill] sm:$0xff] %v5534_v12 }
  0xc9   :  { %v1192_v29 = vld [vmem:[#allocation13 + $0x170] sm:$0xff]  ;;  %v5542_v49 = vcombine.high %v1189_v24, %v1193_v21  ;;  %v5550_v3 = vcombine.low %v1189_v24, %v1193_v21 }
  0xca   :  { %v5540_v46 = vcombine.high %v1188_v33, %v1192_v29  ;;  %v5548_v2 = vcombine.low %v1188_v33, %v1192_v29 }
  0xcb   :  { %1962 = vmatpush2.bf16.msra.mxu0 %v5508_v50  ;;  %2003 = vmatpush2.bf16.msra.mxu1 %v5510_v30  ;;  %7445 = vst [vmem:[#allocation95_spill] sm:$0xff] %v5542_v49  ;;  %v1181_v30 = vld [vmem:[#allocation13 + $0x118] sm:$0xff]  ;;  %7447 = vst [vmem:[#allocation97_spill] sm:$0xff] %v5550_v3 }
  0xcc   :  { %2013 = vmatprep.subr.bf16.mxu0 %v5514_v55  ;;  %2054 = vmatprep.subr.bf16.mxu1 %v5516_v56  ;;  %7444 = vst [vmem:[#allocation94_spill] sm:$0xff] %v5540_v46  ;;  %v1180_v56 = vld [vmem:[#allocation13 + $0x110] sm:$0xff]  ;;  %v1185_v50 = vld [vmem:[#allocation13 + $0x138] sm:$0xff]  ;;  %7446 = vst [vmem:[#allocation96_spill] sm:$0xff] %v5548_v2 }
  0xcd   :  { %v1184_v55 = vld [vmem:[#allocation13 + $0x130] sm:$0xff]  ;;  %v5556_v9 = vcombine.high %v1181_v30, %v1185_v50  ;;  %v5562_v21 = vcombine.low %v1181_v30, %v1185_v50 }
  0xce   :  { %1964 = vmatmul.mubr.bf16.vlgmr.msra.gmra.mxu0 %v7441_v1  ;;  %2005 = vmatmul.mubr.bf16.vlgmr.msra.gmra.mxu1 %v7441_v1  ;;  %v5554_v4 = vcombine.high %v1180_v56, %v1184_v55  ;;  %v5560_v29 = vcombine.low %v1180_v56, %v1184_v55 }
  0xcf   :  { %2014 = vmatpush1.bf16.msra.mxu0 %v5520_v38  ;;  %2055 = vmatpush1.bf16.msra.mxu1 %v5522_v13  ;;  %7449 = vst [vmem:[#allocation99_spill] sm:$0xff] %v5556_v9  ;;  %v1173_v13 = vld [vmem:[#allocation13 + $0xd8] sm:$0xff]  ;;  %7451 = vst [vmem:[#allocation101_spill] sm:$0xff] %v5562_v21 }
  0xd0   :  { %2015 = vmatprep.subr.bf16.mxu0 %v5526_v16  ;;  %2056 = vmatprep.subr.bf16.mxu1 %v5528_v39  ;;  %7448 = vst [vmem:[#allocation98_spill] sm:$0xff] %v5554_v4  ;;  %v1172_v39 = vld [vmem:[#allocation13 + $0xd0] sm:$0xff]  ;;  %v1177_v38 = vld [vmem:[#allocation13 + $0xf8] sm:$0xff]  ;;  %7450 = vst [vmem:[#allocation100_spill] sm:$0xff] %v5560_v29 }
  0xd1   :  { %2045 = vmatprep.mubr.bf16.mxu0 %v7441_v1  ;;  %2086 = vmatprep.mubr.bf16.mxu1 %v7441_v1  ;;  %v1176_v16 = vld [vmem:[#allocation13 + $0xf0] sm:$0xff]  ;;  %v5568_v33 = vcombine.high %v1173_v13, %v1177_v38  ;;  %v5574_v50 = vcombine.low %v1173_v13, %v1177_v38 }
  0xd2   :  { %v5566_v24 = vcombine.high %v1172_v39, %v1176_v16  ;;  %v5572_v55 = vcombine.low %v1172_v39, %v1176_v16 }
  0xd3   :  { %2016 = vmatpush1.bf16.msra.mxu0 %v5534_v12  ;;  %2057 = vmatpush1.bf16.msra.mxu1 %v5536_v0  ;;  %7453 = vst [vmem:[#allocation103_spill] sm:$0xff] %v5568_v33  ;;  %v1165_v0 = vld [vmem:[#allocation13 + $0x98] sm:$0xff]  ;;  %7455 = vst [vmem:[#allocation105_spill] sm:$0xff] %v5574_v50 }
  0xd4   :  { %2017 = vmatprep.subr.bf16.mxu0 %v5540_v46  ;;  %2058 = vmatprep.subr.bf16.mxu1 %v5542_v49  ;;  %7452 = vst [vmem:[#allocation102_spill] sm:$0xff] %v5566_v24  ;;  %v1164_v49 = vld [vmem:[#allocation13 + $0x90] sm:$0xff]  ;;  %v1169_v12 = vld [vmem:[#allocation13 + $0xb8] sm:$0xff]  ;;  %7454 = vst [vmem:[#allocation104_spill] sm:$0xff] %v5572_v55 }
  0xd5   :  { %v1168_v46 = vld [vmem:[#allocation13 + $0xb0] sm:$0xff]  ;;  %v5580_v56 = vcombine.high %v1165_v0, %v1169_v12  ;;  %v5586_v38 = vcombine.low %v1165_v0, %v1169_v12 }
  0xd6   :  { %v5578_v30 = vcombine.high %v1164_v49, %v1168_v46  ;;  %v5584_v16 = vcombine.low %v1164_v49, %v1168_v46 }
  0xd7   :  { %2018 = vmatpush1.bf16.msra.mxu0 %v5548_v2  ;;  %2059 = vmatpush1.bf16.msra.mxu1 %v5550_v3  ;;  %7457 = vst [vmem:[#allocation107_spill] sm:$0xff] %v5580_v56  ;;  %v1157_v3 = vld [vmem:[#allocation13 + $0x58] sm:$0xff]  ;;  %7459 = vst [vmem:[#allocation109_spill] sm:$0xff] %v5586_v38 }
  0xd8   :  { %2019 = vmatprep.subr.bf16.mxu0 %v5554_v4  ;;  %2060 = vmatprep.subr.bf16.mxu1 %v5556_v9  ;;  %7456 = vst [vmem:[#allocation106_spill] sm:$0xff] %v5578_v30  ;;  %v1156_v9 = vld [vmem:[#allocation13 + $0x50] sm:$0xff]  ;;  %v1161_v2 = vld [vmem:[#allocation13 + $0x78] sm:$0xff]  ;;  %7458 = vst [vmem:[#allocation108_spill] sm:$0xff] %v5584_v16 }
  0xd9   :  { %v1160_v4 = vld [vmem:[#allocation13 + $0x70] sm:$0xff]  ;;  %v5592_v39 = vcombine.high %v1157_v3, %v1161_v2  ;;  %v5598_v12 = vcombine.low %v1157_v3, %v1161_v2 }
  0xda   :  { %v5590_v13 = vcombine.high %v1156_v9, %v1160_v4  ;;  %v5596_v46 = vcombine.low %v1156_v9, %v1160_v4 }
  0xdb   :  { %2020 = vmatpush1.bf16.msra.mxu0 %v5560_v29  ;;  %2061 = vmatpush1.bf16.msra.mxu1 %v5562_v21  ;;  %7461 = vst [vmem:[#allocation111_spill] sm:$0xff] %v5592_v39  ;;  %v1149_v21 = vld [vmem:[#allocation13 + $0x18] sm:$0xff]  ;;  %7463 = vst [vmem:[#allocation113_spill] sm:$0xff] %v5598_v12 }
  0xdc   :  { %2021 = vmatprep.subr.bf16.mxu0 %v5566_v24  ;;  %2062 = vmatprep.subr.bf16.mxu1 %v5568_v33  ;;  %7460 = vst [vmem:[#allocation110_spill] sm:$0xff] %v5590_v13  ;;  %v1148_v33 = vld [vmem:[#allocation13 + $0x10] sm:$0xff]  ;;  %v1153_v29 = vld [vmem:[#allocation13 + $0x38] sm:$0xff]  ;;  %7462 = vst [vmem:[#allocation112_spill] sm:$0xff] %v5596_v46 }
  0xdd   :  { %v1152_v24 = vld [vmem:[#allocation13 + $0x30] sm:$0xff]  ;;  %v5604_v49 = vcombine.high %v1149_v21, %v1153_v29  ;;  %v5610_v2 = vcombine.low %v1149_v21, %v1153_v29 }
  0xde   :  { %v5602_v0 = vcombine.high %v1148_v33, %v1152_v24  ;;  %v5608_v4 = vcombine.low %v1148_v33, %v1152_v24 }
  0xdf   :  { %2022 = vmatpush1.bf16.msra.mxu0 %v5572_v55  ;;  %2063 = vmatpush1.bf16.msra.mxu1 %v5574_v50  ;;  %7465 = vst [vmem:[#allocation115_spill] sm:$0xff] %v5604_v49  ;;  %v1269_v50 = vld [vmem:[#allocation13 + $0x3d8] sm:$0xff]  ;;  %7467 = vst [vmem:[#allocation117_spill] sm:$0xff] %v5610_v2 }
  0xe0   :  { %2023 = vmatprep.subr.bf16.mxu0 %v5578_v30  ;;  %2064 = vmatprep.subr.bf16.mxu1 %v5580_v56  ;;  %7464 = vst [vmem:[#allocation114_spill] sm:$0xff] %v5602_v0  ;;  %v1268_v56 = vld [vmem:[#allocation13 + $0x3d0] sm:$0xff]  ;;  %v1273_v55 = vld [vmem:[#allocation13 + $0x3f8] sm:$0xff]  ;;  %7466 = vst [vmem:[#allocation116_spill] sm:$0xff] %v5608_v4 }
  0xe1   :  { %v1272_v30 = vld [vmem:[#allocation13 + $0x3f0] sm:$0xff]  ;;  %v5616_v9 = vcombine.high %v1269_v50, %v1273_v55  ;;  %v5622_v29 = vcombine.low %v1269_v50, %v1273_v55 }
  0xe2   :  { %v5614_v3 = vcombine.high %v1268_v56, %v1272_v30  ;;  %v5620_v24 = vcombine.low %v1268_v56, %v1272_v30 }
  0xe3   :  { %2024 = vmatpush1.bf16.msra.mxu0 %v5584_v16  ;;  %2065 = vmatpush1.bf16.msra.mxu1 %v5586_v38  ;;  %7469 = vst [vmem:[#allocation119_spill] sm:$0xff] %v5616_v9  ;;  %v1261_v38 = vld [vmem:[#allocation13 + $0x398] sm:$0xff]  ;;  %7471 = vst [vmem:[#allocation121_spill] sm:$0xff] %v5622_v29 }
  0xe4   :  { %2025 = vmatprep.subr.bf16.mxu0 %v5590_v13  ;;  %2066 = vmatprep.subr.bf16.mxu1 %v5592_v39  ;;  %7468 = vst [vmem:[#allocation118_spill] sm:$0xff] %v5614_v3  ;;  %v1260_v39 = vld [vmem:[#allocation13 + $0x390] sm:$0xff]  ;;  %v1265_v16 = vld [vmem:[#allocation13 + $0x3b8] sm:$0xff]  ;;  %7470 = vst [vmem:[#allocation120_spill] sm:$0xff] %v5620_v24 }
  0xe5   :  { %v1264_v13 = vld [vmem:[#allocation13 + $0x3b0] sm:$0xff]  ;;  %v5628_v33 = vcombine.high %v1261_v38, %v1265_v16  ;;  %v5634_v55 = vcombine.low %v1261_v38, %v1265_v16 }
  0xe6   :  { %v5626_v21 = vcombine.high %v1260_v39, %v1264_v13  ;;  %v5632_v30 = vcombine.low %v1260_v39, %v1264_v13 }
  0xe7   :  { %2026 = vmatpush1.bf16.msra.mxu0 %v5596_v46  ;;  %2067 = vmatpush1.bf16.msra.mxu1 %v5598_v12  ;;  %7473 = vst [vmem:[#allocation123_spill] sm:$0xff] %v5628_v33  ;;  %v1253_v12 = vld [vmem:[#allocation13 + $0x358] sm:$0xff]  ;;  %7475 = vst [vmem:[#allocation125_spill] sm:$0xff] %v5634_v55 }
  0xe8   :  { %2027 = vmatprep.subr.bf16.mxu0 %v5602_v0  ;;  %2068 = vmatprep.subr.bf16.mxu1 %v5604_v49  ;;  %7472 = vst [vmem:[#allocation122_spill] sm:$0xff] %v5626_v21  ;;  %v1252_v49 = vld [vmem:[#allocation13 + $0x350] sm:$0xff]  ;;  %v1257_v46 = vld [vmem:[#allocation13 + $0x378] sm:$0xff]  ;;  %7474 = vst [vmem:[#allocation124_spill] sm:$0xff] %v5632_v30 }
  0xe9   :  { %v1256_v0 = vld [vmem:[#allocation13 + $0x370] sm:$0xff]  ;;  %v5640_v56 = vcombine.high %v1253_v12, %v1257_v46  ;;  %v5646_v16 = vcombine.low %v1253_v12, %v1257_v46 }
  0xea   :  { %v5638_v50 = vcombine.high %v1252_v49, %v1256_v0  ;;  %v5644_v13 = vcombine.low %v1252_v49, %v1256_v0 }
  0xeb   :  { %2028 = vmatpush1.bf16.msra.mxu0 %v5608_v4  ;;  %2069 = vmatpush1.bf16.msra.mxu1 %v5610_v2  ;;  %7477 = vst [vmem:[#allocation127_spill] sm:$0xff] %v5640_v56  ;;  %v1245_v2 = vld [vmem:[#allocation13 + $0x318] sm:$0xff]  ;;  %7479 = vst [vmem:[#allocation129_spill] sm:$0xff] %v5646_v16 }
  0xec   :  { %2029 = vmatprep.subr.bf16.mxu0 %v5614_v3  ;;  %2070 = vmatprep.subr.bf16.mxu1 %v5616_v9  ;;  %7476 = vst [vmem:[#allocation126_spill] sm:$0xff] %v5638_v50  ;;  %v1244_v9 = vld [vmem:[#allocation13 + $0x310] sm:$0xff]  ;;  %v1249_v4 = vld [vmem:[#allocation13 + $0x338] sm:$0xff]  ;;  %7478 = vst [vmem:[#allocation128_spill] sm:$0xff] %v5644_v13 }
  0xed   :  { %v1248_v3 = vld [vmem:[#allocation13 + $0x330] sm:$0xff]  ;;  %v5652_v39 = vcombine.high %v1245_v2, %v1249_v4  ;;  %v5658_v46 = vcombine.low %v1245_v2, %v1249_v4 }
  0xee   :  { %v5650_v38 = vcombine.high %v1244_v9, %v1248_v3  ;;  %v5656_v0 = vcombine.low %v1244_v9, %v1248_v3 }
  0xef   :  { %2030 = vmatpush2.bf16.msra.mxu0 %v5620_v24  ;;  %2071 = vmatpush2.bf16.msra.mxu1 %v5622_v29  ;;  %7481 = vst [vmem:[#allocation131_spill] sm:$0xff] %v5652_v39  ;;  %v1237_v29 = vld [vmem:[#allocation13 + $0x2d8] sm:$0xff]  ;;  %7483 = vst [vmem:[#allocation133_spill] sm:$0xff] %v5658_v46 }
  0xf0   :  { %2031 = vmatprep.subr.bf16.mxu0 %v5626_v21  ;;  %2072 = vmatprep.subr.bf16.mxu1 %v5628_v33  ;;  %7480 = vst [vmem:[#allocation130_spill] sm:$0xff] %v5650_v38  ;;  %v1236_v33 = vld [vmem:[#allocation13 + $0x2d0] sm:$0xff]  ;;  %v1241_v24 = vld [vmem:[#allocation13 + $0x2f8] sm:$0xff]  ;;  %7482 = vst [vmem:[#allocation132_spill] sm:$0xff] %v5656_v0 }
  0xf1   :  { %v1240_v21 = vld [vmem:[#allocation13 + $0x2f0] sm:$0xff]  ;;  %v5664_v49 = vcombine.high %v1237_v29, %v1241_v24  ;;  %v5670_v4 = vcombine.low %v1237_v29, %v1241_v24 }
  0xf2   :  { %v5662_v12 = vcombine.high %v1236_v33, %v1240_v21  ;;  %v5668_v3 = vcombine.low %v1236_v33, %v1240_v21 }
  0xf3   :  { %2032 = vmatpush2.bf16.msra.mxu0 %v5632_v30  ;;  %2073 = vmatpush2.bf16.msra.mxu1 %v5634_v55  ;;  %7485 = vst [vmem:[#allocation135_spill] sm:$0xff] %v5664_v49  ;;  %v1229_v55 = vld [vmem:[#allocation13 + $0x298] sm:$0xff]  ;;  %7487 = vst [vmem:[#allocation137_spill] sm:$0xff] %v5670_v4 }
  0xf4   :  { %2033 = vmatprep.subr.bf16.mxu0 %v5638_v50  ;;  %2074 = vmatprep.subr.bf16.mxu1 %v5640_v56  ;;  %7484 = vst [vmem:[#allocation134_spill] sm:$0xff] %v5662_v12  ;;  %v1228_v56 = vld [vmem:[#allocation13 + $0x290] sm:$0xff]  ;;  %v1233_v30 = vld [vmem:[#allocation13 + $0x2b8] sm:$0xff]  ;;  %7486 = vst [vmem:[#allocation136_spill] sm:$0xff] %v5668_v3 }
  0xf5   :  { %v1232_v50 = vld [vmem:[#allocation13 + $0x2b0] sm:$0xff]  ;;  %v5676_v9 = vcombine.high %v1229_v55, %v1233_v30  ;;  %v5682_v24 = vcombine.low %v1229_v55, %v1233_v30 }
  0xf6   :  { %v5674_v2 = vcombine.high %v1228_v56, %v1232_v50  ;;  %v5680_v21 = vcombine.low %v1228_v56, %v1232_v50 }
  0xf7   :  { %2034 = vmatpush2.bf16.msra.mxu0 %v5644_v13  ;;  %2075 = vmatpush2.bf16.msra.mxu1 %v5646_v16  ;;  %7489 = vst [vmem:[#allocation139_spill] sm:$0xff] %v5676_v9  ;;  %v1221_v16 = vld [vmem:[#allocation13 + $0x258] sm:$0xff]  ;;  %7491 = vst [vmem:[#allocation141_spill] sm:$0xff] %v5682_v24 }
  0xf8   :  { %2035 = vmatprep.subr.bf16.mxu0 %v5650_v38  ;;  %2076 = vmatprep.subr.bf16.mxu1 %v5652_v39  ;;  %7488 = vst [vmem:[#allocation138_spill] sm:$0xff] %v5674_v2  ;;  %v1220_v39 = vld [vmem:[#allocation13 + $0x250] sm:$0xff]  ;;  %v1225_v13 = vld [vmem:[#allocation13 + $0x278] sm:$0xff]  ;;  %7490 = vst [vmem:[#allocation140_spill] sm:$0xff] %v5680_v21 }
  0xf9   :  { %v1224_v38 = vld [vmem:[#allocation13 + $0x270] sm:$0xff]  ;;  %v5688_v33 = vcombine.high %v1221_v16, %v1225_v13  ;;  %v5694_v30 = vcombine.low %v1221_v16, %v1225_v13 }
  0xfa   :  { %v5686_v29 = vcombine.high %v1220_v39, %v1224_v38  ;;  %v5692_v50 = vcombine.low %v1220_v39, %v1224_v38  ;;  %v178_v39 = vld [vmem:[%s7054_s4] sm:$0xf] }
  0xfb   :  { %2036 = vmatpush2.bf16.msra.mxu0 %v5656_v0  ;;  %2077 = vmatpush2.bf16.msra.mxu1 %v5658_v46  ;;  %7493 = vst [vmem:[#allocation143_spill] sm:$0xff] %v5688_v33  ;;  %v1213_v46 = vld [vmem:[#allocation13 + $0x218] sm:$0xff]  ;;  %7495 = vst [vmem:[#allocation145_spill] sm:$0xff] %v5694_v30 }
  0xfc   :  { %2037 = vmatprep.subr.bf16.mxu0 %v5662_v12  ;;  %2078 = vmatprep.subr.bf16.mxu1 %v5664_v49  ;;  %7492 = vst [vmem:[#allocation142_spill] sm:$0xff] %v5686_v29  ;;  %v1212_v49 = vld [vmem:[#allocation13 + $0x210] sm:$0xff]  ;;  %v1217_v0 = vld [vmem:[#allocation13 + $0x238] sm:$0xff]  ;;  %7494 = vst [vmem:[#allocation144_spill] sm:$0xff] %v5692_v50 }
  0xfd   :  { %v1216_v12 = vld [vmem:[#allocation13 + $0x230] sm:$0xff]  ;;  %v5700_v56 = vcombine.high %v1213_v46, %v1217_v0 }
  0xfe   :  { %v5698_v55 = vcombine.high %v1212_v49, %v1216_v12 }
  0xff   :  { %2038 = vmatpush2.bf16.msra.mxu0 %v5668_v3  ;;  %2079 = vmatpush2.bf16.msra.mxu1 %v5670_v4  ;;  %7497 = vst [vmem:[#allocation147_spill] sm:$0xff] %v5700_v56 }
 0x100   :  { %2039 = vmatprep.subr.bf16.mxu0 %v5674_v2  ;;  %2080 = vmatprep.subr.bf16.mxu1 %v5676_v9  ;;  %7496 = vst [vmem:[#allocation146_spill] sm:$0xff] %v5698_v55  ;;  %v5704_v9 = vcombine.low %v1212_v49, %v1216_v12 }
 0x102   :  { %7498 = vst [vmem:[#allocation148_spill] sm:$0xff] %v5704_v9 }
 0x103   :  { %2040 = vmatpush2.bf16.msra.mxu0 %v5680_v21  ;;  %2081 = vmatpush2.bf16.msra.mxu1 %v5682_v24  ;;  %v5706_v21 = vcombine.low %v1213_v46, %v1217_v0 }
 0x104   :  { %2041 = vmatprep.subr.bf16.mxu0 %v5686_v29  ;;  %2082 = vmatprep.subr.bf16.mxu1 %v5688_v33 }
 0x105   :  { %7499 = vst [vmem:[#allocation149_spill] sm:$0xff] %v5706_v21 }
 0x107   :  { %2042 = vmatpush2.bf16.msra.mxu0 %v5692_v50  ;;  %2083 = vmatpush2.bf16.msra.mxu1 %v5694_v30 }
 0x108   :  { %2043 = vmatprep.subr.bf16.mxu0 %v5698_v55  ;;  %2084 = vmatprep.subr.bf16.mxu1 %v5700_v56 }
 0x10b   :  { %2044 = vmatpush2.bf16.msra.mxu0 %v5704_v9  ;;  %2085 = vmatpush2.bf16.msra.mxu1 %v5706_v21 }
 0x10c   :  { %2175 = vmatprep.subr.bf16.mxu0 %v5314_v10  ;;  %2216 = vmatprep.subr.bf16.mxu1 %v5316_v11 }
 0x10e   :  { %2046 = vmatmul.mubr.bf16.vlgmr.msra.gmra.mxu0 %v7441_v1  ;;  %2087 = vmatmul.mubr.bf16.vlgmr.msra.gmra.mxu1 %v7441_v1  ;;  %v180_v1 = vlaneseq }
 0x10f   :  { %2176 = vmatpush1.bf16.msra.mxu0 %v5320_v17  ;;  %2217 = vmatpush1.bf16.msra.mxu1 %v5322_v18 }
 0x110   :  { %2177 = vmatprep.subr.bf16.mxu0 %v5326_v19  ;;  %2218 = vmatprep.subr.bf16.mxu1 %v5328_v20  ;;  %v5736_v13 = vshrl.u32 %v180_v1, 7 }
 0x112   :  { %v7208_v16 = vsub.s32 0, %v5736_v13  ;;  %v7213_v38 = vsub.s32 2, %v5736_v13  ;;  %v7220_v0 = vsub.s32 1, %v5736_v13  ;;  %v7221_v46 = vsub.s32 3, %v5736_v13 }
 0x113   :  { %2178 = vmatpush1.bf16.msra.mxu0 %v5332_v25  ;;  %2219 = vmatpush1.bf16.msra.mxu1 %v5334_v26 }
 0x114   :  { %2179 = vmatprep.subr.bf16.mxu0 %v5338_v27  ;;  %2220 = vmatprep.subr.bf16.mxu1 %v5340_v28  ;;  %v5755_v12 = vrot.slane %v178_v39, %v7208_v16  ;;  %v5759_v49 = vrot.slane %v178_v39, %v7213_v38  ;;  %v5767_v1 = vrot.slane %v178_v39, %v7220_v0 }
 0x115   :  { %v5771_v16 = vrot.slane %v178_v39, %v7221_v46 }
 0x117   :  { %2180 = vmatpush1.bf16.msra.mxu0 %v5346_v34  ;;  %2221 = vmatpush1.bf16.msra.mxu1 %v5348_v35 }
 0x118   :  { %2181 = vmatprep.subr.bf16.mxu0 %v5352_v36  ;;  %2222 = vmatprep.subr.bf16.mxu1 %v5354_v37 }
 0x11b   :  { %2182 = vmatpush1.bf16.msra.mxu0 %v5358_v42  ;;  %2223 = vmatpush1.bf16.msra.mxu1 %v5360_v43 }
 0x11c   :  { %2183 = vmatprep.subr.bf16.mxu0 %v5364_v44  ;;  %2224 = vmatprep.subr.bf16.mxu1 %v5366_v45 }
 0x11f   :  { %2184 = vmatpush1.bf16.msra.mxu0 %v5372_v51  ;;  %2225 = vmatpush1.bf16.msra.mxu1 %v5374_v52 }
 0x120   :  { %2185 = vmatprep.subr.bf16.mxu0 %v5378_v53  ;;  %2226 = vmatprep.subr.bf16.mxu1 %v5380_v54 }
 0x123   :  { %2186 = vmatpush1.bf16.msra.mxu0 %v5384_v59  ;;  %2227 = vmatpush1.bf16.msra.mxu1 %v5386_v60 }
 0x124   :  { %2187 = vmatprep.subr.bf16.mxu0 %v5390_v61  ;;  %2228 = vmatprep.subr.bf16.mxu1 %v5392_v62 }
 0x127   :  { %2188 = vmatpush1.bf16.msra.mxu0 %v5398_v5  ;;  %2229 = vmatpush1.bf16.msra.mxu1 %v5400_v6  ;;  %v7534_v5 = vld [vmem:[#allocation85_spill] sm:$0xff] }
 0x128   :  { %2189 = vmatprep.subr.bf16.mxu0 %v5404_v7  ;;  %2230 = vmatprep.subr.bf16.mxu1 %v5406_v8 }
 0x12b   :  { %2190 = vmatpush1.bf16.msra.mxu0 %v5410_v14  ;;  %2231 = vmatpush1.bf16.msra.mxu1 %v5412_v15 }
 0x12c   :  { %2191 = vmatprep.subr.bf16.mxu0 %v5416_v22  ;;  %2232 = vmatprep.subr.bf16.mxu1 %v5418_v23 }
 0x12e   :  { %v418_v8 = vpop.f32.mrf.mxu0  ;;  %v491_v7 = vpop.f32.mrf.mxu1 }
 0x12f   :  { %v419_v38 = vadd.f32 %v418_v8, %v5755_v12  ;;  %v492_v14 = vadd.f32 %v491_v7, %v5759_v49  ;;  %2192 = vmatpush2.bf16.msra.mxu0 %v5424_v31  ;;  %2233 = vmatpush2.bf16.msra.mxu1 %v5426_v32 }
 0x130   :  { %v420_v22 = vpop.f32.mrf.mxu0  ;;  %v493_v23 = vpop.f32.mrf.mxu1  ;;  %2193 = vmatprep.subr.bf16.mxu0 %v5430_v40  ;;  %2234 = vmatprep.subr.bf16.mxu1 %v5432_v41 }
 0x131   :  { %v421_v0 = vadd.f32 %v420_v22, %v5767_v1  ;;  %v494_v39 = vadd.f32 %v493_v23, %v5771_v16 }
 0x132   :  { %v422_v46 = vpop.f32.mrf.mxu0  ;;  %v495_v15 = vpop.f32.mrf.mxu1 }
 0x133   :  { %v5781_v6 = vpack.c.bf16 %v421_v0, %v419_v38  ;;  %v423_v7 = vadd.f32 %v422_v46, %v5755_v12  ;;  %v5784_v8 = vpack.c.bf16 %v494_v39, %v492_v14  ;;  %v496_v32 = vadd.f32 %v495_v15, %v5759_v49  ;;  %2194 = vmatpush2.bf16.msra.mxu0 %v5436_v47  ;;  %v7502_v47 = vld [vmem:[#allocation65_spill] sm:$0xff] }
 0x134   :  { %v424_v31 = vpop.f32.mrf.mxu0  ;;  %v497_v40 = vpop.f32.mrf.mxu1  ;;  %2235 = vmatpush2.bf16.msra.mxu1 %v5438_v48  ;;  %2195 = vmatprep.subr.bf16.mxu0 %v5442_v57 }
 0x135   :  { %v425_v22 = vadd.f32 %v424_v31, %v5767_v1  ;;  %v498_v23 = vadd.f32 %v497_v40, %v5771_v16  ;;  %2236 = vmatprep.subr.bf16.mxu1 %v5444_v58  ;;  %v7503_v31 = vld [vmem:[#allocation66_spill] sm:$0xff] }
 0x136   :  { %v428_v38 = vpop.f32.mrf.mxu0  ;;  %v501_v0 = vpop.f32.mrf.mxu1 }
 0x137   :  { %v5793_v14 = vpack.c.bf16 %v425_v22, %v423_v7  ;;  %v429_v15 = vadd.f32 %v428_v38, %v5755_v12  ;;  %v5796_v46 = vpack.c.bf16 %v498_v23, %v496_v32  ;;  %v502_v39 = vadd.f32 %v501_v0, %v5759_v49  ;;  %2196 = vmatpush2.bf16.msra.mxu0 %v5448_v63  ;;  %v7504_v7 = vld [vmem:[#allocation67_spill] sm:$0xff]  ;;  %v7508_v63 = vld [vmem:[#allocation69_spill] sm:$0xff] }
 0x138   :  { %v430_v48 = vpop.f32.mrf.mxu0  ;;  %v503_v57 = vpop.f32.mrf.mxu1  ;;  %2237 = vmatpush2.bf16.msra.mxu1 %v7502_v47  ;;  %2197 = vmatprep.subr.bf16.mxu0 %v7503_v31 }
 0x139   :  { %7500 = vst [vmem:[#allocation150_spill] sm:$0xff] %v5793_v14  ;;  %7501 = vst [vmem:[#allocation151_spill] sm:$0xff] %v5796_v46  ;;  %v431_v40 = vadd.f32 %v430_v48, %v5767_v1  ;;  %v504_v58 = vadd.f32 %v503_v57, %v5771_v16  ;;  %2238 = vmatprep.subr.bf16.mxu1 %v7504_v7  ;;  %v7507_v14 = vld [vmem:[#allocation68_spill] sm:$0xff]  ;;  %v7509_v48 = vld [vmem:[#allocation70_spill] sm:$0xff] }
 0x13a   :  { %v432_v22 = vpop.f32.mrf.mxu0  ;;  %v505_v38 = vpop.f32.mrf.mxu1 }
 0x13b   :  { %v5805_v32 = vpack.c.bf16 %v431_v40, %v429_v15  ;;  %v433_v23 = vadd.f32 %v432_v22, %v5755_v12  ;;  %v5808_v0 = vpack.c.bf16 %v504_v58, %v502_v39  ;;  %v506_v46 = vadd.f32 %v505_v38, %v5759_v49  ;;  %2198 = vmatpush2.bf16.msra.mxu0 %v7507_v14  ;;  %v7510_v15 = vld [vmem:[#allocation71_spill] sm:$0xff]  ;;  %v7514_v14 = vld [vmem:[#allocation73_spill] sm:$0xff] }
 0x13c   :  { %v434_v47 = vpop.f32.mrf.mxu0  ;;  %v507_v31 = vpop.f32.mrf.mxu1  ;;  %2239 = vmatpush2.bf16.msra.mxu1 %v7508_v63  ;;  %2199 = vmatprep.subr.bf16.mxu0 %v7509_v48 }
 0x13d   :  { %7505 = vst [vmem:[#allocation152_spill] sm:$0xff] %v5805_v32  ;;  %7506 = vst [vmem:[#allocation153_spill] sm:$0xff] %v5808_v0  ;;  %v435_v57 = vadd.f32 %v434_v47, %v5767_v1  ;;  %v508_v7 = vadd.f32 %v507_v31, %v5771_v16  ;;  %2240 = vmatprep.subr.bf16.mxu1 %v7510_v15  ;;  %v7513_v32 = vld [vmem:[#allocation72_spill] sm:$0xff]  ;;  %v7515_v47 = vld [vmem:[#allocation74_spill] sm:$0xff] }
 0x13e   :  { %v438_v40 = vpop.f32.mrf.mxu0  ;;  %v511_v22 = vpop.f32.mrf.mxu1 }
 0x13f   :  { %v5817_v58 = vpack.c.bf16 %v435_v57, %v433_v23  ;;  %v439_v39 = vadd.f32 %v438_v40, %v5755_v12  ;;  %v5820_v38 = vpack.c.bf16 %v508_v7, %v506_v46  ;;  %v512_v0 = vadd.f32 %v511_v22, %v5759_v49  ;;  %2200 = vmatpush2.bf16.msra.mxu0 %v7513_v32  ;;  %v7516_v23 = vld [vmem:[#allocation75_spill] sm:$0xff]  ;;  %v7520_v32 = vld [vmem:[#allocation77_spill] sm:$0xff] }
 0x140   :  { %v440_v63 = vpop.f32.mrf.mxu0  ;;  %v513_v48 = vpop.f32.mrf.mxu1  ;;  %2241 = vmatpush2.bf16.msra.mxu1 %v7514_v14  ;;  %2201 = vmatprep.subr.bf16.mxu0 %v7515_v47 }
 0x141   :  { %7511 = vst [vmem:[#allocation154_spill] sm:$0xff] %v5817_v58  ;;  %7512 = vst [vmem:[#allocation155_spill] sm:$0xff] %v5820_v38  ;;  %v441_v31 = vadd.f32 %v440_v63, %v5767_v1  ;;  %v514_v15 = vadd.f32 %v513_v48, %v5771_v16  ;;  %2242 = vmatprep.subr.bf16.mxu1 %v7516_v23  ;;  %v7519_v58 = vld [vmem:[#allocation76_spill] sm:$0xff]  ;;  %v7521_v63 = vld [vmem:[#allocation78_spill] sm:$0xff] }
 0x142   :  { %v442_v57 = vpop.f32.mrf.mxu0  ;;  %v515_v40 = vpop.f32.mrf.mxu1 }
 0x143   :  { %v5829_v46 = vpack.c.bf16 %v441_v31, %v439_v39  ;;  %v443_v7 = vadd.f32 %v442_v57, %v5755_v12  ;;  %v5832_v22 = vpack.c.bf16 %v514_v15, %v512_v0  ;;  %v516_v38 = vadd.f32 %v515_v40, %v5759_v49  ;;  %2202 = vmatpush2.bf16.msra.mxu0 %v7519_v58  ;;  %v7522_v39 = vld [vmem:[#allocation79_spill] sm:$0xff]  ;;  %v682_v40 = vld [vmem:[%s7055_s5] sm:$0xf] }
 0x144   :  { %v444_v14 = vpop.f32.mrf.mxu0  ;;  %v517_v47 = vpop.f32.mrf.mxu1  ;;  %2243 = vmatpush2.bf16.msra.mxu1 %v7520_v32  ;;  %2203 = vmatprep.subr.bf16.mxu0 %v7521_v63  ;;  %v7525_v63 = vld [vmem:[#allocation80_spill] sm:$0xff]  ;;  %v7526_v32 = vld [vmem:[#allocation81_spill] sm:$0xff] }
 0x145   :  { %7517 = vst [vmem:[#allocation156_spill] sm:$0xff] %v5829_v46  ;;  %7518 = vst [vmem:[#allocation157_spill] sm:$0xff] %v5832_v22  ;;  %v445_v48 = vadd.f32 %v444_v14, %v5767_v1  ;;  %v518_v23 = vadd.f32 %v517_v47, %v5771_v16  ;;  %2244 = vmatprep.subr.bf16.mxu1 %v7522_v39  ;;  %v7527_v39 = vld [vmem:[#allocation82_spill] sm:$0xff] }
 0x146   :  { %v448_v31 = vpop.f32.mrf.mxu0  ;;  %v521_v57 = vpop.f32.mrf.mxu1 }
 0x147   :  { %v5841_v0 = vpack.c.bf16 %v445_v48, %v443_v7  ;;  %v449_v15 = vadd.f32 %v448_v31, %v5755_v12  ;;  %v5847_v22 = vpack.c.bf16 %v518_v23, %v516_v38  ;;  %v522_v46 = vadd.f32 %v521_v57, %v5759_v49  ;;  %2204 = vmatpush2.bf16.msra.mxu0 %v7525_v63  ;;  %v7528_v31 = vld [vmem:[#allocation83_spill] sm:$0xff] }
 0x148   :  { %v450_v14 = vpop.f32.mrf.mxu0  ;;  %v523_v47 = vpop.f32.mrf.mxu1  ;;  %2245 = vmatpush2.bf16.msra.mxu1 %v7526_v32  ;;  %2205 = vmatprep.subr.bf16.mxu0 %v7527_v39  ;;  %v7529_v38 = vsub.s32 0, %v5736_v13 }
 0x149   :  { %7523 = vst [vmem:[#allocation158_spill] sm:$0xff] %v5841_v0  ;;  %7524 = vst [vmem:[#allocation159_spill] sm:$0xff] %v5847_v22  ;;  %v451_v7 = vadd.f32 %v450_v14, %v5767_v1  ;;  %v524_v48 = vadd.f32 %v523_v47, %v5771_v16  ;;  %2246 = vmatprep.subr.bf16.mxu1 %v7528_v31  ;;  %v7530_v22 = vsub.s32 2, %v5736_v13  ;;  %v7533_v47 = vld [vmem:[#allocation84_spill] sm:$0xff] }
 0x14a   :  { %v452_v0 = vpop.f32.mrf.mxu0  ;;  %v5858_v23 = vrot.slane %v682_v40, %v7529_v38  ;;  %v525_v57 = vpop.f32.mrf.mxu1  ;;  %v7535_v38 = vld [vmem:[#allocation86_spill] sm:$0xff] }
 0x14b   :  { %v5862_v63 = vrot.slane %v682_v40, %v7530_v22  ;;  %v5864_v58 = vpack.c.bf16 %v451_v7, %v449_v15  ;;  %v453_v39 = vadd.f32 %v452_v0, %v5755_v12  ;;  %v5867_v32 = vpack.c.bf16 %v524_v48, %v522_v46  ;;  %2206 = vmatpush2.bf16.msra.mxu0 %v7533_v47 }
 0x14c   :  { %v526_v14 = vadd.f32 %v525_v57, %v5759_v49  ;;  %v454_v31 = vpop.f32.mrf.mxu0  ;;  %v527_v41 = vpop.f32.mrf.mxu1  ;;  %2247 = vmatpush2.bf16.msra.mxu1 %v7534_v5  ;;  %2257 = vmatprep.subr.bf16.mxu0 %v7535_v38  ;;  %v7536_v22 = vsub.s32 1, %v5736_v13  ;;  %v7537_v46 = vsub.s32 3, %v5736_v13  ;;  %v7538_v49 = vld [vmem:[#allocation87_spill] sm:$0xff] }
 0x14d   :  { %7531 = vst [vmem:[#allocation160_spill] sm:$0xff] %v5864_v58  ;;  %7532 = vst [vmem:[#allocation161_spill] sm:$0xff] %v5867_v32  ;;  %v455_v62 = vadd.f32 %v454_v31, %v5767_v1  ;;  %v528_v12 = vadd.f32 %v527_v41, %v5771_v16  ;;  %2298 = vmatprep.subr.bf16.mxu1 %v7538_v49 }
 0x14e   :  { %v5876_v15 = vrot.slane %v682_v40, %v7536_v22  ;;  %v5881_v0 = vrot.slane %v682_v40, %v7537_v46  ;;  %v922_v7 = vpop.f32.mrf.mxu0  ;;  %v995_v48 = vpop.f32.mrf.mxu1 }
 0x14f   :  { %v5884_v57 = vpack.c.bf16 %v455_v62, %v453_v39  ;;  %v923_v32 = vadd.f32 %v922_v7, %v5858_v23  ;;  %v5887_v58 = vpack.c.bf16 %v528_v12, %v526_v14  ;;  %v996_v1 = vadd.f32 %v995_v48, %v5862_v63 }
 0x150   :  { %v924_v31 = vpop.f32.mrf.mxu0  ;;  %v997_v22 = vpop.f32.mrf.mxu1 }
 0x151   :  { %7539 = vst [vmem:[#allocation162_spill] sm:$0xff] %v5884_v57  ;;  %7540 = vst [vmem:[#allocation163_spill] sm:$0xff] %v5887_v58  ;;  %v925_v41 = vadd.f32 %v924_v31, %v5876_v15  ;;  %v998_v13 = vadd.f32 %v997_v22, %v5881_v0 }
 0x152   :  { %v926_v16 = vpop.f32.mrf.mxu0  ;;  %v999_v40 = vpop.f32.mrf.mxu1 }
 0x153   :  { %v5892_v46 = vpack.c.bf16 %v925_v41, %v923_v32  ;;  %v927_v49 = vadd.f32 %v926_v16, %v5858_v23  ;;  %v5895_v62 = vpack.c.bf16 %v998_v13, %v996_v1  ;;  %v1000_v39 = vadd.f32 %v999_v40, %v5862_v63 }
 0x154   :  { %v928_v14 = vpop.f32.mrf.mxu0  ;;  %v1001_v12 = vpop.f32.mrf.mxu1 }
 0x155   :  { %7541 = vst [vmem:[#allocation164_spill] sm:$0xff] %v5892_v46  ;;  %7542 = vst [vmem:[#allocation165_spill] sm:$0xff] %v5895_v62  ;;  %v929_v7 = vadd.f32 %v928_v14, %v5876_v15  ;;  %v1002_v48 = vadd.f32 %v1001_v12, %v5881_v0 }
 0x156   :  { %v932_v58 = vpop.f32.mrf.mxu0  ;;  %v1005_v31 = vpop.f32.mrf.mxu1 }
 0x157   :  { %v5900_v57 = vpack.c.bf16 %v929_v7, %v927_v49  ;;  %v5902_v22 = vpack.c.bf16 %v1002_v48, %v1000_v39  ;;  %v933_v32 = vadd.f32 %v932_v58, %v5858_v23  ;;  %v1006_v41 = vadd.f32 %v1005_v31, %v5862_v63 }
 0x158   :  { %v934_v1 = vpop.f32.mrf.mxu0  ;;  %v1007_v13 = vpop.f32.mrf.mxu1 }
 0x159   :  { %7543 = vst [vmem:[#allocation166_spill] sm:$0xff] %v5900_v57  ;;  %7544 = vst [vmem:[#allocation167_spill] sm:$0xff] %v5902_v22  ;;  %v935_v16 = vadd.f32 %v934_v1, %v5876_v15  ;;  %v1008_v40 = vadd.f32 %v1007_v13, %v5881_v0 }
 0x15a   :  { %v936_v62 = vpop.f32.mrf.mxu0  ;;  %v1009_v14 = vpop.f32.mrf.mxu1 }
 0x15b   :  { %v5908_v46 = vpack.c.bf16 %v935_v16, %v933_v32  ;;  %v937_v12 = vadd.f32 %v936_v62, %v5858_v23  ;;  %v5911_v49 = vpack.c.bf16 %v1008_v40, %v1006_v41  ;;  %v1010_v39 = vadd.f32 %v1009_v14, %v5862_v63 }
 0x15c   :  { %v938_v7 = vpop.f32.mrf.mxu0  ;;  %v1011_v58 = vpop.f32.mrf.mxu1 }
 0x15d   :  { %7545 = vst [vmem:[#allocation168_spill] sm:$0xff] %v5908_v46  ;;  %7546 = vst [vmem:[#allocation169_spill] sm:$0xff] %v5911_v49  ;;  %v939_v48 = vadd.f32 %v938_v7, %v5876_v15  ;;  %v1012_v31 = vadd.f32 %v1011_v58, %v5881_v0 }
 0x15e   :  { %v942_v22 = vpop.f32.mrf.mxu0  ;;  %v1015_v1 = vpop.f32.mrf.mxu1 }
 0x15f   :  { %v5916_v57 = vpack.c.bf16 %v939_v48, %v937_v12  ;;  %v943_v13 = vadd.f32 %v942_v22, %v5858_v23  ;;  %v5919_v32 = vpack.c.bf16 %v1012_v31, %v1010_v39  ;;  %v1016_v62 = vadd.f32 %v1015_v1, %v5862_v63 }
 0x160   :  { %v944_v41 = vpop.f32.mrf.mxu0  ;;  %v1017_v16 = vpop.f32.mrf.mxu1 }
 0x161   :  { %7547 = vst [vmem:[#allocation170_spill] sm:$0xff] %v5916_v57  ;;  %7548 = vst [vmem:[#allocation171_spill] sm:$0xff] %v5919_v32  ;;  %v945_v40 = vadd.f32 %v944_v41, %v5876_v15  ;;  %v1018_v14 = vadd.f32 %v1017_v16, %v5881_v0 }
 0x162   :  { %v946_v49 = vpop.f32.mrf.mxu0  ;;  %v1019_v7 = vpop.f32.mrf.mxu1 }
 0x163   :  { %v5924_v46 = vpack.c.bf16 %v945_v40, %v943_v13  ;;  %v947_v58 = vadd.f32 %v946_v49, %v5858_v23  ;;  %v5927_v12 = vpack.c.bf16 %v1018_v14, %v1016_v62  ;;  %v1020_v22 = vadd.f32 %v1019_v7, %v5862_v63 }
 0x164   :  { %v948_v39 = vpop.f32.mrf.mxu0  ;;  %v1021_v48 = vpop.f32.mrf.mxu1 }
 0x165   :  { %7549 = vst [vmem:[#allocation172_spill] sm:$0xff] %v5924_v46  ;;  %7550 = vst [vmem:[#allocation173_spill] sm:$0xff] %v5927_v12  ;;  %v949_v31 = vadd.f32 %v948_v39, %v5876_v15  ;;  %v1022_v1 = vadd.f32 %v1021_v48, %v5881_v0 }
 0x166   :  { %v952_v32 = vpop.f32.mrf.mxu0  ;;  %v1025_v41 = vpop.f32.mrf.mxu1 }
 0x167   :  { %v5932_v57 = vpack.c.bf16 %v949_v31, %v947_v58  ;;  %v953_v16 = vadd.f32 %v952_v32, %v5858_v23  ;;  %v5935_v13 = vpack.c.bf16 %v1022_v1, %v1020_v22  ;;  %v1026_v49 = vadd.f32 %v1025_v41, %v5862_v63 }
 0x168   :  { %v954_v62 = vpop.f32.mrf.mxu0  ;;  %v1027_v40 = vpop.f32.mrf.mxu1  ;;  %v2100_v41 = vunpack.c.l.bf16 %v5781_v6 }
 0x169   :  { %7551 = vst [vmem:[#allocation174_spill] sm:$0xff] %v5932_v57  ;;  %7552 = vst [vmem:[#allocation175_spill] sm:$0xff] %v5935_v13  ;;  %v955_v14 = vadd.f32 %v954_v62, %v5876_v15  ;;  %v1028_v7 = vadd.f32 %v1027_v40, %v5881_v0  ;;  %v2102_v13 = vunpack.c.l.bf16 %v5784_v8 }
 0x16a   :  { %v1029_v12 = vpop.f32.mrf.mxu1  ;;  %v956_v1 = vpop.f32.mrf.mxu0 }
 0x16b   :  { %v5940_v39 = vpack.c.bf16 %v955_v14, %v953_v16  ;;  %v5942_v48 = vpack.c.bf16 %v1028_v7, %v1026_v49  ;;  %v1030_v58 = vadd.f32 %v1029_v12, %v5862_v63  ;;  %v2101_v16 = vunpack.c.h.bf16 %v5781_v6 }
 0x16c   :  { %v1031_v31 = vpop.f32.mrf.mxu1  ;;  %v958_v46 = vpop.f32.mrf.mxu0  ;;  %v2103_v49 = vunpack.c.h.bf16 %v5784_v8 }
 0x16d   :  { %7553 = vst [vmem:[#allocation176_spill] sm:$0xff] %v5940_v39  ;;  %7554 = vst [vmem:[#allocation177_spill] sm:$0xff] %v5942_v48  ;;  %v1032_v32 = vadd.f32 %v1031_v31, %v5881_v0 }
 0x16f   :  { %v4612_v22 = vpack.c.bf16 %v1032_v32, %v1030_v58 }
 0x18e   :  { %v1965_v62 = vpop.f32.mrf.mxu0  ;;  %v2006_v57 = vpop.f32.mrf.mxu1 }
 0x18f   :  { %v2104_v40 = vadd.f32 %v2100_v41, %v1965_v62  ;;  %v2106_v38 = vadd.f32 %v2102_v13, %v2006_v57 }
 0x190   :  { %v1967_v14 = vpop.f32.mrf.mxu0  ;;  %v2008_v63 = vpop.f32.mrf.mxu1 }
 0x191   :  { %v4500_v12 = vmul.f32 -1.442695, %v2104_v40  ;;  %v2105_v7 = vadd.f32 %v2101_v16, %v1967_v14  ;;  %v2107_v0 = vadd.f32 %v2103_v49, %v2008_v63  ;;  %v957_v49 = vadd.f32 %v956_v1, %v5858_v23 }
 0x192   :  { %v1969_v58 = vpop.f32.mrf.mxu0  ;;  %v2010_v31 = vpop.f32.mrf.mxu1  ;;  %v2115_v23 = vunpack.c.l.bf16 %v4612_v22 }
 0x193   :  { %4808 = vpow2.f32 %v4500_v12  ;;  %v4501_v32 = vmul.f32 -1.442695, %v2105_v7 }
 0x194   :  { %v1970_v48 = vpop.f32.mrf.mxu0  ;;  %v2011_v39 = vpop.f32.mrf.mxu1 }
 0x195   :  { %4810 = vpow2.f32 %v4501_v32  ;;  %v959_v48 = vadd.f32 %v958_v46, %v5876_v15  ;;  %v4502_v15 = vmul.f32 -1.442695, %v2106_v38  ;;  %v2116_v46 = vunpack.c.h.bf16 %v4612_v22 }
 0x196   :  { %4812 = vtanh.f32 %v2107_v0 }
 0x197   :  { %v4611_v39 = vpack.c.bf16 %v959_v48, %v957_v49 }
 0x199   :  { %v2113_v14 = vunpack.c.l.bf16 %v4611_v39  ;;  %v2114_v7 = vunpack.c.h.bf16 %v4611_v39 }
 0x1a0   :  { %v4809_v5 = vpop.eup %4808 }
 0x1a1   :  { %v2130_v47 = vadd.f32 1.0, %v4809_v5 }
 0x1a2   :  { %v4811_v41 = vpop.eup %4810 }
 0x1a3   :  { %4814 = vrcp.f32 %v2130_v47  ;;  %v2131_v6 = vadd.f32 1.0, %v4811_v41  ;;  %v4813_v8 = vpop.eup %4812 }
 0x1a5   :  { %4816 = vrcp.f32 %v2131_v6 }
 0x1b0   :  { %v4815_v57 = vpop.eup %4814 }
 0x1b1   :  { %v2141_v13 = vmul.f32 %v4815_v57, %v4813_v8 }
 0x1b2   :  { %v4817_v62 = vpop.eup %4816 }
 0x1b3   :  { %v2140_v40 = vmul.f32 0.0, %v4817_v62 }
 0x1b5   :  { %v5950_v16 = vadd.f32 %v2141_v13, %v2140_v40 }
 0x1ce   :  { %v2047_v63 = vpop.f32.mrf.mxu0  ;;  %v2088_v5 = vpop.f32.mrf.mxu1 }
 0x1cf   :  { %v2117_v12 = vadd.f32 %v2113_v14, %v2047_v63  ;;  %v2119_v1 = vadd.f32 %v2115_v23, %v2088_v5 }
 0x1d0   :  { %v2049_v47 = vpop.f32.mrf.mxu0  ;;  %v2090_v0 = vpop.f32.mrf.mxu1 }
 0x1d1   :  { %v4503_v58 = vmul.f32 -1.442695, %v2117_v12  ;;  %v2118_v31 = vadd.f32 %v2114_v7, %v2049_v47  ;;  %v4505_v13 = vmul.f32 -1.442695, %v2119_v1  ;;  %v2120_v62 = vadd.f32 %v2116_v46, %v2090_v0  ;;  %v7558_v46 = vld [vmem:[#allocation89_spill] sm:$0xff] }
 0x1d2   :  { %v2051_v32 = vpop.f32.mrf.mxu0  ;;  %v2092_v41 = vpop.f32.mrf.mxu1 }
 0x1d3   :  { %4818 = vpow2.f32 %v4503_v58  ;;  %v4504_v6 = vmul.f32 -1.442695, %v2118_v31 }
 0x1d4   :  { %v2052_v8 = vpop.f32.mrf.mxu0  ;;  %v2093_v57 = vpop.f32.mrf.mxu1 }
 0x1d5   :  { %4820 = vpow2.f32 %v4504_v6 }
 0x1d6   :  { %4822 = vpow2.f32 %v4502_v15  ;;  %v7557_v15 = vld [vmem:[#allocation88_spill] sm:$0xff] }
 0x1d7   :  { %4824 = vpow2.f32 %v4505_v13  ;;  %v7559_v13 = vld [vmem:[#allocation90_spill] sm:$0xff] }
 0x1d8   :  { %4826 = vtanh.f32 %v2120_v62  ;;  %v7560_v62 = vld [vmem:[#allocation91_spill] sm:$0xff] }
 0x1e0   :  { %v4819_v40 = vpop.eup %4818 }
 0x1e1   :  { %v2154_v49 = vadd.f32 1.0, %v4819_v40  ;;  %v7561_v40 = vld [vmem:[#allocation92_spill] sm:$0xff] }
 0x1e2   :  { %v4821_v48 = vpop.eup %4820 }
 0x1e3   :  { %4828 = vrcp.f32 %v2154_v49  ;;  %v2155_v39 = vadd.f32 1.0, %v4821_v48  ;;  %v4823_v14 = vpop.eup %4822  ;;  %v7562_v49 = vld [vmem:[#allocation93_spill] sm:$0xff]  ;;  %v7563_v48 = vld [vmem:[#allocation94_spill] sm:$0xff] }
 0x1e4   :  { %v4825_v63 = vpop.eup %4824  ;;  %v2132_v47 = vadd.f32 1.0, %v4823_v14  ;;  %v7565_v14 = vld [vmem:[#allocation96_spill] sm:$0xff] }
 0x1e5   :  { %4830 = vrcp.f32 %v2155_v39  ;;  %v4827_v12 = vpop.eup %4826  ;;  %v2156_v38 = vadd.f32 1.0, %v4825_v63  ;;  %v7564_v39 = vld [vmem:[#allocation95_spill] sm:$0xff]  ;;  %v7566_v63 = vld [vmem:[#allocation97_spill] sm:$0xff] }
 0x1e6   :  { %4832 = vtanh.f32 %v5950_v16 }
 0x1e7   :  { %4834 = vrcp.f32 %v2132_v47  ;;  %v7569_v47 = vld [vmem:[#allocation100_spill] sm:$0xff] }
 0x1e8   :  { %4836 = vrcp.f32 %v2156_v38  ;;  %v7572_v38 = vld [vmem:[#allocation103_spill] sm:$0xff] }
 0x1f0   :  { %v4829_v7 = vpop.eup %4828 }
 0x1f1   :  { %v2165_v58 = vmul.f32 %v4829_v7, %v4827_v12  ;;  %v7567_v12 = vld [vmem:[#allocation98_spill] sm:$0xff]  ;;  %v7568_v7 = vld [vmem:[#allocation99_spill] sm:$0xff] }
 0x1f2   :  { %v4831_v5 = vpop.eup %4830 }
 0x1f3   :  { %v2164_v22 = vmul.f32 0.0, %v4831_v5  ;;  %v4833_v31 = vpop.eup %4832  ;;  %v7571_v5 = vld [vmem:[#allocation102_spill] sm:$0xff] }
 0x1f4   :  { %v4835_v32 = vpop.eup %4834 }
 0x1f5   :  { %v5955_v0 = vadd.f32 %v2165_v58, %v2164_v22  ;;  %v4837_v41 = vpop.eup %4836  ;;  %v5958_v8 = vmul.f32 %v4835_v32, %v4833_v31  ;;  %v7570_v58 = vld [vmem:[#allocation101_spill] sm:$0xff]  ;;  %v7573_v22 = vld [vmem:[#allocation104_spill] sm:$0xff]  ;;  %v7575_v32 = vld [vmem:[#allocation106_spill] sm:$0xff] }
 0x1f6   :  { %v7574_v31 = vld [vmem:[#allocation105_spill] sm:$0xff] }
 0x1f7   :  { %4838 = vtanh.f32 %v5955_v0  ;;  %7555 = vst [vmem:[#allocation178_spill] sm:$0xff] %v5958_v8  ;;  %v5966_v1 = vpack.c.bf16 %v5958_v8, %v5958_v8  ;;  %v7580_v8 = vld [vmem:[#allocation111_spill] sm:$0xff] }
 0x204   :  { %v4839_v6 = vpop.eup %4838 }
 0x205   :  { %v5960_v57 = vmul.f32 %v4839_v6, %v4837_v41  ;;  %v7576_v41 = vld [vmem:[#allocation107_spill] sm:$0xff]  ;;  %v7577_v6 = vld [vmem:[#allocation108_spill] sm:$0xff] }
 0x207   :  { %7556 = vst [vmem:[#allocation179_spill] sm:$0xff] %v5960_v57  ;;  %v2174_v23 = vpack.c.bf16 %v5960_v57, %v5960_v57  ;;  %v7579_v57 = vld [vmem:[#allocation110_spill] sm:$0xff] }
 0x209   :  { %2207 = vmatprep.mubr.bf16.mxu0 %v2174_v23  ;;  %2248 = vmatprep.mubr.bf16.mxu1 %v2174_v23 }
 0x20a   :  { %2208 = vmatmul.mubr.bf16.vlgmr.msra.gmra.mxu0 %v5966_v1  ;;  %2249 = vmatmul.mubr.bf16.vlgmr.msra.gmra.mxu1 %v5966_v1 }
 0x20b   :  { %2258 = vmatpush1.bf16.msra.mxu0 %v7557_v15  ;;  %2299 = vmatpush1.bf16.msra.mxu1 %v7558_v46 }
 0x20c   :  { %2289 = vmatprep.mubr.bf16.mxu0 %v2174_v23  ;;  %2330 = vmatprep.mubr.bf16.mxu1 %v2174_v23  ;;  %v7578_v23 = vld [vmem:[#allocation109_spill] sm:$0xff] }
 0x20d   :  { %2259 = vmatprep.subr.bf16.mxu0 %v7559_v13  ;;  %2300 = vmatprep.subr.bf16.mxu1 %v7560_v62 }
 0x20f   :  { %2260 = vmatpush1.bf16.msra.mxu0 %v7561_v40  ;;  %2301 = vmatpush1.bf16.msra.mxu1 %v7562_v49 }
 0x210   :  { %2261 = vmatprep.subr.bf16.mxu0 %v7563_v48  ;;  %2302 = vmatprep.subr.bf16.mxu1 %v7564_v39 }
 0x213   :  { %2262 = vmatpush1.bf16.msra.mxu0 %v7565_v14  ;;  %2303 = vmatpush1.bf16.msra.mxu1 %v7566_v63 }
 0x214   :  { %2263 = vmatprep.subr.bf16.mxu0 %v7567_v12  ;;  %2304 = vmatprep.subr.bf16.mxu1 %v7568_v7 }
 0x217   :  { %2264 = vmatpush1.bf16.msra.mxu0 %v7569_v47  ;;  %2305 = vmatpush1.bf16.msra.mxu1 %v7570_v58  ;;  %v7581_v58 = vld [vmem:[#allocation112_spill] sm:$0xff] }
 0x218   :  { %2265 = vmatprep.subr.bf16.mxu0 %v7571_v5  ;;  %2306 = vmatprep.subr.bf16.mxu1 %v7572_v38  ;;  %v7582_v5 = vld [vmem:[#allocation113_spill] sm:$0xff]  ;;  %v7583_v38 = vld [vmem:[#allocation114_spill] sm:$0xff] }
 0x21b   :  { %2266 = vmatpush1.bf16.msra.mxu0 %v7573_v22  ;;  %2307 = vmatpush1.bf16.msra.mxu1 %v7574_v31  ;;  %v7584_v22 = vld [vmem:[#allocation115_spill] sm:$0xff]  ;;  %v7585_v31 = vld [vmem:[#allocation116_spill] sm:$0xff] }
 0x21c   :  { %2267 = vmatprep.subr.bf16.mxu0 %v7575_v32  ;;  %2308 = vmatprep.subr.bf16.mxu1 %v7576_v41  ;;  %v7586_v32 = vld [vmem:[#allocation117_spill] sm:$0xff]  ;;  %v7587_v41 = vld [vmem:[#allocation118_spill] sm:$0xff] }
 0x21f   :  { %2268 = vmatpush1.bf16.msra.mxu0 %v7577_v6  ;;  %2309 = vmatpush1.bf16.msra.mxu1 %v7578_v23  ;;  %v7588_v6 = vld [vmem:[#allocation119_spill] sm:$0xff]  ;;  %v7589_v23 = vld [vmem:[#allocation120_spill] sm:$0xff] }
 0x220   :  { %2269 = vmatprep.subr.bf16.mxu0 %v7579_v57  ;;  %2310 = vmatprep.subr.bf16.mxu1 %v7580_v8  ;;  %v7590_v57 = vld [vmem:[#allocation121_spill] sm:$0xff]  ;;  %v7591_v8 = vld [vmem:[#allocation122_spill] sm:$0xff] }
 0x223   :  { %2270 = vmatpush1.bf16.msra.mxu0 %v7581_v58  ;;  %2311 = vmatpush1.bf16.msra.mxu1 %v7582_v5  ;;  %v7592_v58 = vld [vmem:[#allocation123_spill] sm:$0xff]  ;;  %v7593_v5 = vld [vmem:[#allocation124_spill] sm:$0xff] }
 0x224   :  { %2271 = vmatprep.subr.bf16.mxu0 %v7583_v38  ;;  %2312 = vmatprep.subr.bf16.mxu1 %v7584_v22  ;;  %v7594_v38 = vld [vmem:[#allocation125_spill] sm:$0xff]  ;;  %v7595_v22 = vld [vmem:[#allocation126_spill] sm:$0xff] }
 0x227   :  { %2272 = vmatpush1.bf16.msra.mxu0 %v7585_v31  ;;  %2313 = vmatpush1.bf16.msra.mxu1 %v7586_v32  ;;  %v7596_v31 = vld [vmem:[#allocation127_spill] sm:$0xff]  ;;  %v7597_v32 = vld [vmem:[#allocation128_spill] sm:$0xff] }
 0x228   :  { %2273 = vmatprep.subr.bf16.mxu0 %v7587_v41  ;;  %2314 = vmatprep.subr.bf16.mxu1 %v7588_v6  ;;  %v7598_v41 = vld [vmem:[#allocation129_spill] sm:$0xff]  ;;  %v7599_v6 = vld [vmem:[#allocation130_spill] sm:$0xff] }
 0x22b   :  { %2274 = vmatpush2.bf16.msra.mxu0 %v7589_v23  ;;  %2315 = vmatpush2.bf16.msra.mxu1 %v7590_v57  ;;  %v7600_v23 = vld [vmem:[#allocation131_spill] sm:$0xff]  ;;  %v7601_v57 = vld [vmem:[#allocation132_spill] sm:$0xff] }
 0x22c   :  { %2275 = vmatprep.subr.bf16.mxu0 %v7591_v8  ;;  %2316 = vmatprep.subr.bf16.mxu1 %v7592_v58  ;;  %v7602_v8 = vld [vmem:[#allocation133_spill] sm:$0xff]  ;;  %v7603_v58 = vld [vmem:[#allocation134_spill] sm:$0xff] }
 0x22f   :  { %2276 = vmatpush2.bf16.msra.mxu0 %v7593_v5  ;;  %2317 = vmatpush2.bf16.msra.mxu1 %v7594_v38  ;;  %v7604_v5 = vld [vmem:[#allocation135_spill] sm:$0xff] }
 0x230   :  { %2277 = vmatprep.subr.bf16.mxu0 %v7595_v22  ;;  %2318 = vmatprep.subr.bf16.mxu1 %v7596_v31 }
 0x233   :  { %2278 = vmatpush2.bf16.msra.mxu0 %v7597_v32  ;;  %2319 = vmatpush2.bf16.msra.mxu1 %v7598_v41  ;;  %v7605_v32 = vld [vmem:[#allocation139_spill] sm:$0xff]  ;;  %v7606_v41 = vld [vmem:[#allocation140_spill] sm:$0xff] }
 0x234   :  { %2279 = vmatprep.subr.bf16.mxu0 %v7599_v6  ;;  %2320 = vmatprep.subr.bf16.mxu1 %v7600_v23 }
 0x237   :  { %2280 = vmatpush2.bf16.msra.mxu0 %v7601_v57  ;;  %2321 = vmatpush2.bf16.msra.mxu1 %v7602_v8 }
 0x238   :  { %2281 = vmatprep.subr.bf16.mxu0 %v7603_v58  ;;  %2322 = vmatprep.subr.bf16.mxu1 %v7604_v5 }
 0x23b   :  { %2282 = vmatpush2.bf16.msra.mxu0 %v5668_v3  ;;  %2323 = vmatpush2.bf16.msra.mxu1 %v5670_v4 }
 0x23c   :  { %2283 = vmatprep.subr.bf16.mxu0 %v5674_v2  ;;  %2324 = vmatprep.subr.bf16.mxu1 %v7605_v32 }
 0x23f   :  { %2284 = vmatpush2.bf16.msra.mxu0 %v7606_v41  ;;  %2325 = vmatpush2.bf16.msra.mxu1 %v5682_v24 }
 0x240   :  { %2285 = vmatprep.subr.bf16.mxu0 %v5686_v29  ;;  %2326 = vmatprep.subr.bf16.mxu1 %v5688_v33 }
 0x243   :  { %2286 = vmatpush2.bf16.msra.mxu0 %v5692_v50  ;;  %2327 = vmatpush2.bf16.msra.mxu1 %v5694_v30 }
 0x244   :  { %2287 = vmatprep.subr.bf16.mxu0 %v5698_v55  ;;  %2328 = vmatprep.subr.bf16.mxu1 %v5700_v56 }
 0x247   :  { %2288 = vmatpush2.bf16.msra.mxu0 %v5704_v9  ;;  %2329 = vmatpush2.bf16.msra.mxu1 %v5706_v21 }
 0x248   :  { %2419 = vmatprep.subr.bf16.mxu0 %v5314_v10  ;;  %2460 = vmatprep.subr.bf16.mxu1 %v5316_v11 }
 0x24a   :  { %2290 = vmatmul.mubr.bf16.vlgmr.msra.gmra.mxu0 %v5966_v1  ;;  %2331 = vmatmul.mubr.bf16.vlgmr.msra.gmra.mxu1 %v5966_v1  ;;  %v7607_v1 = vld [vmem:[#allocation47_spill] sm:$0xff] }
 0x24b   :  { %2420 = vmatpush1.bf16.msra.mxu0 %v5320_v17  ;;  %2461 = vmatpush1.bf16.msra.mxu1 %v5322_v18 }
 0x24c   :  { %2421 = vmatprep.subr.bf16.mxu0 %v5326_v19  ;;  %2462 = vmatprep.subr.bf16.mxu1 %v5328_v20 }
 0x24f   :  { %2422 = vmatpush1.bf16.msra.mxu0 %v5332_v25  ;;  %2463 = vmatpush1.bf16.msra.mxu1 %v5334_v26 }
 0x250   :  { %2423 = vmatprep.subr.bf16.mxu0 %v5338_v27  ;;  %2464 = vmatprep.subr.bf16.mxu1 %v5340_v28 }
 0x253   :  { %2424 = vmatpush1.bf16.msra.mxu0 %v5346_v34  ;;  %2465 = vmatpush1.bf16.msra.mxu1 %v5348_v35 }
 0x254   :  { %2425 = vmatprep.subr.bf16.mxu0 %v5352_v36  ;;  %2466 = vmatprep.subr.bf16.mxu1 %v5354_v37 }
 0x257   :  { %2426 = vmatpush1.bf16.msra.mxu0 %v5358_v42  ;;  %2467 = vmatpush1.bf16.msra.mxu1 %v5360_v43  ;;  %v7608_v43 = vld [vmem:[#allocation48_spill] sm:$0xff]  ;;  %v7649_v42 = vld [vmem:[#allocation151_spill] sm:$0xff] }
 0x258   :  { %2427 = vmatprep.subr.bf16.mxu0 %v5364_v44  ;;  %2468 = vmatprep.subr.bf16.mxu1 %v5366_v45  ;;  %v7609_v44 = vld [vmem:[#allocation49_spill] sm:$0xff]  ;;  %v7610_v45 = vld [vmem:[#allocation50_spill] sm:$0xff] }
 0x25b   :  { %2428 = vmatpush1.bf16.msra.mxu0 %v5372_v51  ;;  %2469 = vmatpush1.bf16.msra.mxu1 %v5374_v52  ;;  %v7611_v51 = vld [vmem:[#allocation51_spill] sm:$0xff]  ;;  %v7612_v52 = vld [vmem:[#allocation52_spill] sm:$0xff] }
 0x25c   :  { %2429 = vmatprep.subr.bf16.mxu0 %v5378_v53  ;;  %2470 = vmatprep.subr.bf16.mxu1 %v5380_v54  ;;  %v7613_v53 = vld [vmem:[#allocation53_spill] sm:$0xff]  ;;  %v7614_v54 = vld [vmem:[#allocation54_spill] sm:$0xff] }
 0x25f   :  { %2430 = vmatpush1.bf16.msra.mxu0 %v5384_v59  ;;  %2471 = vmatpush1.bf16.msra.mxu1 %v5386_v60  ;;  %v7615_v59 = vld [vmem:[#allocation55_spill] sm:$0xff]  ;;  %v7616_v60 = vld [vmem:[#allocation56_spill] sm:$0xff] }
 0x260   :  { %2431 = vmatprep.subr.bf16.mxu0 %v5390_v61  ;;  %2472 = vmatprep.subr.bf16.mxu1 %v7607_v1  ;;  %v7617_v61 = vld [vmem:[#allocation57_spill] sm:$0xff]  ;;  %v7618_v1 = vld [vmem:[#allocation58_spill] sm:$0xff] }
 0x263   :  { %2432 = vmatpush1.bf16.msra.mxu0 %v7608_v43  ;;  %2473 = vmatpush1.bf16.msra.mxu1 %v7609_v44  ;;  %v7619_v43 = vld [vmem:[#allocation59_spill] sm:$0xff]  ;;  %v7620_v44 = vld [vmem:[#allocation60_spill] sm:$0xff] }
 0x264   :  { %2433 = vmatprep.subr.bf16.mxu0 %v7610_v45  ;;  %2474 = vmatprep.subr.bf16.mxu1 %v7611_v51  ;;  %v7621_v45 = vld [vmem:[#allocation61_spill] sm:$0xff]  ;;  %v7622_v51 = vld [vmem:[#allocation62_spill] sm:$0xff] }
 0x267   :  { %2434 = vmatpush1.bf16.msra.mxu0 %v7612_v52  ;;  %2475 = vmatpush1.bf16.msra.mxu1 %v7613_v53  ;;  %v7623_v52 = vld [vmem:[#allocation63_spill] sm:$0xff]  ;;  %v7624_v53 = vld [vmem:[#allocation64_spill] sm:$0xff] }
 0x268   :  { %2435 = vmatprep.subr.bf16.mxu0 %v7614_v54  ;;  %2476 = vmatprep.subr.bf16.mxu1 %v7615_v59  ;;  %v7625_v54 = vld [vmem:[#allocation65_spill] sm:$0xff]  ;;  %v7626_v59 = vld [vmem:[#allocation66_spill] sm:$0xff] }
 0x26b   :  { %2436 = vmatpush2.bf16.msra.mxu0 %v7616_v60  ;;  %2477 = vmatpush2.bf16.msra.mxu1 %v7617_v61  ;;  %v7627_v60 = vld [vmem:[#allocation67_spill] sm:$0xff]  ;;  %v7628_v61 = vld [vmem:[#allocation68_spill] sm:$0xff] }
 0x26c   :  { %2437 = vmatprep.subr.bf16.mxu0 %v7618_v1  ;;  %2478 = vmatprep.subr.bf16.mxu1 %v7619_v43  ;;  %v7629_v1 = vld [vmem:[#allocation69_spill] sm:$0xff]  ;;  %v7630_v43 = vld [vmem:[#allocation70_spill] sm:$0xff] }
 0x26f   :  { %2438 = vmatpush2.bf16.msra.mxu0 %v7620_v44  ;;  %2479 = vmatpush2.bf16.msra.mxu1 %v7621_v45  ;;  %v7631_v44 = vld [vmem:[#allocation71_spill] sm:$0xff]  ;;  %v7632_v45 = vld [vmem:[#allocation72_spill] sm:$0xff] }
 0x270   :  { %2439 = vmatprep.subr.bf16.mxu0 %v7622_v51  ;;  %2480 = vmatprep.subr.bf16.mxu1 %v7623_v52  ;;  %v7633_v51 = vld [vmem:[#allocation73_spill] sm:$0xff]  ;;  %v7634_v52 = vld [vmem:[#allocation74_spill] sm:$0xff] }
 0x273   :  { %2440 = vmatpush2.bf16.msra.mxu0 %v7624_v53  ;;  %2481 = vmatpush2.bf16.msra.mxu1 %v7625_v54  ;;  %v7635_v53 = vld [vmem:[#allocation75_spill] sm:$0xff]  ;;  %v7636_v54 = vld [vmem:[#allocation76_spill] sm:$0xff] }
 0x274   :  { %2441 = vmatprep.subr.bf16.mxu0 %v7626_v59  ;;  %2482 = vmatprep.subr.bf16.mxu1 %v7627_v60  ;;  %v7637_v59 = vld [vmem:[#allocation77_spill] sm:$0xff]  ;;  %v7638_v60 = vld [vmem:[#allocation78_spill] sm:$0xff] }
 0x277   :  { %2442 = vmatpush2.bf16.msra.mxu0 %v7628_v61  ;;  %2483 = vmatpush2.bf16.msra.mxu1 %v7629_v1  ;;  %v7639_v61 = vld [vmem:[#allocation79_spill] sm:$0xff]  ;;  %v7640_v1 = vld [vmem:[#allocation80_spill] sm:$0xff] }
 0x278   :  { %2443 = vmatprep.subr.bf16.mxu0 %v7630_v43  ;;  %2484 = vmatprep.subr.bf16.mxu1 %v7631_v44  ;;  %v7641_v43 = vld [vmem:[#allocation81_spill] sm:$0xff]  ;;  %v7642_v44 = vld [vmem:[#allocation82_spill] sm:$0xff] }
 0x27b   :  { %2444 = vmatpush2.bf16.msra.mxu0 %v7632_v45  ;;  %2485 = vmatpush2.bf16.msra.mxu1 %v7633_v51  ;;  %v7643_v45 = vld [vmem:[#allocation83_spill] sm:$0xff]  ;;  %v7644_v51 = vld [vmem:[#allocation84_spill] sm:$0xff] }
 0x27c   :  { %2445 = vmatprep.subr.bf16.mxu0 %v7634_v52  ;;  %2486 = vmatprep.subr.bf16.mxu1 %v7635_v53  ;;  %v7645_v52 = vld [vmem:[#allocation85_spill] sm:$0xff]  ;;  %v7646_v53 = vld [vmem:[#allocation86_spill] sm:$0xff] }
 0x27f   :  { %2446 = vmatpush2.bf16.msra.mxu0 %v7636_v54  ;;  %2487 = vmatpush2.bf16.msra.mxu1 %v7637_v59  ;;  %v7647_v54 = vld [vmem:[#allocation87_spill] sm:$0xff]  ;;  %v7648_v59 = vld [vmem:[#allocation150_spill] sm:$0xff] }
 0x280   :  { %2447 = vmatprep.subr.bf16.mxu0 %v7638_v60  ;;  %2488 = vmatprep.subr.bf16.mxu1 %v7639_v61  ;;  %v2344_v60 = vunpack.c.l.bf16 %v7648_v59  ;;  %v2346_v61 = vunpack.c.l.bf16 %v7649_v42 }
 0x283   :  { %2448 = vmatpush2.bf16.msra.mxu0 %v7640_v1  ;;  %2489 = vmatpush2.bf16.msra.mxu1 %v7641_v43 }
 0x284   :  { %2449 = vmatprep.subr.bf16.mxu0 %v7642_v44  ;;  %2490 = vmatprep.subr.bf16.mxu1 %v7643_v45  ;;  %v2345_v44 = vunpack.c.h.bf16 %v7648_v59  ;;  %v2347_v45 = vunpack.c.h.bf16 %v7649_v42 }
 0x287   :  { %2450 = vmatpush2.bf16.msra.mxu0 %v7644_v51  ;;  %2491 = vmatpush2.bf16.msra.mxu1 %v7645_v52 }
 0x288   :  { %2501 = vmatprep.subr.bf16.mxu0 %v7646_v53  ;;  %2542 = vmatprep.subr.bf16.mxu1 %v7647_v54 }
 0x2ca   :  { %v2209_v37 = vpop.f32.mrf.mxu0  ;;  %v2250_v1 = vpop.f32.mrf.mxu1 }
 0x2cb   :  { %v2348_v36 = vadd.f32 %v2344_v60, %v2209_v37  ;;  %v2350_v43 = vadd.f32 %v2346_v61, %v2250_v1 }
 0x2cc   :  { %v2211_v35 = vpop.f32.mrf.mxu0  ;;  %v2252_v51 = vpop.f32.mrf.mxu1 }
 0x2cd   :  { %v4506_v34 = vmul.f32 -1.442695, %v2348_v36  ;;  %v2349_v52 = vadd.f32 %v2345_v44, %v2211_v35  ;;  %v2351_v28 = vadd.f32 %v2347_v45, %v2252_v51 }
 0x2ce   :  { %v2213_v53 = vpop.f32.mrf.mxu0  ;;  %v2254_v27 = vpop.f32.mrf.mxu1 }
 0x2cf   :  { %4840 = vpow2.f32 %v4506_v34  ;;  %v4507_v54 = vmul.f32 -1.442695, %v2349_v52  ;;  %v7650_v27 = vld [vmem:[#allocation176_spill] sm:$0xff] }
 0x2d0   :  { %v2214_v26 = vpop.f32.mrf.mxu0  ;;  %v2255_v25 = vpop.f32.mrf.mxu1  ;;  %v2357_v34 = vunpack.c.l.bf16 %v7650_v27 }
 0x2d1   :  { %4842 = vpow2.f32 %v4507_v54 }
 0x2d2   :  { %4844 = vtanh.f32 %v2351_v28 }
 0x2dc   :  { %v4841_v20 = vpop.eup %4840 }
 0x2dd   :  { %v2374_v19 = vadd.f32 1.0, %v4841_v20  ;;  %v2358_v20 = vunpack.c.h.bf16 %v7650_v27 }
 0x2de   :  { %v4843_v37 = vpop.eup %4842 }
 0x2df   :  { %4846 = vrcp.f32 %v2374_v19  ;;  %v2375_v59 = vadd.f32 1.0, %v4843_v37  ;;  %v4845_v42 = vpop.eup %4844 }
 0x2e1   :  { %4848 = vrcp.f32 %v2375_v59 }
 0x2ec   :  { %v4847_v60 = vpop.eup %4846 }
 0x2ed   :  { %v2385_v61 = vmul.f32 %v4847_v60, %v4845_v42 }
 0x2ee   :  { %v4849_v36 = vpop.eup %4848 }
 0x2ef   :  { %v2384_v35 = vmul.f32 %v4849_v36, %v5950_v16  ;;  %v7651_v16 = vld [vmem:[#allocation177_spill] sm:$0xff] }
 0x2f0   :  { %v2359_v42 = vunpack.c.l.bf16 %v7651_v16  ;;  %v2360_v36 = vunpack.c.h.bf16 %v7651_v16 }
 0x2f1   :  { %v6105_v44 = vadd.f32 %v2385_v61, %v2384_v35  ;;  %v4508_v61 = vmul.f32 -1.442695, %v2350_v43 }
 0x30a   :  { %v2291_v26 = vpop.f32.mrf.mxu0  ;;  %v2332_v25 = vpop.f32.mrf.mxu1 }
 0x30b   :  { %v2361_v45 = vadd.f32 %v2357_v34, %v2291_v26  ;;  %v2363_v60 = vadd.f32 %v2359_v42, %v2332_v25 }
 0x30c   :  { %v2293_v51 = vpop.f32.mrf.mxu0  ;;  %v2334_v28 = vpop.f32.mrf.mxu1 }
 0x30d   :  { %v4509_v19 = vmul.f32 -1.442695, %v2361_v45  ;;  %v2362_v52 = vadd.f32 %v2358_v20, %v2293_v51  ;;  %v4511_v35 = vmul.f32 -1.442695, %v2363_v60  ;;  %v2364_v34 = vadd.f32 %v2360_v36, %v2334_v28 }
 0x30e   :  { %v2295_v53 = vpop.f32.mrf.mxu0  ;;  %v2336_v54 = vpop.f32.mrf.mxu1 }
 0x30f   :  { %4850 = vpow2.f32 %v4509_v19  ;;  %v4510_v1 = vmul.f32 -1.442695, %v2362_v52 }
 0x310   :  { %v2296_v37 = vpop.f32.mrf.mxu0  ;;  %v2337_v59 = vpop.f32.mrf.mxu1 }
 0x311   :  { %4852 = vpow2.f32 %v4510_v1 }
 0x312   :  { %4854 = vpow2.f32 %v4508_v61 }
 0x313   :  { %4856 = vpow2.f32 %v4511_v35 }
 0x314   :  { %4858 = vtanh.f32 %v2364_v34  ;;  %v7652_v34 = vld [vmem:[#allocation101_spill] sm:$0xff] }
 0x31c   :  { %v4851_v27 = vpop.eup %4850 }
 0x31d   :  { %v2398_v26 = vadd.f32 1.0, %v4851_v27  ;;  %v7653_v27 = vld [vmem:[#allocation102_spill] sm:$0xff] }
 0x31e   :  { %v4853_v45 = vpop.eup %4852 }
 0x31f   :  { %4860 = vrcp.f32 %v2398_v26  ;;  %v2399_v20 = vadd.f32 1.0, %v4853_v45  ;;  %v4855_v51 = vpop.eup %4854  ;;  %v7654_v26 = vld [vmem:[#allocation103_spill] sm:$0xff]  ;;  %v7655_v45 = vld [vmem:[#allocation104_spill] sm:$0xff] }
 0x320   :  { %v4857_v19 = vpop.eup %4856  ;;  %v2376_v54 = vadd.f32 1.0, %v4855_v51  ;;  %v7657_v51 = vld [vmem:[#allocation106_spill] sm:$0xff] }
 0x321   :  { %4862 = vrcp.f32 %v2399_v20  ;;  %v4859_v52 = vpop.eup %4858  ;;  %v2400_v1 = vadd.f32 1.0, %v4857_v19  ;;  %v7656_v20 = vld [vmem:[#allocation105_spill] sm:$0xff]  ;;  %v7658_v19 = vld [vmem:[#allocation107_spill] sm:$0xff] }
 0x322   :  { %4864 = vtanh.f32 %v6105_v44 }
 0x323   :  { %4866 = vrcp.f32 %v2376_v54  ;;  %v7661_v54 = vld [vmem:[#allocation110_spill] sm:$0xff] }
 0x324   :  { %4868 = vrcp.f32 %v2400_v1  ;;  %v7664_v1 = vld [vmem:[#allocation113_spill] sm:$0xff] }
 0x32c   :  { %v4861_v53 = vpop.eup %4860 }
 0x32d   :  { %v2409_v25 = vmul.f32 %v4861_v53, %v4859_v52  ;;  %v7659_v52 = vld [vmem:[#allocation108_spill] sm:$0xff]  ;;  %v7660_v53 = vld [vmem:[#allocation109_spill] sm:$0xff] }
 0x32e   :  { %v4863_v43 = vpop.eup %4862 }
 0x32f   :  { %v2408_v37 = vmul.f32 %v4863_v43, %v5955_v0  ;;  %v4865_v59 = vpop.eup %4864  ;;  %v7663_v43 = vld [vmem:[#allocation112_spill] sm:$0xff] }
 0x330   :  { %v4867_v16 = vpop.eup %4866 }
 0x331   :  { %v6113_v28 = vadd.f32 %v2409_v25, %v2408_v37  ;;  %v4869_v42 = vpop.eup %4868  ;;  %v6116_v61 = vmul.f32 %v4867_v16, %v4865_v59  ;;  %v7662_v25 = vld [vmem:[#allocation111_spill] sm:$0xff]  ;;  %v7665_v37 = vld [vmem:[#allocation114_spill] sm:$0xff]  ;;  %v7667_v16 = vld [vmem:[#allocation116_spill] sm:$0xff] }
 0x332   :  { %v7666_v59 = vld [vmem:[#allocation115_spill] sm:$0xff] }
 0x333   :  { %4870 = vtanh.f32 %v6113_v28  ;;  %v6124_v0 = vpack.c.bf16 %v6116_v61, %v6116_v61 }
 0x340   :  { %v4871_v60 = vpop.eup %4870 }
 0x341   :  { %v6118_v36 = vmul.f32 %v4871_v60, %v4869_v42  ;;  %v7668_v42 = vld [vmem:[#allocation117_spill] sm:$0xff]  ;;  %v7669_v60 = vld [vmem:[#allocation118_spill] sm:$0xff] }
 0x343   :  { %v2418_v35 = vpack.c.bf16 %v6118_v36, %v6118_v36 }
 0x345   :  { %2451 = vmatprep.mubr.bf16.mxu0 %v2418_v35  ;;  %2492 = vmatprep.mubr.bf16.mxu1 %v2418_v35 }
 0x346   :  { %2452 = vmatmul.mubr.bf16.vlgmr.msra.gmra.mxu0 %v6124_v0  ;;  %2493 = vmatmul.mubr.bf16.vlgmr.msra.gmra.mxu1 %v6124_v0 }
 0x347   :  { %2502 = vmatpush1.bf16.msra.mxu0 %v7557_v15  ;;  %2543 = vmatpush1.bf16.msra.mxu1 %v7558_v46 }
 0x348   :  { %2533 = vmatprep.mubr.bf16.mxu0 %v2418_v35  ;;  %2574 = vmatprep.mubr.bf16.mxu1 %v2418_v35  ;;  %v7670_v35 = vld [vmem:[#allocation119_spill] sm:$0xff] }
 0x349   :  { %2503 = vmatprep.subr.bf16.mxu0 %v7559_v13  ;;  %2544 = vmatprep.subr.bf16.mxu1 %v7560_v62 }
 0x34b   :  { %2504 = vmatpush1.bf16.msra.mxu0 %v7561_v40  ;;  %2545 = vmatpush1.bf16.msra.mxu1 %v7562_v49 }
 0x34c   :  { %2505 = vmatprep.subr.bf16.mxu0 %v7563_v48  ;;  %2546 = vmatprep.subr.bf16.mxu1 %v7564_v39 }
 0x34f   :  { %2506 = vmatpush1.bf16.msra.mxu0 %v7565_v14  ;;  %2547 = vmatpush1.bf16.msra.mxu1 %v7566_v63 }
 0x350   :  { %2507 = vmatprep.subr.bf16.mxu0 %v7567_v12  ;;  %2548 = vmatprep.subr.bf16.mxu1 %v7568_v7 }
 0x353   :  { %2508 = vmatpush1.bf16.msra.mxu0 %v7569_v47  ;;  %2549 = vmatpush1.bf16.msra.mxu1 %v7652_v34 }
 0x354   :  { %2509 = vmatprep.subr.bf16.mxu0 %v7653_v27  ;;  %2550 = vmatprep.subr.bf16.mxu1 %v7654_v26 }
 0x357   :  { %2510 = vmatpush1.bf16.msra.mxu0 %v7655_v45  ;;  %2551 = vmatpush1.bf16.msra.mxu1 %v7656_v20 }
 0x358   :  { %2511 = vmatprep.subr.bf16.mxu0 %v7657_v51  ;;  %2552 = vmatprep.subr.bf16.mxu1 %v7658_v19 }
 0x35b   :  { %2512 = vmatpush1.bf16.msra.mxu0 %v7659_v52  ;;  %2553 = vmatpush1.bf16.msra.mxu1 %v7660_v53  ;;  %v7671_v53 = vld [vmem:[#allocation120_spill] sm:$0xff] }
 0x35c   :  { %2513 = vmatprep.subr.bf16.mxu0 %v7661_v54  ;;  %2554 = vmatprep.subr.bf16.mxu1 %v7662_v25  ;;  %v7672_v54 = vld [vmem:[#allocation121_spill] sm:$0xff]  ;;  %v7673_v25 = vld [vmem:[#allocation122_spill] sm:$0xff] }
 0x35f   :  { %2514 = vmatpush1.bf16.msra.mxu0 %v7663_v43  ;;  %2555 = vmatpush1.bf16.msra.mxu1 %v7664_v1  ;;  %v7674_v43 = vld [vmem:[#allocation123_spill] sm:$0xff]  ;;  %v7675_v1 = vld [vmem:[#allocation124_spill] sm:$0xff] }
 0x360   :  { %2515 = vmatprep.subr.bf16.mxu0 %v7665_v37  ;;  %2556 = vmatprep.subr.bf16.mxu1 %v7666_v59 }
 0x363   :  { %2516 = vmatpush1.bf16.msra.mxu0 %v7667_v16  ;;  %2557 = vmatpush1.bf16.msra.mxu1 %v7668_v42  ;;  %v7676_v42 = vld [vmem:[#allocation128_spill] sm:$0xff] }
 0x364   :  { %2517 = vmatprep.subr.bf16.mxu0 %v7669_v60  ;;  %2558 = vmatprep.subr.bf16.mxu1 %v7670_v35  ;;  %v7677_v60 = vld [vmem:[#allocation129_spill] sm:$0xff] }
 0x367   :  { %2518 = vmatpush2.bf16.msra.mxu0 %v7671_v53  ;;  %2559 = vmatpush2.bf16.msra.mxu1 %v7672_v54 }
 0x368   :  { %2519 = vmatprep.subr.bf16.mxu0 %v7673_v25  ;;  %2560 = vmatprep.subr.bf16.mxu1 %v7674_v43 }
 0x36b   :  { %2520 = vmatpush2.bf16.msra.mxu0 %v7675_v1  ;;  %2561 = vmatpush2.bf16.msra.mxu1 %v7594_v38 }
 0x36c   :  { %2521 = vmatprep.subr.bf16.mxu0 %v7595_v22  ;;  %2562 = vmatprep.subr.bf16.mxu1 %v7596_v31 }
 0x36f   :  { %2522 = vmatpush2.bf16.msra.mxu0 %v7676_v42  ;;  %2563 = vmatpush2.bf16.msra.mxu1 %v7677_v60 }
 0x370   :  { %2523 = vmatprep.subr.bf16.mxu0 %v7599_v6  ;;  %2564 = vmatprep.subr.bf16.mxu1 %v7600_v23 }
 0x373   :  { %2524 = vmatpush2.bf16.msra.mxu0 %v7601_v57  ;;  %2565 = vmatpush2.bf16.msra.mxu1 %v7602_v8 }
 0x374   :  { %2525 = vmatprep.subr.bf16.mxu0 %v7603_v58  ;;  %2566 = vmatprep.subr.bf16.mxu1 %v7604_v5 }
 0x377   :  { %2526 = vmatpush2.bf16.msra.mxu0 %v5668_v3  ;;  %2567 = vmatpush2.bf16.msra.mxu1 %v5670_v4 }
 0x378   :  { %2527 = vmatprep.subr.bf16.mxu0 %v5674_v2  ;;  %2568 = vmatprep.subr.bf16.mxu1 %v7605_v32 }
 0x37b   :  { %2528 = vmatpush2.bf16.msra.mxu0 %v7606_v41  ;;  %2569 = vmatpush2.bf16.msra.mxu1 %v5682_v24 }
 0x37c   :  { %2529 = vmatprep.subr.bf16.mxu0 %v5686_v29  ;;  %2570 = vmatprep.subr.bf16.mxu1 %v5688_v33  ;;  %v7741_v33 = vld [vmem:[#allocation153_spill] sm:$0xff] }
 0x37f   :  { %2530 = vmatpush2.bf16.msra.mxu0 %v5692_v50  ;;  %2571 = vmatpush2.bf16.msra.mxu1 %v5694_v30  ;;  %v7678_v30 = vld [vmem:[#allocation26_spill] sm:$0xff]  ;;  %v7685_v50 = vld [vmem:[#allocation33_spill] sm:$0xff] }
 0x380   :  { %2531 = vmatprep.subr.bf16.mxu0 %v5698_v55  ;;  %2572 = vmatprep.subr.bf16.mxu1 %v5700_v56  ;;  %v7679_v55 = vld [vmem:[#allocation27_spill] sm:$0xff]  ;;  %v7680_v56 = vld [vmem:[#allocation28_spill] sm:$0xff] }
 0x383   :  { %2532 = vmatpush2.bf16.msra.mxu0 %v5704_v9  ;;  %2573 = vmatpush2.bf16.msra.mxu1 %v5706_v21  ;;  %v7681_v9 = vld [vmem:[#allocation29_spill] sm:$0xff]  ;;  %v7682_v21 = vld [vmem:[#allocation30_spill] sm:$0xff] }
 0x384   :  { %2663 = vmatprep.subr.bf16.mxu0 %v5314_v10  ;;  %2704 = vmatprep.subr.bf16.mxu1 %v5316_v11  ;;  %v7683_v10 = vld [vmem:[#allocation31_spill] sm:$0xff]  ;;  %v7684_v11 = vld [vmem:[#allocation32_spill] sm:$0xff] }
 0x386   :  { %2534 = vmatmul.mubr.bf16.vlgmr.msra.gmra.mxu0 %v6124_v0  ;;  %2575 = vmatmul.mubr.bf16.vlgmr.msra.gmra.mxu1 %v6124_v0  ;;  %v7686_v0 = vld [vmem:[#allocation34_spill] sm:$0xff] }
 0x387   :  { %2664 = vmatpush1.bf16.msra.mxu0 %v5320_v17  ;;  %2705 = vmatpush1.bf16.msra.mxu1 %v5322_v18  ;;  %v7687_v17 = vld [vmem:[#allocation35_spill] sm:$0xff]  ;;  %v7688_v18 = vld [vmem:[#allocation36_spill] sm:$0xff] }
 0x388   :  { %2665 = vmatprep.subr.bf16.mxu0 %v7678_v30  ;;  %2706 = vmatprep.subr.bf16.mxu1 %v7679_v55  ;;  %v7689_v30 = vld [vmem:[#allocation37_spill] sm:$0xff]  ;;  %v7690_v55 = vld [vmem:[#allocation38_spill] sm:$0xff] }
 0x38b   :  { %2666 = vmatpush1.bf16.msra.mxu0 %v7680_v56  ;;  %2707 = vmatpush1.bf16.msra.mxu1 %v7681_v9  ;;  %v7691_v56 = vld [vmem:[#allocation39_spill] sm:$0xff]  ;;  %v7692_v9 = vld [vmem:[#allocation40_spill] sm:$0xff] }
 0x38c   :  { %2667 = vmatprep.subr.bf16.mxu0 %v7682_v21  ;;  %2708 = vmatprep.subr.bf16.mxu1 %v7683_v10  ;;  %v7693_v21 = vld [vmem:[#allocation41_spill] sm:$0xff]  ;;  %v7694_v10 = vld [vmem:[#allocation42_spill] sm:$0xff] }
 0x38f   :  { %2668 = vmatpush1.bf16.msra.mxu0 %v7684_v11  ;;  %2709 = vmatpush1.bf16.msra.mxu1 %v7685_v50  ;;  %v7695_v11 = vld [vmem:[#allocation43_spill] sm:$0xff]  ;;  %v7696_v50 = vld [vmem:[#allocation44_spill] sm:$0xff] }
 0x390   :  { %2669 = vmatprep.subr.bf16.mxu0 %v7686_v0  ;;  %2710 = vmatprep.subr.bf16.mxu1 %v7687_v17  ;;  %v7697_v0 = vld [vmem:[#allocation45_spill] sm:$0xff]  ;;  %v7698_v17 = vld [vmem:[#allocation46_spill] sm:$0xff] }
 0x393   :  { %2670 = vmatpush1.bf16.msra.mxu0 %v7688_v18  ;;  %2711 = vmatpush1.bf16.msra.mxu1 %v7689_v30  ;;  %v7699_v18 = vld [vmem:[#allocation47_spill] sm:$0xff]  ;;  %v7700_v30 = vld [vmem:[#allocation48_spill] sm:$0xff] }
 0x394   :  { %2671 = vmatprep.subr.bf16.mxu0 %v7690_v55  ;;  %2712 = vmatprep.subr.bf16.mxu1 %v7691_v56  ;;  %v7701_v55 = vld [vmem:[#allocation49_spill] sm:$0xff]  ;;  %v7702_v56 = vld [vmem:[#allocation50_spill] sm:$0xff] }
 0x397   :  { %2672 = vmatpush1.bf16.msra.mxu0 %v7692_v9  ;;  %2713 = vmatpush1.bf16.msra.mxu1 %v7693_v21  ;;  %v7703_v9 = vld [vmem:[#allocation51_spill] sm:$0xff]  ;;  %v7704_v21 = vld [vmem:[#allocation52_spill] sm:$0xff] }
 0x398   :  { %2673 = vmatprep.subr.bf16.mxu0 %v7694_v10  ;;  %2714 = vmatprep.subr.bf16.mxu1 %v7695_v11  ;;  %v7705_v10 = vld [vmem:[#allocation53_spill] sm:$0xff]  ;;  %v7706_v11 = vld [vmem:[#allocation54_spill] sm:$0xff] }
 0x39b   :  { %2674 = vmatpush1.bf16.msra.mxu0 %v7696_v50  ;;  %2715 = vmatpush1.bf16.msra.mxu1 %v7697_v0  ;;  %v7707_v50 = vld [vmem:[#allocation55_spill] sm:$0xff]  ;;  %v7708_v0 = vld [vmem:[#allocation56_spill] sm:$0xff] }
 0x39c   :  { %2675 = vmatprep.subr.bf16.mxu0 %v7698_v17  ;;  %2716 = vmatprep.subr.bf16.mxu1 %v7699_v18  ;;  %v7709_v17 = vld [vmem:[#allocation57_spill] sm:$0xff]  ;;  %v7710_v18 = vld [vmem:[#allocation58_spill] sm:$0xff] }
 0x39f   :  { %2676 = vmatpush1.bf16.msra.mxu0 %v7700_v30  ;;  %2717 = vmatpush1.bf16.msra.mxu1 %v7701_v55  ;;  %v7711_v30 = vld [vmem:[#allocation59_spill] sm:$0xff]  ;;  %v7712_v55 = vld [vmem:[#allocation60_spill] sm:$0xff] }
 0x3a0   :  { %2677 = vmatprep.subr.bf16.mxu0 %v7702_v56  ;;  %2718 = vmatprep.subr.bf16.mxu1 %v7703_v9  ;;  %v7713_v56 = vld [vmem:[#allocation61_spill] sm:$0xff]  ;;  %v7714_v9 = vld [vmem:[#allocation62_spill] sm:$0xff] }
 0x3a3   :  { %2678 = vmatpush1.bf16.msra.mxu0 %v7704_v21  ;;  %2719 = vmatpush1.bf16.msra.mxu1 %v7705_v10  ;;  %v7715_v21 = vld [vmem:[#allocation63_spill] sm:$0xff]  ;;  %v7716_v10 = vld [vmem:[#allocation64_spill] sm:$0xff] }
 0x3a4   :  { %2679 = vmatprep.subr.bf16.mxu0 %v7706_v11  ;;  %2720 = vmatprep.subr.bf16.mxu1 %v7707_v50  ;;  %v7717_v11 = vld [vmem:[#allocation65_spill] sm:$0xff]  ;;  %v7718_v50 = vld [vmem:[#allocation66_spill] sm:$0xff] }
 0x3a7   :  { %2680 = vmatpush2.bf16.msra.mxu0 %v7708_v0  ;;  %2721 = vmatpush2.bf16.msra.mxu1 %v7709_v17  ;;  %v7719_v0 = vld [vmem:[#allocation67_spill] sm:$0xff]  ;;  %v7720_v17 = vld [vmem:[#allocation68_spill] sm:$0xff] }
 0x3a8   :  { %2681 = vmatprep.subr.bf16.mxu0 %v7710_v18  ;;  %2722 = vmatprep.subr.bf16.mxu1 %v7711_v30  ;;  %v7721_v18 = vld [vmem:[#allocation69_spill] sm:$0xff]  ;;  %v7722_v30 = vld [vmem:[#allocation70_spill] sm:$0xff] }
 0x3ab   :  { %2682 = vmatpush2.bf16.msra.mxu0 %v7712_v55  ;;  %2723 = vmatpush2.bf16.msra.mxu1 %v7713_v56  ;;  %v7723_v55 = vld [vmem:[#allocation71_spill] sm:$0xff]  ;;  %v7724_v56 = vld [vmem:[#allocation72_spill] sm:$0xff] }
 0x3ac   :  { %2683 = vmatprep.subr.bf16.mxu0 %v7714_v9  ;;  %2724 = vmatprep.subr.bf16.mxu1 %v7715_v21  ;;  %v7725_v9 = vld [vmem:[#allocation73_spill] sm:$0xff]  ;;  %v7726_v21 = vld [vmem:[#allocation74_spill] sm:$0xff] }
 0x3af   :  { %2684 = vmatpush2.bf16.msra.mxu0 %v7716_v10  ;;  %2725 = vmatpush2.bf16.msra.mxu1 %v7717_v11  ;;  %v7727_v10 = vld [vmem:[#allocation75_spill] sm:$0xff]  ;;  %v7728_v11 = vld [vmem:[#allocation76_spill] sm:$0xff] }
 0x3b0   :  { %2685 = vmatprep.subr.bf16.mxu0 %v7718_v50  ;;  %2726 = vmatprep.subr.bf16.mxu1 %v7719_v0  ;;  %v7729_v50 = vld [vmem:[#allocation77_spill] sm:$0xff]  ;;  %v7730_v0 = vld [vmem:[#allocation78_spill] sm:$0xff] }
 0x3b3   :  { %2686 = vmatpush2.bf16.msra.mxu0 %v7720_v17  ;;  %2727 = vmatpush2.bf16.msra.mxu1 %v7721_v18  ;;  %v7731_v17 = vld [vmem:[#allocation79_spill] sm:$0xff]  ;;  %v7732_v18 = vld [vmem:[#allocation80_spill] sm:$0xff] }
 0x3b4   :  { %2687 = vmatprep.subr.bf16.mxu0 %v7722_v30  ;;  %2728 = vmatprep.subr.bf16.mxu1 %v7723_v55  ;;  %v7733_v30 = vld [vmem:[#allocation81_spill] sm:$0xff]  ;;  %v7734_v55 = vld [vmem:[#allocation82_spill] sm:$0xff] }
 0x3b7   :  { %2688 = vmatpush2.bf16.msra.mxu0 %v7724_v56  ;;  %2729 = vmatpush2.bf16.msra.mxu1 %v7725_v9  ;;  %v7735_v56 = vld [vmem:[#allocation83_spill] sm:$0xff]  ;;  %v7736_v9 = vld [vmem:[#allocation84_spill] sm:$0xff] }
 0x3b8   :  { %2689 = vmatprep.subr.bf16.mxu0 %v7726_v21  ;;  %2730 = vmatprep.subr.bf16.mxu1 %v7727_v10  ;;  %v7737_v21 = vld [vmem:[#allocation85_spill] sm:$0xff]  ;;  %v7738_v10 = vld [vmem:[#allocation86_spill] sm:$0xff] }
 0x3bb   :  { %2690 = vmatpush2.bf16.msra.mxu0 %v7728_v11  ;;  %2731 = vmatpush2.bf16.msra.mxu1 %v7729_v50  ;;  %v7739_v11 = vld [vmem:[#allocation87_spill] sm:$0xff]  ;;  %v7740_v50 = vld [vmem:[#allocation152_spill] sm:$0xff] }
 0x3bc   :  { %2691 = vmatprep.subr.bf16.mxu0 %v7730_v0  ;;  %2732 = vmatprep.subr.bf16.mxu1 %v7731_v17  ;;  %v2588_v0 = vunpack.c.l.bf16 %v7740_v50  ;;  %v2590_v17 = vunpack.c.l.bf16 %v7741_v33 }
 0x3bf   :  { %2692 = vmatpush2.bf16.msra.mxu0 %v7732_v18  ;;  %2733 = vmatpush2.bf16.msra.mxu1 %v7733_v30 }
 0x3c0   :  { %2693 = vmatprep.subr.bf16.mxu0 %v7734_v55  ;;  %2734 = vmatprep.subr.bf16.mxu1 %v7735_v56  ;;  %v2589_v55 = vunpack.c.h.bf16 %v7740_v50  ;;  %v2591_v56 = vunpack.c.h.bf16 %v7741_v33 }
 0x3c3   :  { %2694 = vmatpush2.bf16.msra.mxu0 %v7736_v9  ;;  %2735 = vmatpush2.bf16.msra.mxu1 %v7737_v21 }
 0x3c4   :  { %2745 = vmatprep.subr.bf16.mxu0 %v7738_v10  ;;  %2786 = vmatprep.subr.bf16.mxu1 %v7739_v11 }
 0x406   :  { %v2453_v29 = vpop.f32.mrf.mxu0  ;;  %v2494_v18 = vpop.f32.mrf.mxu1 }
 0x407   :  { %v2592_v24 = vadd.f32 %v2588_v0, %v2453_v29  ;;  %v2594_v30 = vadd.f32 %v2590_v17, %v2494_v18 }
 0x408   :  { %v2455_v41 = vpop.f32.mrf.mxu0  ;;  %v2496_v9 = vpop.f32.mrf.mxu1 }
 0x409   :  { %v4512_v32 = vmul.f32 -1.442695, %v2592_v24  ;;  %v2593_v21 = vadd.f32 %v2589_v55, %v2455_v41  ;;  %v2595_v2 = vadd.f32 %v2591_v56, %v2496_v9  ;;  %v4514_v58 = vmul.f32 -1.442695, %v2594_v30  ;;  %v7742_v55 = vld [vmem:[#allocation178_spill] sm:$0xff] }
 0x40a   :  { %v2457_v10 = vpop.f32.mrf.mxu0  ;;  %v2498_v4 = vpop.f32.mrf.mxu1  ;;  %v2414_v56 = vmax.f32 %v7742_v55, %v6116_v61 }
 0x40b   :  { %4872 = vpow2.f32 %v4512_v32  ;;  %v4513_v11 = vmul.f32 -1.442695, %v2593_v21  ;;  %v7744_v32 = vld [vmem:[#allocation174_spill] sm:$0xff] }
 0x40c   :  { %v2458_v3 = vpop.f32.mrf.mxu0  ;;  %v2499_v5 = vpop.f32.mrf.mxu1  ;;  %v2601_v41 = vunpack.c.l.bf16 %v7744_v32 }
 0x40d   :  { %4874 = vpow2.f32 %v4513_v11 }
 0x40e   :  { %4876 = vpow2.f32 %v4514_v58 }
 0x40f   :  { %4878 = vtanh.f32 %v2595_v2  ;;  %v2413_v2 = vadd.f32 %v6116_v61, %v7742_v55 }
 0x418   :  { %v4873_v8 = vpop.eup %4872 }
 0x419   :  { %v2618_v29 = vadd.f32 1.0, %v4873_v8 }
 0x41a   :  { %v4875_v17 = vpop.eup %4874 }
 0x41b   :  { %4880 = vrcp.f32 %v2618_v29  ;;  %v2619_v18 = vadd.f32 1.0, %v4875_v17  ;;  %v4877_v33 = vpop.eup %4876  ;;  %v2602_v17 = vunpack.c.h.bf16 %v7744_v32 }
 0x41c   :  { %v4879_v24 = vpop.eup %4878  ;;  %v2620_v4 = vadd.f32 1.0, %v4877_v33 }
 0x41d   :  { %4882 = vrcp.f32 %v2619_v18 }
 0x41e   :  { %4884 = vrcp.f32 %v2620_v4 }
 0x428   :  { %v4881_v50 = vpop.eup %4880 }
 0x429   :  { %v2629_v9 = vmul.f32 %v4881_v50, %v4879_v24 }
 0x42a   :  { %v4883_v10 = vpop.eup %4882 }
 0x42b   :  { %v2628_v21 = vmul.f32 %v4883_v10, %v6105_v44  ;;  %v4885_v11 = vpop.eup %4884 }
 0x42d   :  { %v6263_v3 = vadd.f32 %v2629_v9, %v2628_v21 }
 0x42f   :  { %4886 = vtanh.f32 %v6263_v3 }
 0x43c   :  { %v4887_v30 = vpop.eup %4886 }
 0x43d   :  { %v2632_v8 = vmul.f32 %v4887_v30, %v4885_v11  ;;  %v7745_v11 = vld [vmem:[#allocation175_spill] sm:$0xff] }
 0x43e   :  { %v2603_v30 = vunpack.c.l.bf16 %v7745_v11 }
 0x43f   :  { %v6270_v58 = vadd.f32 %v2632_v8, %v2413_v2  ;;  %v6272_v5 = vmax.f32 %v2414_v56, %v2632_v8  ;;  %v2604_v2 = vunpack.c.h.bf16 %v7745_v11 }
 0x441   :  { %7743 = vst [vmem:[#allocation88_spill] sm:$0xff] %v6270_v58 }
 0x446   :  { %v2535_v44 = vpop.f32.mrf.mxu0  ;;  %v2576_v0 = vpop.f32.mrf.mxu1 }
 0x447   :  { %v2605_v29 = vadd.f32 %v2601_v41, %v2535_v44  ;;  %v2607_v55 = vadd.f32 %v2603_v30, %v2576_v0 }
 0x448   :  { %v2537_v18 = vpop.f32.mrf.mxu0  ;;  %v2578_v33 = vpop.f32.mrf.mxu1 }
 0x449   :  { %v4515_v24 = vmul.f32 -1.442695, %v2605_v29  ;;  %v2606_v50 = vadd.f32 %v2602_v17, %v2537_v18  ;;  %v4517_v56 = vmul.f32 -1.442695, %v2607_v55  ;;  %v2608_v41 = vadd.f32 %v2604_v2, %v2578_v33 }
 0x44a   :  { %v2539_v9 = vpop.f32.mrf.mxu0  ;;  %v2580_v10 = vpop.f32.mrf.mxu1 }
 0x44b   :  { %4888 = vpow2.f32 %v4515_v24  ;;  %v4516_v61 = vmul.f32 -1.442695, %v2606_v50 }
 0x44c   :  { %v2540_v4 = vpop.f32.mrf.mxu0  ;;  %v2581_v21 = vpop.f32.mrf.mxu1 }
 0x44d   :  { %4890 = vpow2.f32 %v4516_v61  ;;  %v7746_v21 = vld [vmem:[#allocation179_spill] sm:$0xff] }
 0x44e   :  { %4892 = vpow2.f32 %v4517_v56  ;;  %v2415_v11 = vadd.f32 %v6118_v36, %v7746_v21  ;;  %v2416_v30 = vmax.f32 %v7746_v21, %v6118_v36  ;;  %v7747_v36 = vld [vmem:[#allocation109_spill] sm:$0xff] }
 0x44f   :  { %4894 = vtanh.f32 %v2608_v41  ;;  %v7749_v41 = vld [vmem:[#allocation111_spill] sm:$0xff]  ;;  %v7762_v21 = vld [vmem:[#allocation141_spill] sm:$0xff] }
 0x458   :  { %v4889_v44 = vpop.eup %4888 }
 0x459   :  { %v2642_v32 = vadd.f32 1.0, %v4889_v44  ;;  %v7750_v44 = vld [vmem:[#allocation112_spill] sm:$0xff] }
 0x45a   :  { %v4891_v58 = vpop.eup %4890 }
 0x45b   :  { %4896 = vrcp.f32 %v2642_v32  ;;  %v2643_v29 = vadd.f32 1.0, %v4891_v58  ;;  %v4893_v17 = vpop.eup %4892  ;;  %v7751_v32 = vld [vmem:[#allocation113_spill] sm:$0xff] }
 0x45c   :  { %v4895_v18 = vpop.eup %4894  ;;  %v2644_v10 = vadd.f32 1.0, %v4893_v17  ;;  %v7753_v17 = vld [vmem:[#allocation118_spill] sm:$0xff] }
 0x45d   :  { %4898 = vrcp.f32 %v2643_v29  ;;  %v7752_v29 = vld [vmem:[#allocation117_spill] sm:$0xff] }
 0x45e   :  { %4900 = vrcp.f32 %v2644_v10  ;;  %v7758_v10 = vld [vmem:[#allocation137_spill] sm:$0xff] }
 0x468   :  { %v4897_v24 = vpop.eup %4896 }
 0x469   :  { %v2653_v50 = vmul.f32 %v4897_v24, %v4895_v18  ;;  %v7754_v18 = vld [vmem:[#allocation133_spill] sm:$0xff]  ;;  %v7755_v24 = vld [vmem:[#allocation134_spill] sm:$0xff] }
 0x46a   :  { %v4899_v9 = vpop.eup %4898 }
 0x46b   :  { %v2652_v0 = vmul.f32 %v4899_v9, %v6113_v28  ;;  %v4901_v33 = vpop.eup %4900  ;;  %v6290_v28 = vpack.c.bf16 %v2632_v8, %v2632_v8  ;;  %v7748_v8 = vld [vmem:[#allocation110_spill] sm:$0xff]  ;;  %v7757_v9 = vld [vmem:[#allocation136_spill] sm:$0xff] }
 0x46d   :  { %v6279_v61 = vadd.f32 %v2653_v50, %v2652_v0  ;;  %v7756_v50 = vld [vmem:[#allocation135_spill] sm:$0xff]  ;;  %v7759_v0 = vld [vmem:[#allocation138_spill] sm:$0xff] }
 0x46f   :  { %4902 = vtanh.f32 %v6279_v61 }
 0x47c   :  { %v4903_v4 = vpop.eup %4902 }
 0x47d   :  { %v2656_v58 = vmul.f32 %v4903_v4, %v4901_v33  ;;  %v7760_v33 = vld [vmem:[#allocation139_spill] sm:$0xff]  ;;  %v7761_v4 = vld [vmem:[#allocation140_spill] sm:$0xff] }
 0x47f   :  { %v2662_v55 = vpack.c.bf16 %v2656_v58, %v2656_v58  ;;  %v6286_v2 = vmax.f32 %v2416_v30, %v2656_v58  ;;  %v6288_v56 = vadd.f32 %v2656_v58, %v2415_v11  ;;  %v7763_v11 = vld [vmem:[#allocation142_spill] sm:$0xff]  ;;  %v7764_v58 = vld [vmem:[#allocation143_spill] sm:$0xff]  ;;  %v7765_v30 = vld [vmem:[#allocation144_spill] sm:$0xff] }
 0x481   :  { %2695 = vmatprep.mubr.bf16.mxu0 %v2662_v55  ;;  %2736 = vmatprep.mubr.bf16.mxu1 %v2662_v55 }
 0x482   :  { %2696 = vmatmul.mubr.bf16.vlgmr.msra.gmra.mxu0 %v6290_v28  ;;  %2737 = vmatmul.mubr.bf16.vlgmr.msra.gmra.mxu1 %v6290_v28 }
 0x483   :  { %2746 = vmatpush1.bf16.msra.mxu0 %v7557_v15  ;;  %2787 = vmatpush1.bf16.msra.mxu1 %v7558_v46 }
 0x484   :  { %2777 = vmatprep.mubr.bf16.mxu0 %v2662_v55  ;;  %2818 = vmatprep.mubr.bf16.mxu1 %v2662_v55  ;;  %v7766_v55 = vld [vmem:[#allocation145_spill] sm:$0xff] }
 0x485   :  { %2747 = vmatprep.subr.bf16.mxu0 %v7559_v13  ;;  %2788 = vmatprep.subr.bf16.mxu1 %v7560_v62 }
 0x487   :  { %2748 = vmatpush1.bf16.msra.mxu0 %v7561_v40  ;;  %2789 = vmatpush1.bf16.msra.mxu1 %v7562_v49 }
 0x488   :  { %2749 = vmatprep.subr.bf16.mxu0 %v7563_v48  ;;  %2790 = vmatprep.subr.bf16.mxu1 %v7564_v39 }
 0x48b   :  { %2750 = vmatpush1.bf16.msra.mxu0 %v7565_v14  ;;  %2791 = vmatpush1.bf16.msra.mxu1 %v7566_v63 }
 0x48c   :  { %2751 = vmatprep.subr.bf16.mxu0 %v7567_v12  ;;  %2792 = vmatprep.subr.bf16.mxu1 %v7568_v7 }
 0x48f   :  { %2752 = vmatpush1.bf16.msra.mxu0 %v7569_v47  ;;  %2793 = vmatpush1.bf16.msra.mxu1 %v7652_v34 }
 0x490   :  { %2753 = vmatprep.subr.bf16.mxu0 %v7653_v27  ;;  %2794 = vmatprep.subr.bf16.mxu1 %v7654_v26 }
 0x493   :  { %2754 = vmatpush1.bf16.msra.mxu0 %v7655_v45  ;;  %2795 = vmatpush1.bf16.msra.mxu1 %v7656_v20 }
 0x494   :  { %2755 = vmatprep.subr.bf16.mxu0 %v7657_v51  ;;  %2796 = vmatprep.subr.bf16.mxu1 %v7658_v19 }
 0x497   :  { %2756 = vmatpush1.bf16.msra.mxu0 %v7659_v52  ;;  %2797 = vmatpush1.bf16.msra.mxu1 %v7747_v36 }
 0x498   :  { %2757 = vmatprep.subr.bf16.mxu0 %v7748_v8  ;;  %2798 = vmatprep.subr.bf16.mxu1 %v7749_v41 }
 0x49b   :  { %2758 = vmatpush1.bf16.msra.mxu0 %v7750_v44  ;;  %2799 = vmatpush1.bf16.msra.mxu1 %v7751_v32 }
 0x49c   :  { %2759 = vmatprep.subr.bf16.mxu0 %v7665_v37  ;;  %2800 = vmatprep.subr.bf16.mxu1 %v7666_v59 }
 0x49f   :  { %2760 = vmatpush1.bf16.msra.mxu0 %v7667_v16  ;;  %2801 = vmatpush1.bf16.msra.mxu1 %v7752_v29 }
 0x4a0   :  { %2761 = vmatprep.subr.bf16.mxu0 %v7753_v17  ;;  %2802 = vmatprep.subr.bf16.mxu1 %v7670_v35 }
 0x4a3   :  { %2762 = vmatpush2.bf16.msra.mxu0 %v7671_v53  ;;  %2803 = vmatpush2.bf16.msra.mxu1 %v7672_v54 }
 0x4a4   :  { %2763 = vmatprep.subr.bf16.mxu0 %v7673_v25  ;;  %2804 = vmatprep.subr.bf16.mxu1 %v7674_v43 }
 0x4a7   :  { %2764 = vmatpush2.bf16.msra.mxu0 %v7675_v1  ;;  %2805 = vmatpush2.bf16.msra.mxu1 %v7594_v38 }
 0x4a8   :  { %2765 = vmatprep.subr.bf16.mxu0 %v7595_v22  ;;  %2806 = vmatprep.subr.bf16.mxu1 %v7596_v31 }
 0x4ab   :  { %2766 = vmatpush2.bf16.msra.mxu0 %v7676_v42  ;;  %2807 = vmatpush2.bf16.msra.mxu1 %v7677_v60 }
 0x4ac   :  { %2767 = vmatprep.subr.bf16.mxu0 %v7599_v6  ;;  %2808 = vmatprep.subr.bf16.mxu1 %v7600_v23 }
 0x4af   :  { %2768 = vmatpush2.bf16.msra.mxu0 %v7601_v57  ;;  %2809 = vmatpush2.bf16.msra.mxu1 %v7754_v18 }
 0x4b0   :  { %2769 = vmatprep.subr.bf16.mxu0 %v7755_v24  ;;  %2810 = vmatprep.subr.bf16.mxu1 %v7756_v50  ;;  %v7767_v50 = vld [vmem:[#allocation146_spill] sm:$0xff] }
 0x4b3   :  { %2770 = vmatpush2.bf16.msra.mxu0 %v7757_v9  ;;  %2811 = vmatpush2.bf16.msra.mxu1 %v7758_v10  ;;  %v7768_v9 = vld [vmem:[#allocation147_spill] sm:$0xff]  ;;  %v7769_v10 = vld [vmem:[#allocation148_spill] sm:$0xff] }
 0x4b4   :  { %2771 = vmatprep.subr.bf16.mxu0 %v7759_v0  ;;  %2812 = vmatprep.subr.bf16.mxu1 %v7760_v33  ;;  %v7770_v0 = vld [vmem:[#allocation149_spill] sm:$0xff]  ;;  %v7771_v33 = vld [vmem:[#allocation22_spill] sm:$0xff] }
 0x4b7   :  { %2772 = vmatpush2.bf16.msra.mxu0 %v7761_v4  ;;  %2813 = vmatpush2.bf16.msra.mxu1 %v7762_v21  ;;  %v7772_v4 = vld [vmem:[#allocation23_spill] sm:$0xff] }
 0x4b8   :  { %2773 = vmatprep.subr.bf16.mxu0 %v7763_v11  ;;  %2814 = vmatprep.subr.bf16.mxu1 %v7764_v58  ;;  %v7773_v58 = vld [vmem:[#allocation24_spill] sm:$0xff]  ;;  %v7782_v11 = vld [vmem:[#allocation33_spill] sm:$0xff]  ;;  %v7838_v21 = vld [vmem:[#allocation155_spill] sm:$0xff] }
 0x4bb   :  { %2774 = vmatpush2.bf16.msra.mxu0 %v7765_v30  ;;  %2815 = vmatpush2.bf16.msra.mxu1 %v7766_v55  ;;  %v7774_v30 = vld [vmem:[#allocation25_spill] sm:$0xff]  ;;  %v7775_v55 = vld [vmem:[#allocation26_spill] sm:$0xff] }
 0x4bc   :  { %2775 = vmatprep.subr.bf16.mxu0 %v7767_v50  ;;  %2816 = vmatprep.subr.bf16.mxu1 %v7768_v9  ;;  %v7776_v50 = vld [vmem:[#allocation27_spill] sm:$0xff]  ;;  %v7777_v9 = vld [vmem:[#allocation28_spill] sm:$0xff] }
 0x4bf   :  { %2776 = vmatpush2.bf16.msra.mxu0 %v7769_v10  ;;  %2817 = vmatpush2.bf16.msra.mxu1 %v7770_v0  ;;  %v7778_v10 = vld [vmem:[#allocation29_spill] sm:$0xff]  ;;  %v7779_v0 = vld [vmem:[#allocation30_spill] sm:$0xff] }
 0x4c0   :  { %2907 = vmatprep.subr.bf16.mxu0 %v7771_v33  ;;  %2948 = vmatprep.subr.bf16.mxu1 %v7772_v4  ;;  %v7780_v33 = vld [vmem:[#allocation31_spill] sm:$0xff]  ;;  %v7781_v4 = vld [vmem:[#allocation32_spill] sm:$0xff] }
 0x4c2   :  { %2778 = vmatmul.mubr.bf16.vlgmr.msra.gmra.mxu0 %v6290_v28  ;;  %2819 = vmatmul.mubr.bf16.vlgmr.msra.gmra.mxu1 %v6290_v28  ;;  %v7783_v28 = vld [vmem:[#allocation34_spill] sm:$0xff] }
 0x4c3   :  { %2908 = vmatpush1.bf16.msra.mxu0 %v7773_v58  ;;  %2949 = vmatpush1.bf16.msra.mxu1 %v7774_v30  ;;  %v7784_v58 = vld [vmem:[#allocation35_spill] sm:$0xff]  ;;  %v7785_v30 = vld [vmem:[#allocation36_spill] sm:$0xff] }
 0x4c4   :  { %2909 = vmatprep.subr.bf16.mxu0 %v7775_v55  ;;  %2950 = vmatprep.subr.bf16.mxu1 %v7776_v50  ;;  %v7786_v55 = vld [vmem:[#allocation37_spill] sm:$0xff]  ;;  %v7787_v50 = vld [vmem:[#allocation38_spill] sm:$0xff] }
 0x4c7   :  { %2910 = vmatpush1.bf16.msra.mxu0 %v7777_v9  ;;  %2951 = vmatpush1.bf16.msra.mxu1 %v7778_v10  ;;  %v7788_v9 = vld [vmem:[#allocation39_spill] sm:$0xff]  ;;  %v7789_v10 = vld [vmem:[#allocation40_spill] sm:$0xff] }
 0x4c8   :  { %2911 = vmatprep.subr.bf16.mxu0 %v7779_v0  ;;  %2952 = vmatprep.subr.bf16.mxu1 %v7780_v33  ;;  %v7790_v0 = vld [vmem:[#allocation41_spill] sm:$0xff]  ;;  %v7791_v33 = vld [vmem:[#allocation42_spill] sm:$0xff] }
 0x4cb   :  { %2912 = vmatpush1.bf16.msra.mxu0 %v7781_v4  ;;  %2953 = vmatpush1.bf16.msra.mxu1 %v7782_v11  ;;  %v7792_v4 = vld [vmem:[#allocation43_spill] sm:$0xff]  ;;  %v7793_v11 = vld [vmem:[#allocation44_spill] sm:$0xff] }
 0x4cc   :  { %2913 = vmatprep.subr.bf16.mxu0 %v7783_v28  ;;  %2954 = vmatprep.subr.bf16.mxu1 %v7784_v58  ;;  %v7794_v28 = vld [vmem:[#allocation45_spill] sm:$0xff]  ;;  %v7795_v58 = vld [vmem:[#allocation46_spill] sm:$0xff] }
 0x4cf   :  { %2914 = vmatpush1.bf16.msra.mxu0 %v7785_v30  ;;  %2955 = vmatpush1.bf16.msra.mxu1 %v7786_v55  ;;  %v7796_v30 = vld [vmem:[#allocation47_spill] sm:$0xff]  ;;  %v7797_v55 = vld [vmem:[#allocation48_spill] sm:$0xff] }
 0x4d0   :  { %2915 = vmatprep.subr.bf16.mxu0 %v7787_v50  ;;  %2956 = vmatprep.subr.bf16.mxu1 %v7788_v9  ;;  %v7798_v50 = vld [vmem:[#allocation49_spill] sm:$0xff]  ;;  %v7799_v9 = vld [vmem:[#allocation50_spill] sm:$0xff] }
 0x4d3   :  { %2916 = vmatpush1.bf16.msra.mxu0 %v7789_v10  ;;  %2957 = vmatpush1.bf16.msra.mxu1 %v7790_v0  ;;  %v7800_v10 = vld [vmem:[#allocation51_spill] sm:$0xff]  ;;  %v7801_v0 = vld [vmem:[#allocation52_spill] sm:$0xff] }
 0x4d4   :  { %2917 = vmatprep.subr.bf16.mxu0 %v7791_v33  ;;  %2958 = vmatprep.subr.bf16.mxu1 %v7792_v4  ;;  %v7802_v33 = vld [vmem:[#allocation53_spill] sm:$0xff]  ;;  %v7803_v4 = vld [vmem:[#allocation54_spill] sm:$0xff] }
 0x4d7   :  { %2918 = vmatpush1.bf16.msra.mxu0 %v7793_v11  ;;  %2959 = vmatpush1.bf16.msra.mxu1 %v7794_v28  ;;  %v7804_v11 = vld [vmem:[#allocation55_spill] sm:$0xff]  ;;  %v7805_v28 = vld [vmem:[#allocation56_spill] sm:$0xff] }
 0x4d8   :  { %2919 = vmatprep.subr.bf16.mxu0 %v7795_v58  ;;  %2960 = vmatprep.subr.bf16.mxu1 %v7796_v30  ;;  %v7806_v58 = vld [vmem:[#allocation57_spill] sm:$0xff]  ;;  %v7807_v30 = vld [vmem:[#allocation58_spill] sm:$0xff] }
 0x4db   :  { %2920 = vmatpush1.bf16.msra.mxu0 %v7797_v55  ;;  %2961 = vmatpush1.bf16.msra.mxu1 %v7798_v50  ;;  %v7808_v55 = vld [vmem:[#allocation59_spill] sm:$0xff]  ;;  %v7809_v50 = vld [vmem:[#allocation60_spill] sm:$0xff] }
 0x4dc   :  { %2921 = vmatprep.subr.bf16.mxu0 %v7799_v9  ;;  %2962 = vmatprep.subr.bf16.mxu1 %v7800_v10  ;;  %v7810_v9 = vld [vmem:[#allocation61_spill] sm:$0xff]  ;;  %v7811_v10 = vld [vmem:[#allocation62_spill] sm:$0xff] }
 0x4df   :  { %2922 = vmatpush1.bf16.msra.mxu0 %v7801_v0  ;;  %2963 = vmatpush1.bf16.msra.mxu1 %v7802_v33  ;;  %v7812_v0 = vld [vmem:[#allocation63_spill] sm:$0xff]  ;;  %v7813_v33 = vld [vmem:[#allocation64_spill] sm:$0xff] }
 0x4e0   :  { %2923 = vmatprep.subr.bf16.mxu0 %v7803_v4  ;;  %2964 = vmatprep.subr.bf16.mxu1 %v7804_v11  ;;  %v7814_v4 = vld [vmem:[#allocation65_spill] sm:$0xff]  ;;  %v7815_v11 = vld [vmem:[#allocation66_spill] sm:$0xff] }
 0x4e3   :  { %2924 = vmatpush2.bf16.msra.mxu0 %v7805_v28  ;;  %2965 = vmatpush2.bf16.msra.mxu1 %v7806_v58  ;;  %v7816_v28 = vld [vmem:[#allocation67_spill] sm:$0xff]  ;;  %v7817_v58 = vld [vmem:[#allocation68_spill] sm:$0xff] }
 0x4e4   :  { %2925 = vmatprep.subr.bf16.mxu0 %v7807_v30  ;;  %2966 = vmatprep.subr.bf16.mxu1 %v7808_v55  ;;  %v7818_v30 = vld [vmem:[#allocation69_spill] sm:$0xff]  ;;  %v7819_v55 = vld [vmem:[#allocation70_spill] sm:$0xff] }
 0x4e7   :  { %2926 = vmatpush2.bf16.msra.mxu0 %v7809_v50  ;;  %2967 = vmatpush2.bf16.msra.mxu1 %v7810_v9  ;;  %v7820_v50 = vld [vmem:[#allocation71_spill] sm:$0xff]  ;;  %v7821_v9 = vld [vmem:[#allocation72_spill] sm:$0xff] }
 0x4e8   :  { %2927 = vmatprep.subr.bf16.mxu0 %v7811_v10  ;;  %2968 = vmatprep.subr.bf16.mxu1 %v7812_v0  ;;  %v7822_v10 = vld [vmem:[#allocation73_spill] sm:$0xff]  ;;  %v7823_v0 = vld [vmem:[#allocation74_spill] sm:$0xff] }
 0x4eb   :  { %2928 = vmatpush2.bf16.msra.mxu0 %v7813_v33  ;;  %2969 = vmatpush2.bf16.msra.mxu1 %v7814_v4  ;;  %v7824_v33 = vld [vmem:[#allocation75_spill] sm:$0xff]  ;;  %v7825_v4 = vld [vmem:[#allocation76_spill] sm:$0xff] }
 0x4ec   :  { %2929 = vmatprep.subr.bf16.mxu0 %v7815_v11  ;;  %2970 = vmatprep.subr.bf16.mxu1 %v7816_v28  ;;  %v7826_v11 = vld [vmem:[#allocation77_spill] sm:$0xff]  ;;  %v7827_v28 = vld [vmem:[#allocation78_spill] sm:$0xff] }
 0x4ef   :  { %2930 = vmatpush2.bf16.msra.mxu0 %v7817_v58  ;;  %2971 = vmatpush2.bf16.msra.mxu1 %v7818_v30  ;;  %v7828_v58 = vld [vmem:[#allocation79_spill] sm:$0xff]  ;;  %v7829_v30 = vld [vmem:[#allocation80_spill] sm:$0xff] }
 0x4f0   :  { %2931 = vmatprep.subr.bf16.mxu0 %v7819_v55  ;;  %2972 = vmatprep.subr.bf16.mxu1 %v7820_v50  ;;  %v7830_v55 = vld [vmem:[#allocation81_spill] sm:$0xff]  ;;  %v7831_v50 = vld [vmem:[#allocation82_spill] sm:$0xff] }
 0x4f3   :  { %2932 = vmatpush2.bf16.msra.mxu0 %v7821_v9  ;;  %2973 = vmatpush2.bf16.msra.mxu1 %v7822_v10  ;;  %v7832_v9 = vld [vmem:[#allocation83_spill] sm:$0xff]  ;;  %v7833_v10 = vld [vmem:[#allocation84_spill] sm:$0xff] }
 0x4f4   :  { %2933 = vmatprep.subr.bf16.mxu0 %v7823_v0  ;;  %2974 = vmatprep.subr.bf16.mxu1 %v7824_v33  ;;  %v7834_v0 = vld [vmem:[#allocation85_spill] sm:$0xff]  ;;  %v7835_v33 = vld [vmem:[#allocation86_spill] sm:$0xff] }
 0x4f7   :  { %2934 = vmatpush2.bf16.msra.mxu0 %v7825_v4  ;;  %2975 = vmatpush2.bf16.msra.mxu1 %v7826_v11  ;;  %v7836_v4 = vld [vmem:[#allocation87_spill] sm:$0xff]  ;;  %v7837_v11 = vld [vmem:[#allocation154_spill] sm:$0xff] }
 0x4f8   :  { %2935 = vmatprep.subr.bf16.mxu0 %v7827_v28  ;;  %2976 = vmatprep.subr.bf16.mxu1 %v7828_v58  ;;  %v2832_v28 = vunpack.c.l.bf16 %v7837_v11  ;;  %v2834_v58 = vunpack.c.l.bf16 %v7838_v21 }
 0x4fb   :  { %2936 = vmatpush2.bf16.msra.mxu0 %v7829_v30  ;;  %2977 = vmatpush2.bf16.msra.mxu1 %v7830_v55 }
 0x4fc   :  { %2937 = vmatprep.subr.bf16.mxu0 %v7831_v50  ;;  %2978 = vmatprep.subr.bf16.mxu1 %v7832_v9  ;;  %v2833_v50 = vunpack.c.h.bf16 %v7837_v11  ;;  %v2835_v9 = vunpack.c.h.bf16 %v7838_v21 }
 0x4ff   :  { %2938 = vmatpush2.bf16.msra.mxu0 %v7833_v10  ;;  %2979 = vmatpush2.bf16.msra.mxu1 %v7834_v0 }
 0x500   :  { %2989 = vmatprep.subr.bf16.mxu0 %v7835_v33  ;;  %3030 = vmatprep.subr.bf16.mxu1 %v7836_v4 }
 0x542   :  { %v2697_v24 = vpop.f32.mrf.mxu0  ;;  %v2738_v30 = vpop.f32.mrf.mxu1 }
 0x543   :  { %v2836_v18 = vadd.f32 %v2832_v28, %v2697_v24  ;;  %v2838_v55 = vadd.f32 %v2834_v58, %v2738_v30 }
 0x544   :  { %v2699_v57 = vpop.f32.mrf.mxu0  ;;  %v2740_v10 = vpop.f32.mrf.mxu1 }
 0x545   :  { %v4518_v23 = vmul.f32 -1.442695, %v2836_v18  ;;  %v2837_v0 = vadd.f32 %v2833_v50, %v2699_v57  ;;  %v2839_v6 = vadd.f32 %v2835_v9, %v2740_v10  ;;  %v4520_v22 = vmul.f32 -1.442695, %v2838_v55  ;;  %v7839_v10 = vld [vmem:[#allocation88_spill] sm:$0xff] }
 0x546   :  { %v2701_v33 = vpop.f32.mrf.mxu0  ;;  %v2742_v60 = vpop.f32.mrf.mxu1 }
 0x547   :  { %4904 = vpow2.f32 %v4518_v23  ;;  %v4519_v4 = vmul.f32 -1.442695, %v2837_v0  ;;  %v7841_v33 = vld [vmem:[#allocation172_spill] sm:$0xff] }
 0x548   :  { %v2702_v42 = vpop.f32.mrf.mxu0  ;;  %v2743_v31 = vpop.f32.mrf.mxu1  ;;  %v2846_v28 = vunpack.c.h.bf16 %v7841_v33 }
 0x549   :  { %4906 = vpow2.f32 %v4519_v4  ;;  %v2845_v4 = vunpack.c.l.bf16 %v7841_v33 }
 0x54a   :  { %4908 = vpow2.f32 %v4520_v22 }
 0x54b   :  { %4910 = vtanh.f32 %v2839_v6 }
 0x554   :  { %v4905_v38 = vpop.eup %4904 }
 0x555   :  { %v2862_v24 = vadd.f32 1.0, %v4905_v38 }
 0x556   :  { %v4907_v58 = vpop.eup %4906 }
 0x557   :  { %4912 = vrcp.f32 %v2862_v24  ;;  %v2863_v21 = vadd.f32 1.0, %v4907_v58  ;;  %v4909_v11 = vpop.eup %4908 }
 0x558   :  { %v4911_v18 = vpop.eup %4910  ;;  %v2864_v60 = vadd.f32 1.0, %v4909_v11 }
 0x559   :  { %4914 = vrcp.f32 %v2863_v21 }
 0x55a   :  { %4916 = vrcp.f32 %v2864_v60 }
 0x564   :  { %v4913_v57 = vpop.eup %4912 }
 0x565   :  { %v2873_v50 = vmul.f32 %v4913_v57, %v4911_v18 }
 0x566   :  { %v4915_v9 = vpop.eup %4914 }
 0x567   :  { %v2872_v23 = vmul.f32 %v4915_v9, %v6263_v3  ;;  %v4917_v38 = vpop.eup %4916 }
 0x569   :  { %v6429_v42 = vadd.f32 %v2873_v50, %v2872_v23  ;;  %v7842_v23 = vld [vmem:[#allocation173_spill] sm:$0xff] }
 0x56b   :  { %4918 = vtanh.f32 %v6429_v42 }
 0x578   :  { %v4919_v22 = vpop.eup %4918 }
 0x579   :  { %v6432_v31 = vmul.f32 %v4919_v22, %v4917_v38  ;;  %v2847_v38 = vunpack.c.l.bf16 %v7842_v23 }
 0x57b   :  { %v6438_v0 = vadd.f32 %v6432_v31, %v7839_v10  ;;  %v2848_v10 = vunpack.c.h.bf16 %v7842_v23 }
 0x57d   :  { %7840 = vst [vmem:[#allocation89_spill] sm:$0xff] %v6438_v0 }
 0x582   :  { %v2779_v30 = vpop.f32.mrf.mxu0  ;;  %v2820_v3 = vpop.f32.mrf.mxu1 }
 0x583   :  { %v2849_v55 = vadd.f32 %v2845_v4, %v2779_v30  ;;  %v2851_v22 = vadd.f32 %v2847_v38, %v2820_v3  ;;  %v7844_v38 = vld [vmem:[#allocation126_spill] sm:$0xff] }
 0x584   :  { %v2781_v24 = vpop.f32.mrf.mxu0  ;;  %v2822_v58 = vpop.f32.mrf.mxu1 }
 0x585   :  { %v4521_v21 = vmul.f32 -1.442695, %v2849_v55  ;;  %v2850_v11 = vadd.f32 %v2846_v28, %v2781_v24  ;;  %v4523_v6 = vmul.f32 -1.442695, %v2851_v22  ;;  %v2852_v4 = vadd.f32 %v2848_v10, %v2822_v58  ;;  %v7845_v22 = vld [vmem:[#allocation127_spill] sm:$0xff]  ;;  %v7846_v10 = vld [vmem:[#allocation128_spill] sm:$0xff] }
 0x586   :  { %v2783_v18 = vpop.f32.mrf.mxu0  ;;  %v2824_v57 = vpop.f32.mrf.mxu1 }
 0x587   :  { %4920 = vpow2.f32 %v4521_v21  ;;  %v4522_v50 = vmul.f32 -1.442695, %v2850_v11 }
 0x588   :  { %v2784_v9 = vpop.f32.mrf.mxu0  ;;  %v2825_v60 = vpop.f32.mrf.mxu1 }
 0x589   :  { %4922 = vpow2.f32 %v4522_v50  ;;  %v7861_v60 = vld [vmem:[#allocation143_spill] sm:$0xff] }
 0x58a   :  { %4924 = vpow2.f32 %v4523_v6 }
 0x58b   :  { %4926 = vtanh.f32 %v2852_v4  ;;  %v7847_v4 = vld [vmem:[#allocation129_spill] sm:$0xff] }
 0x594   :  { %v4921_v30 = vpop.eup %4920 }
 0x595   :  { %v2886_v33 = vadd.f32 1.0, %v4921_v30  ;;  %v7848_v30 = vld [vmem:[#allocation130_spill] sm:$0xff] }
 0x596   :  { %v4923_v0 = vpop.eup %4922 }
 0x597   :  { %4928 = vrcp.f32 %v2886_v33  ;;  %v2887_v55 = vadd.f32 1.0, %v4923_v0  ;;  %v4925_v28 = vpop.eup %4924  ;;  %v7849_v33 = vld [vmem:[#allocation131_spill] sm:$0xff] }
 0x598   :  { %v4927_v24 = vpop.eup %4926  ;;  %v2888_v57 = vadd.f32 1.0, %v4925_v28  ;;  %v7851_v28 = vld [vmem:[#allocation133_spill] sm:$0xff] }
 0x599   :  { %4930 = vrcp.f32 %v2887_v55  ;;  %v7850_v55 = vld [vmem:[#allocation132_spill] sm:$0xff] }
 0x59a   :  { %4932 = vrcp.f32 %v2888_v57  ;;  %v7856_v57 = vld [vmem:[#allocation138_spill] sm:$0xff] }
 0x5a4   :  { %v4929_v21 = vpop.eup %4928 }
 0x5a5   :  { %v2897_v11 = vmul.f32 %v4929_v21, %v4927_v24  ;;  %v7852_v24 = vld [vmem:[#allocation134_spill] sm:$0xff]  ;;  %v7853_v21 = vld [vmem:[#allocation135_spill] sm:$0xff] }
 0x5a6   :  { %v4931_v18 = vpop.eup %4930 }
 0x5a7   :  { %v2896_v3 = vmul.f32 %v4931_v18, %v6279_v61  ;;  %v4933_v58 = vpop.eup %4932  ;;  %v6460_v61 = vpack.c.bf16 %v6432_v31, %v6432_v31  ;;  %v7855_v18 = vld [vmem:[#allocation137_spill] sm:$0xff] }
 0x5a9   :  { %v6445_v50 = vadd.f32 %v2897_v11, %v2896_v3  ;;  %v7854_v11 = vld [vmem:[#allocation136_spill] sm:$0xff]  ;;  %v7857_v3 = vld [vmem:[#allocation139_spill] sm:$0xff] }
 0x5ab   :  { %4934 = vtanh.f32 %v6445_v50 }
 0x5b8   :  { %v4935_v6 = vpop.eup %4934 }
 0x5b9   :  { %v6448_v9 = vmul.f32 %v4935_v6, %v4933_v58  ;;  %v7858_v58 = vld [vmem:[#allocation140_spill] sm:$0xff]  ;;  %v7859_v6 = vld [vmem:[#allocation141_spill] sm:$0xff] }
 0x5bb   :  { %v2906_v0 = vpack.c.bf16 %v6448_v9, %v6448_v9  ;;  %v6456_v23 = vadd.f32 %v6448_v9, %v6288_v56  ;;  %v7843_v56 = vld [vmem:[#allocation125_spill] sm:$0xff] }
 0x5bd   :  { %2939 = vmatprep.mubr.bf16.mxu0 %v2906_v0  ;;  %2980 = vmatprep.mubr.bf16.mxu1 %v2906_v0 }
 0x5be   :  { %2940 = vmatmul.mubr.bf16.vlgmr.msra.gmra.mxu0 %v6460_v61  ;;  %2981 = vmatmul.mubr.bf16.vlgmr.msra.gmra.mxu1 %v6460_v61 }
 0x5bf   :  { %2990 = vmatpush1.bf16.msra.mxu0 %v7557_v15  ;;  %3031 = vmatpush1.bf16.msra.mxu1 %v7558_v46 }
 0x5c0   :  { %3021 = vmatprep.mubr.bf16.mxu0 %v2906_v0  ;;  %3062 = vmatprep.mubr.bf16.mxu1 %v2906_v0  ;;  %v7860_v0 = vld [vmem:[#allocation142_spill] sm:$0xff] }
 0x5c1   :  { %2991 = vmatprep.subr.bf16.mxu0 %v7559_v13  ;;  %3032 = vmatprep.subr.bf16.mxu1 %v7560_v62 }
 0x5c3   :  { %2992 = vmatpush1.bf16.msra.mxu0 %v7561_v40  ;;  %3033 = vmatpush1.bf16.msra.mxu1 %v7562_v49 }
 0x5c4   :  { %2993 = vmatprep.subr.bf16.mxu0 %v7563_v48  ;;  %3034 = vmatprep.subr.bf16.mxu1 %v7564_v39 }
 0x5c7   :  { %2994 = vmatpush1.bf16.msra.mxu0 %v7565_v14  ;;  %3035 = vmatpush1.bf16.msra.mxu1 %v7566_v63 }
 0x5c8   :  { %2995 = vmatprep.subr.bf16.mxu0 %v7567_v12  ;;  %3036 = vmatprep.subr.bf16.mxu1 %v7568_v7 }
 0x5cb   :  { %2996 = vmatpush1.bf16.msra.mxu0 %v7569_v47  ;;  %3037 = vmatpush1.bf16.msra.mxu1 %v7652_v34 }
 0x5cc   :  { %2997 = vmatprep.subr.bf16.mxu0 %v7653_v27  ;;  %3038 = vmatprep.subr.bf16.mxu1 %v7654_v26 }
 0x5cf   :  { %2998 = vmatpush1.bf16.msra.mxu0 %v7655_v45  ;;  %3039 = vmatpush1.bf16.msra.mxu1 %v7656_v20 }
 0x5d0   :  { %2999 = vmatprep.subr.bf16.mxu0 %v7657_v51  ;;  %3040 = vmatprep.subr.bf16.mxu1 %v7658_v19 }
 0x5d3   :  { %3000 = vmatpush1.bf16.msra.mxu0 %v7659_v52  ;;  %3041 = vmatpush1.bf16.msra.mxu1 %v7747_v36 }
 0x5d4   :  { %3001 = vmatprep.subr.bf16.mxu0 %v7748_v8  ;;  %3042 = vmatprep.subr.bf16.mxu1 %v7749_v41 }
 0x5d7   :  { %3002 = vmatpush1.bf16.msra.mxu0 %v7750_v44  ;;  %3043 = vmatpush1.bf16.msra.mxu1 %v7751_v32 }
 0x5d8   :  { %3003 = vmatprep.subr.bf16.mxu0 %v7665_v37  ;;  %3044 = vmatprep.subr.bf16.mxu1 %v7666_v59 }
 0x5db   :  { %3004 = vmatpush1.bf16.msra.mxu0 %v7667_v16  ;;  %3045 = vmatpush1.bf16.msra.mxu1 %v7752_v29 }
 0x5dc   :  { %3005 = vmatprep.subr.bf16.mxu0 %v7753_v17  ;;  %3046 = vmatprep.subr.bf16.mxu1 %v7670_v35 }
 0x5df   :  { %3006 = vmatpush2.bf16.msra.mxu0 %v7671_v53  ;;  %3047 = vmatpush2.bf16.msra.mxu1 %v7672_v54 }
 0x5e0   :  { %3007 = vmatprep.subr.bf16.mxu0 %v7673_v25  ;;  %3048 = vmatprep.subr.bf16.mxu1 %v7674_v43 }
 0x5e3   :  { %3008 = vmatpush2.bf16.msra.mxu0 %v7675_v1  ;;  %3049 = vmatpush2.bf16.msra.mxu1 %v7843_v56 }
 0x5e4   :  { %3009 = vmatprep.subr.bf16.mxu0 %v7844_v38  ;;  %3050 = vmatprep.subr.bf16.mxu1 %v7845_v22 }
 0x5e7   :  { %3010 = vmatpush2.bf16.msra.mxu0 %v7846_v10  ;;  %3051 = vmatpush2.bf16.msra.mxu1 %v7847_v4 }
 0x5e8   :  { %3011 = vmatprep.subr.bf16.mxu0 %v7848_v30  ;;  %3052 = vmatprep.subr.bf16.mxu1 %v7849_v33 }
 0x5eb   :  { %3012 = vmatpush2.bf16.msra.mxu0 %v7850_v55  ;;  %3053 = vmatpush2.bf16.msra.mxu1 %v7851_v28  ;;  %v7862_v28 = vld [vmem:[#allocation144_spill] sm:$0xff] }
 0x5ec   :  { %3013 = vmatprep.subr.bf16.mxu0 %v7852_v24  ;;  %3054 = vmatprep.subr.bf16.mxu1 %v7853_v21  ;;  %v7863_v24 = vld [vmem:[#allocation145_spill] sm:$0xff]  ;;  %v7864_v21 = vld [vmem:[#allocation146_spill] sm:$0xff] }
 0x5ef   :  { %3014 = vmatpush2.bf16.msra.mxu0 %v7854_v11  ;;  %3055 = vmatpush2.bf16.msra.mxu1 %v7855_v18  ;;  %v7865_v11 = vld [vmem:[#allocation147_spill] sm:$0xff]  ;;  %v7866_v18 = vld [vmem:[#allocation148_spill] sm:$0xff] }
 0x5f0   :  { %3015 = vmatprep.subr.bf16.mxu0 %v7856_v57  ;;  %3056 = vmatprep.subr.bf16.mxu1 %v7857_v3  ;;  %v7867_v57 = vld [vmem:[#allocation149_spill] sm:$0xff]  ;;  %v7868_v3 = vld [vmem:[#allocation22_spill] sm:$0xff] }
 0x5f3   :  { %3016 = vmatpush2.bf16.msra.mxu0 %v7858_v58  ;;  %3057 = vmatpush2.bf16.msra.mxu1 %v7859_v6  ;;  %v7869_v58 = vld [vmem:[#allocation23_spill] sm:$0xff]  ;;  %v7935_v6 = vld [vmem:[#allocation157_spill] sm:$0xff] }
 0x5f4   :  { %3017 = vmatprep.subr.bf16.mxu0 %v7860_v0  ;;  %3058 = vmatprep.subr.bf16.mxu1 %v7861_v60  ;;  %v7870_v60 = vld [vmem:[#allocation24_spill] sm:$0xff]  ;;  %v7879_v0 = vld [vmem:[#allocation33_spill] sm:$0xff] }
 0x5f7   :  { %3018 = vmatpush2.bf16.msra.mxu0 %v7862_v28  ;;  %3059 = vmatpush2.bf16.msra.mxu1 %v7863_v24  ;;  %v7871_v28 = vld [vmem:[#allocation25_spill] sm:$0xff]  ;;  %v7872_v24 = vld [vmem:[#allocation26_spill] sm:$0xff] }
 0x5f8   :  { %3019 = vmatprep.subr.bf16.mxu0 %v7864_v21  ;;  %3060 = vmatprep.subr.bf16.mxu1 %v7865_v11  ;;  %v7873_v21 = vld [vmem:[#allocation27_spill] sm:$0xff]  ;;  %v7874_v11 = vld [vmem:[#allocation28_spill] sm:$0xff] }
 0x5fb   :  { %3020 = vmatpush2.bf16.msra.mxu0 %v7866_v18  ;;  %3061 = vmatpush2.bf16.msra.mxu1 %v7867_v57  ;;  %v7875_v18 = vld [vmem:[#allocation29_spill] sm:$0xff]  ;;  %v7876_v57 = vld [vmem:[#allocation30_spill] sm:$0xff] }
 0x5fc   :  { %3149 = vmatprep.subr.bf16.mxu0 %v7868_v3  ;;  %3190 = vmatprep.subr.bf16.mxu1 %v7869_v58  ;;  %v7877_v3 = vld [vmem:[#allocation31_spill] sm:$0xff]  ;;  %v7878_v58 = vld [vmem:[#allocation32_spill] sm:$0xff] }
 0x5fe   :  { %3022 = vmatmul.mubr.bf16.vlgmr.msra.gmra.mxu0 %v6460_v61  ;;  %3063 = vmatmul.mubr.bf16.vlgmr.msra.gmra.mxu1 %v6460_v61  ;;  %v7880_v61 = vld [vmem:[#allocation34_spill] sm:$0xff] }
 0x5ff   :  { %3150 = vmatpush1.bf16.msra.mxu0 %v7870_v60  ;;  %3191 = vmatpush1.bf16.msra.mxu1 %v7871_v28  ;;  %v7881_v60 = vld [vmem:[#allocation35_spill] sm:$0xff]  ;;  %v7882_v28 = vld [vmem:[#allocation36_spill] sm:$0xff] }
 0x600   :  { %3151 = vmatprep.subr.bf16.mxu0 %v7872_v24  ;;  %3192 = vmatprep.subr.bf16.mxu1 %v7873_v21  ;;  %v7883_v24 = vld [vmem:[#allocation37_spill] sm:$0xff]  ;;  %v7884_v21 = vld [vmem:[#allocation38_spill] sm:$0xff] }
 0x603   :  { %3152 = vmatpush1.bf16.msra.mxu0 %v7874_v11  ;;  %3193 = vmatpush1.bf16.msra.mxu1 %v7875_v18  ;;  %v7885_v11 = vld [vmem:[#allocation39_spill] sm:$0xff]  ;;  %v7886_v18 = vld [vmem:[#allocation40_spill] sm:$0xff] }
 0x604   :  { %3153 = vmatprep.subr.bf16.mxu0 %v7876_v57  ;;  %3194 = vmatprep.subr.bf16.mxu1 %v7877_v3  ;;  %v7887_v57 = vld [vmem:[#allocation41_spill] sm:$0xff]  ;;  %v7888_v3 = vld [vmem:[#allocation42_spill] sm:$0xff] }
 0x607   :  { %3154 = vmatpush1.bf16.msra.mxu0 %v7878_v58  ;;  %3195 = vmatpush1.bf16.msra.mxu1 %v7879_v0  ;;  %v7889_v58 = vld [vmem:[#allocation43_spill] sm:$0xff]  ;;  %v7890_v0 = vld [vmem:[#allocation44_spill] sm:$0xff] }
 0x608   :  { %3155 = vmatprep.subr.bf16.mxu0 %v7880_v61  ;;  %3196 = vmatprep.subr.bf16.mxu1 %v7881_v60  ;;  %v7891_v61 = vld [vmem:[#allocation45_spill] sm:$0xff]  ;;  %v7892_v60 = vld [vmem:[#allocation46_spill] sm:$0xff] }
 0x60b   :  { %3156 = vmatpush1.bf16.msra.mxu0 %v7882_v28  ;;  %3197 = vmatpush1.bf16.msra.mxu1 %v7883_v24  ;;  %v7893_v28 = vld [vmem:[#allocation47_spill] sm:$0xff]  ;;  %v7894_v24 = vld [vmem:[#allocation48_spill] sm:$0xff] }
 0x60c   :  { %3157 = vmatprep.subr.bf16.mxu0 %v7884_v21  ;;  %3198 = vmatprep.subr.bf16.mxu1 %v7885_v11  ;;  %v7895_v21 = vld [vmem:[#allocation49_spill] sm:$0xff]  ;;  %v7896_v11 = vld [vmem:[#allocation50_spill] sm:$0xff] }
 0x60f   :  { %3158 = vmatpush1.bf16.msra.mxu0 %v7886_v18  ;;  %3199 = vmatpush1.bf16.msra.mxu1 %v7887_v57  ;;  %v7897_v18 = vld [vmem:[#allocation51_spill] sm:$0xff]  ;;  %v7898_v57 = vld [vmem:[#allocation52_spill] sm:$0xff] }
 0x610   :  { %3159 = vmatprep.subr.bf16.mxu0 %v7888_v3  ;;  %3200 = vmatprep.subr.bf16.mxu1 %v7889_v58  ;;  %v7899_v3 = vld [vmem:[#allocation53_spill] sm:$0xff]  ;;  %v7900_v58 = vld [vmem:[#allocation54_spill] sm:$0xff] }
 0x613   :  { %3160 = vmatpush1.bf16.msra.mxu0 %v7890_v0  ;;  %3201 = vmatpush1.bf16.msra.mxu1 %v7891_v61  ;;  %v7901_v0 = vld [vmem:[#allocation55_spill] sm:$0xff]  ;;  %v7902_v61 = vld [vmem:[#allocation56_spill] sm:$0xff] }
 0x614   :  { %3161 = vmatprep.subr.bf16.mxu0 %v7892_v60  ;;  %3202 = vmatprep.subr.bf16.mxu1 %v7893_v28  ;;  %v7903_v60 = vld [vmem:[#allocation57_spill] sm:$0xff]  ;;  %v7904_v28 = vld [vmem:[#allocation58_spill] sm:$0xff] }
 0x617   :  { %3162 = vmatpush1.bf16.msra.mxu0 %v7894_v24  ;;  %3203 = vmatpush1.bf16.msra.mxu1 %v7895_v21  ;;  %v7905_v24 = vld [vmem:[#allocation59_spill] sm:$0xff]  ;;  %v7906_v21 = vld [vmem:[#allocation60_spill] sm:$0xff] }
 0x618   :  { %3163 = vmatprep.subr.bf16.mxu0 %v7896_v11  ;;  %3204 = vmatprep.subr.bf16.mxu1 %v7897_v18  ;;  %v7907_v11 = vld [vmem:[#allocation61_spill] sm:$0xff]  ;;  %v7908_v18 = vld [vmem:[#allocation62_spill] sm:$0xff] }
 0x61b   :  { %3164 = vmatpush1.bf16.msra.mxu0 %v7898_v57  ;;  %3205 = vmatpush1.bf16.msra.mxu1 %v7899_v3  ;;  %v7909_v57 = vld [vmem:[#allocation63_spill] sm:$0xff]  ;;  %v7910_v3 = vld [vmem:[#allocation64_spill] sm:$0xff] }
 0x61c   :  { %3165 = vmatprep.subr.bf16.mxu0 %v7900_v58  ;;  %3206 = vmatprep.subr.bf16.mxu1 %v7901_v0  ;;  %v7911_v58 = vld [vmem:[#allocation65_spill] sm:$0xff]  ;;  %v7912_v0 = vld [vmem:[#allocation66_spill] sm:$0xff] }
 0x61f   :  { %3166 = vmatpush2.bf16.msra.mxu0 %v7902_v61  ;;  %3207 = vmatpush2.bf16.msra.mxu1 %v7903_v60  ;;  %v7913_v61 = vld [vmem:[#allocation67_spill] sm:$0xff]  ;;  %v7914_v60 = vld [vmem:[#allocation68_spill] sm:$0xff] }
 0x620   :  { %3167 = vmatprep.subr.bf16.mxu0 %v7904_v28  ;;  %3208 = vmatprep.subr.bf16.mxu1 %v7905_v24  ;;  %v7915_v28 = vld [vmem:[#allocation69_spill] sm:$0xff]  ;;  %v7916_v24 = vld [vmem:[#allocation70_spill] sm:$0xff] }
 0x623   :  { %3168 = vmatpush2.bf16.msra.mxu0 %v7906_v21  ;;  %3209 = vmatpush2.bf16.msra.mxu1 %v7907_v11  ;;  %v7917_v21 = vld [vmem:[#allocation71_spill] sm:$0xff]  ;;  %v7918_v11 = vld [vmem:[#allocation72_spill] sm:$0xff] }
 0x624   :  { %3169 = vmatprep.subr.bf16.mxu0 %v7908_v18  ;;  %3210 = vmatprep.subr.bf16.mxu1 %v7909_v57  ;;  %v7919_v18 = vld [vmem:[#allocation73_spill] sm:$0xff]  ;;  %v7920_v57 = vld [vmem:[#allocation74_spill] sm:$0xff] }
 0x627   :  { %3170 = vmatpush2.bf16.msra.mxu0 %v7910_v3  ;;  %3211 = vmatpush2.bf16.msra.mxu1 %v7911_v58  ;;  %v7921_v3 = vld [vmem:[#allocation75_spill] sm:$0xff]  ;;  %v7922_v58 = vld [vmem:[#allocation76_spill] sm:$0xff] }
 0x628   :  { %3171 = vmatprep.subr.bf16.mxu0 %v7912_v0  ;;  %3212 = vmatprep.subr.bf16.mxu1 %v7913_v61  ;;  %v7923_v0 = vld [vmem:[#allocation77_spill] sm:$0xff]  ;;  %v7924_v61 = vld [vmem:[#allocation78_spill] sm:$0xff] }
 0x62b   :  { %3172 = vmatpush2.bf16.msra.mxu0 %v7914_v60  ;;  %3213 = vmatpush2.bf16.msra.mxu1 %v7915_v28  ;;  %v7925_v60 = vld [vmem:[#allocation79_spill] sm:$0xff]  ;;  %v7926_v28 = vld [vmem:[#allocation80_spill] sm:$0xff] }
 0x62c   :  { %3173 = vmatprep.subr.bf16.mxu0 %v7916_v24  ;;  %3214 = vmatprep.subr.bf16.mxu1 %v7917_v21  ;;  %v7927_v24 = vld [vmem:[#allocation81_spill] sm:$0xff]  ;;  %v7928_v21 = vld [vmem:[#allocation82_spill] sm:$0xff] }
 0x62f   :  { %3174 = vmatpush2.bf16.msra.mxu0 %v7918_v11  ;;  %3215 = vmatpush2.bf16.msra.mxu1 %v7919_v18  ;;  %v7929_v11 = vld [vmem:[#allocation83_spill] sm:$0xff]  ;;  %v7930_v18 = vld [vmem:[#allocation84_spill] sm:$0xff] }
 0x630   :  { %3175 = vmatprep.subr.bf16.mxu0 %v7920_v57  ;;  %3216 = vmatprep.subr.bf16.mxu1 %v7921_v3  ;;  %v7931_v57 = vld [vmem:[#allocation85_spill] sm:$0xff]  ;;  %v7932_v3 = vld [vmem:[#allocation86_spill] sm:$0xff] }
 0x633   :  { %3176 = vmatpush2.bf16.msra.mxu0 %v7922_v58  ;;  %3217 = vmatpush2.bf16.msra.mxu1 %v7923_v0  ;;  %v7933_v58 = vld [vmem:[#allocation87_spill] sm:$0xff]  ;;  %v7934_v0 = vld [vmem:[#allocation156_spill] sm:$0xff] }
 0x634   :  { %3177 = vmatprep.subr.bf16.mxu0 %v7924_v61  ;;  %3218 = vmatprep.subr.bf16.mxu1 %v7925_v60  ;;  %v3075_v61 = vunpack.c.l.bf16 %v7934_v0  ;;  %v3077_v60 = vunpack.c.l.bf16 %v7935_v6 }
 0x637   :  { %3178 = vmatpush2.bf16.msra.mxu0 %v7926_v28  ;;  %3219 = vmatpush2.bf16.msra.mxu1 %v7927_v24 }
 0x638   :  { %3179 = vmatprep.subr.bf16.mxu0 %v7928_v21  ;;  %3220 = vmatprep.subr.bf16.mxu1 %v7929_v11  ;;  %v3076_v21 = vunpack.c.h.bf16 %v7934_v0  ;;  %v3078_v11 = vunpack.c.h.bf16 %v7935_v6 }
 0x63b   :  { %3180 = vmatpush2.bf16.msra.mxu0 %v7930_v18  ;;  %3221 = vmatpush2.bf16.msra.mxu1 %v7931_v57 }
 0x63c   :  { %3231 = vmatprep.subr.bf16.mxu0 %v7932_v3  ;;  %3272 = vmatprep.subr.bf16.mxu1 %v7933_v58 }
 0x67e   :  { %v2941_v55 = vpop.f32.mrf.mxu0  ;;  %v2982_v28 = vpop.f32.mrf.mxu1 }
 0x67f   :  { %v3079_v33 = vadd.f32 %v3075_v61, %v2941_v55  ;;  %v3081_v24 = vadd.f32 %v3077_v60, %v2982_v28 }
 0x680   :  { %v2943_v30 = vpop.f32.mrf.mxu0  ;;  %v2984_v18 = vpop.f32.mrf.mxu1 }
 0x681   :  { %v4524_v4 = vmul.f32 -1.442695, %v3079_v33  ;;  %v3080_v57 = vadd.f32 %v3076_v21, %v2943_v30  ;;  %v3082_v10 = vadd.f32 %v3078_v11, %v2984_v18  ;;  %v4526_v1 = vmul.f32 -1.442695, %v3081_v24  ;;  %v7937_v18 = vld [vmem:[#allocation89_spill] sm:$0xff] }
 0x682   :  { %v2945_v3 = vpop.f32.mrf.mxu0  ;;  %v2986_v22 = vpop.f32.mrf.mxu1 }
 0x683   :  { %4936 = vpow2.f32 %v4524_v4  ;;  %v4525_v58 = vmul.f32 -1.442695, %v3080_v57  ;;  %v7938_v3 = vld [vmem:[#allocation170_spill] sm:$0xff] }
 0x684   :  { %v2946_v38 = vpop.f32.mrf.mxu0  ;;  %v2987_v56 = vpop.f32.mrf.mxu1 }
 0x685   :  { %4938 = vpow2.f32 %v4525_v58  ;;  %v3087_v58 = vunpack.c.l.bf16 %v7938_v3 }
 0x686   :  { %4940 = vpow2.f32 %v4526_v1 }
 0x687   :  { %4942 = vtanh.f32 %v3082_v10  ;;  %v7936_v10 = vmax.f32 %v6272_v5, %v6432_v31 }
 0x690   :  { %v4937_v43 = vpop.eup %4936 }
 0x691   :  { %v3104_v55 = vadd.f32 1.0, %v4937_v43 }
 0x692   :  { %v4939_v60 = vpop.eup %4938 }
 0x693   :  { %4944 = vrcp.f32 %v3104_v55  ;;  %v3105_v28 = vadd.f32 1.0, %v4939_v60  ;;  %v4941_v6 = vpop.eup %4940  ;;  %v3088_v55 = vunpack.c.h.bf16 %v7938_v3 }
 0x694   :  { %v4943_v33 = vpop.eup %4942  ;;  %v3106_v22 = vadd.f32 1.0, %v4941_v6 }
 0x695   :  { %4946 = vrcp.f32 %v3105_v28 }
 0x696   :  { %4948 = vrcp.f32 %v3106_v22  ;;  %v7939_v22 = vld [vmem:[#allocation171_spill] sm:$0xff] }
 0x6a0   :  { %v4945_v30 = vpop.eup %4944 }
 0x6a1   :  { %v3115_v21 = vmul.f32 %v4945_v30, %v4943_v33 }
 0x6a2   :  { %v4947_v11 = vpop.eup %4946 }
 0x6a3   :  { %v3114_v4 = vmul.f32 %v4947_v11, %v6429_v42  ;;  %v4949_v43 = vpop.eup %4948 }
 0x6a5   :  { %v6599_v38 = vadd.f32 %v3115_v21, %v3114_v4  ;;  %v3089_v4 = vunpack.c.l.bf16 %v7939_v22 }
 0x6a7   :  { %4950 = vtanh.f32 %v6599_v38 }
 0x6b4   :  { %v4951_v1 = vpop.eup %4950 }
 0x6b5   :  { %v3118_v56 = vmul.f32 %v4951_v1, %v4949_v43  ;;  %v3090_v1 = vunpack.c.h.bf16 %v7939_v22 }
 0x6b7   :  { %v6605_v24 = vmax.f32 %v7936_v10, %v3118_v56  ;;  %v6608_v57 = vadd.f32 %v3118_v56, %v7937_v18 }
 0x6be   :  { %v3023_v0 = vpop.f32.mrf.mxu0  ;;  %v3064_v42 = vpop.f32.mrf.mxu1 }
 0x6bf   :  { %v3091_v61 = vadd.f32 %v3087_v58, %v3023_v0  ;;  %v3093_v43 = vadd.f32 %v3089_v4, %v3064_v42  ;;  %v7940_v4 = vmax.f32 %v6286_v2, %v6448_v9  ;;  %v7941_v2 = vld [vmem:[#allocation123_spill] sm:$0xff]  ;;  %v7943_v9 = vld [vmem:[#allocation125_spill] sm:$0xff] }
 0x6c0   :  { %v3025_v60 = vpop.f32.mrf.mxu0  ;;  %v3066_v28 = vpop.f32.mrf.mxu1 }
 0x6c1   :  { %v4527_v6 = vmul.f32 -1.442695, %v3091_v61  ;;  %v3092_v33 = vadd.f32 %v3088_v55, %v3025_v60  ;;  %v4529_v10 = vmul.f32 -1.442695, %v3093_v43  ;;  %v3094_v18 = vadd.f32 %v3090_v1, %v3066_v28 }
 0x6c2   :  { %v3027_v30 = vpop.f32.mrf.mxu0  ;;  %v3068_v21 = vpop.f32.mrf.mxu1 }
 0x6c3   :  { %4952 = vpow2.f32 %v4527_v6  ;;  %v4528_v5 = vmul.f32 -1.442695, %v3092_v33 }
 0x6c4   :  { %v3028_v31 = vpop.f32.mrf.mxu0  ;;  %v3069_v11 = vpop.f32.mrf.mxu1 }
 0x6c5   :  { %4954 = vpow2.f32 %v4528_v5 }
 0x6c6   :  { %4956 = vpow2.f32 %v4529_v10  ;;  %v6626_v10 = vpack.c.bf16 %v3118_v56, %v3118_v56  ;;  %v7945_v56 = vld [vmem:[#allocation127_spill] sm:$0xff] }
 0x6c7   :  { %4958 = vtanh.f32 %v3094_v18  ;;  %v7946_v18 = vld [vmem:[#allocation128_spill] sm:$0xff] }
 0x6d0   :  { %v4953_v58 = vpop.eup %4952 }
 0x6d1   :  { %v3128_v3 = vadd.f32 1.0, %v4953_v58  ;;  %v7947_v58 = vld [vmem:[#allocation129_spill] sm:$0xff] }
 0x6d2   :  { %v4955_v0 = vpop.eup %4954 }
 0x6d3   :  { %4960 = vrcp.f32 %v3128_v3  ;;  %v3129_v61 = vadd.f32 1.0, %v4955_v0  ;;  %v4957_v55 = vpop.eup %4956  ;;  %v7948_v3 = vld [vmem:[#allocation130_spill] sm:$0xff]  ;;  %v7949_v0 = vld [vmem:[#allocation131_spill] sm:$0xff] }
 0x6d4   :  { %v4959_v60 = vpop.eup %4958  ;;  %v3130_v21 = vadd.f32 1.0, %v4957_v55  ;;  %v7951_v55 = vld [vmem:[#allocation133_spill] sm:$0xff] }
 0x6d5   :  { %4962 = vrcp.f32 %v3129_v61  ;;  %v7950_v61 = vld [vmem:[#allocation132_spill] sm:$0xff] }
 0x6d6   :  { %4964 = vrcp.f32 %v3130_v21  ;;  %v7956_v21 = vld [vmem:[#allocation138_spill] sm:$0xff] }
 0x6e0   :  { %v4961_v6 = vpop.eup %4960 }
 0x6e1   :  { %v3139_v33 = vmul.f32 %v4961_v6, %v4959_v60  ;;  %v7952_v60 = vld [vmem:[#allocation134_spill] sm:$0xff]  ;;  %v7953_v6 = vld [vmem:[#allocation135_spill] sm:$0xff] }
 0x6e2   :  { %v4963_v30 = vpop.eup %4962 }
 0x6e3   :  { %v3138_v42 = vmul.f32 %v4963_v30, %v6445_v50  ;;  %v4965_v28 = vpop.eup %4964  ;;  %v7942_v50 = vld [vmem:[#allocation124_spill] sm:$0xff]  ;;  %v7955_v30 = vld [vmem:[#allocation137_spill] sm:$0xff] }
 0x6e5   :  { %v6615_v5 = vadd.f32 %v3139_v33, %v3138_v42  ;;  %v7954_v33 = vld [vmem:[#allocation136_spill] sm:$0xff]  ;;  %v7957_v42 = vld [vmem:[#allocation139_spill] sm:$0xff] }
 0x6e7   :  { %4966 = vtanh.f32 %v6615_v5 }
 0x6f4   :  { %v4967_v31 = vpop.eup %4966 }
 0x6f5   :  { %v3142_v11 = vmul.f32 %v4967_v31, %v4965_v28  ;;  %v7958_v28 = vld [vmem:[#allocation140_spill] sm:$0xff]  ;;  %v7959_v31 = vld [vmem:[#allocation141_spill] sm:$0xff] }
 0x6f7   :  { %v3148_v22 = vpack.c.bf16 %v3142_v11, %v3142_v11  ;;  %v6621_v43 = vmax.f32 %v7940_v4, %v3142_v11  ;;  %v6624_v1 = vadd.f32 %v3142_v11, %v6456_v23  ;;  %v7944_v23 = vld [vmem:[#allocation126_spill] sm:$0xff]  ;;  %v7962_v4 = vld [vmem:[#allocation144_spill] sm:$0xff] }
 0x6f8   :  { %v7960_v11 = vld [vmem:[#allocation142_spill] sm:$0xff] }
 0x6f9   :  { %3181 = vmatprep.mubr.bf16.mxu0 %v3148_v22  ;;  %3222 = vmatprep.mubr.bf16.mxu1 %v3148_v22 }
 0x6fa   :  { %3182 = vmatmul.mubr.bf16.vlgmr.msra.gmra.mxu0 %v6626_v10  ;;  %3223 = vmatmul.mubr.bf16.vlgmr.msra.gmra.mxu1 %v6626_v10 }
 0x6fb   :  { %3232 = vmatpush1.bf16.msra.mxu0 %v7557_v15  ;;  %3273 = vmatpush1.bf16.msra.mxu1 %v7558_v46 }
 0x6fc   :  { %3263 = vmatprep.mubr.bf16.mxu0 %v3148_v22  ;;  %3304 = vmatprep.mubr.bf16.mxu1 %v3148_v22  ;;  %v7961_v22 = vld [vmem:[#allocation143_spill] sm:$0xff] }
 0x6fd   :  { %3233 = vmatprep.subr.bf16.mxu0 %v7559_v13  ;;  %3274 = vmatprep.subr.bf16.mxu1 %v7560_v62 }
 0x6ff   :  { %3234 = vmatpush1.bf16.msra.mxu0 %v7561_v40  ;;  %3275 = vmatpush1.bf16.msra.mxu1 %v7562_v49 }
 0x700   :  { %3235 = vmatprep.subr.bf16.mxu0 %v7563_v48  ;;  %3276 = vmatprep.subr.bf16.mxu1 %v7564_v39 }
 0x703   :  { %3236 = vmatpush1.bf16.msra.mxu0 %v7565_v14  ;;  %3277 = vmatpush1.bf16.msra.mxu1 %v7566_v63 }
 0x704   :  { %3237 = vmatprep.subr.bf16.mxu0 %v7567_v12  ;;  %3278 = vmatprep.subr.bf16.mxu1 %v7568_v7 }
 0x707   :  { %3238 = vmatpush1.bf16.msra.mxu0 %v7569_v47  ;;  %3279 = vmatpush1.bf16.msra.mxu1 %v7652_v34 }
 0x708   :  { %3239 = vmatprep.subr.bf16.mxu0 %v7653_v27  ;;  %3280 = vmatprep.subr.bf16.mxu1 %v7654_v26 }
 0x70b   :  { %3240 = vmatpush1.bf16.msra.mxu0 %v7655_v45  ;;  %3281 = vmatpush1.bf16.msra.mxu1 %v7656_v20 }
 0x70c   :  { %3241 = vmatprep.subr.bf16.mxu0 %v7657_v51  ;;  %3282 = vmatprep.subr.bf16.mxu1 %v7658_v19 }
 0x70f   :  { %3242 = vmatpush1.bf16.msra.mxu0 %v7659_v52  ;;  %3283 = vmatpush1.bf16.msra.mxu1 %v7747_v36 }
 0x710   :  { %3243 = vmatprep.subr.bf16.mxu0 %v7748_v8  ;;  %3284 = vmatprep.subr.bf16.mxu1 %v7749_v41 }
 0x713   :  { %3244 = vmatpush1.bf16.msra.mxu0 %v7750_v44  ;;  %3285 = vmatpush1.bf16.msra.mxu1 %v7751_v32 }
 0x714   :  { %3245 = vmatprep.subr.bf16.mxu0 %v7665_v37  ;;  %3286 = vmatprep.subr.bf16.mxu1 %v7666_v59 }
 0x717   :  { %3246 = vmatpush1.bf16.msra.mxu0 %v7667_v16  ;;  %3287 = vmatpush1.bf16.msra.mxu1 %v7752_v29 }
 0x718   :  { %3247 = vmatprep.subr.bf16.mxu0 %v7753_v17  ;;  %3288 = vmatprep.subr.bf16.mxu1 %v7670_v35 }
 0x71b   :  { %3248 = vmatpush2.bf16.msra.mxu0 %v7671_v53  ;;  %3289 = vmatpush2.bf16.msra.mxu1 %v7672_v54 }
 0x71c   :  { %3249 = vmatprep.subr.bf16.mxu0 %v7673_v25  ;;  %3290 = vmatprep.subr.bf16.mxu1 %v7941_v2 }
 0x71f   :  { %3250 = vmatpush2.bf16.msra.mxu0 %v7942_v50  ;;  %3291 = vmatpush2.bf16.msra.mxu1 %v7943_v9 }
 0x720   :  { %3251 = vmatprep.subr.bf16.mxu0 %v7944_v23  ;;  %3292 = vmatprep.subr.bf16.mxu1 %v7945_v56 }
 0x723   :  { %3252 = vmatpush2.bf16.msra.mxu0 %v7946_v18  ;;  %3293 = vmatpush2.bf16.msra.mxu1 %v7947_v58 }
 0x724   :  { %3253 = vmatprep.subr.bf16.mxu0 %v7948_v3  ;;  %3294 = vmatprep.subr.bf16.mxu1 %v7949_v0 }
 0x727   :  { %3254 = vmatpush2.bf16.msra.mxu0 %v7950_v61  ;;  %3295 = vmatpush2.bf16.msra.mxu1 %v7951_v55 }
 0x728   :  { %3255 = vmatprep.subr.bf16.mxu0 %v7952_v60  ;;  %3296 = vmatprep.subr.bf16.mxu1 %v7953_v6  ;;  %v7963_v60 = vld [vmem:[#allocation145_spill] sm:$0xff]  ;;  %v7964_v6 = vld [vmem:[#allocation146_spill] sm:$0xff] }
 0x72b   :  { %3256 = vmatpush2.bf16.msra.mxu0 %v7954_v33  ;;  %3297 = vmatpush2.bf16.msra.mxu1 %v7955_v30  ;;  %v7965_v33 = vld [vmem:[#allocation147_spill] sm:$0xff]  ;;  %v7966_v30 = vld [vmem:[#allocation148_spill] sm:$0xff] }
 0x72c   :  { %3257 = vmatprep.subr.bf16.mxu0 %v7956_v21  ;;  %3298 = vmatprep.subr.bf16.mxu1 %v7957_v42  ;;  %v7967_v21 = vld [vmem:[#allocation149_spill] sm:$0xff]  ;;  %v7968_v42 = vld [vmem:[#allocation22_spill] sm:$0xff] }
 0x72f   :  { %3258 = vmatpush2.bf16.msra.mxu0 %v7958_v28  ;;  %3299 = vmatpush2.bf16.msra.mxu1 %v7959_v31  ;;  %v7969_v28 = vld [vmem:[#allocation23_spill] sm:$0xff] }
 0x730   :  { %3259 = vmatprep.subr.bf16.mxu0 %v7960_v11  ;;  %3300 = vmatprep.subr.bf16.mxu1 %v7961_v22  ;;  %v7970_v22 = vld [vmem:[#allocation24_spill] sm:$0xff]  ;;  %v7979_v11 = vld [vmem:[#allocation33_spill] sm:$0xff]  ;;  %v8035_v31 = vld [vmem:[#allocation159_spill] sm:$0xff] }
 0x733   :  { %3260 = vmatpush2.bf16.msra.mxu0 %v7962_v4  ;;  %3301 = vmatpush2.bf16.msra.mxu1 %v7963_v60  ;;  %v7971_v4 = vld [vmem:[#allocation25_spill] sm:$0xff]  ;;  %v7972_v60 = vld [vmem:[#allocation26_spill] sm:$0xff] }
 0x734   :  { %3261 = vmatprep.subr.bf16.mxu0 %v7964_v6  ;;  %3302 = vmatprep.subr.bf16.mxu1 %v7965_v33  ;;  %v7973_v6 = vld [vmem:[#allocation27_spill] sm:$0xff]  ;;  %v7974_v33 = vld [vmem:[#allocation28_spill] sm:$0xff] }
 0x737   :  { %3262 = vmatpush2.bf16.msra.mxu0 %v7966_v30  ;;  %3303 = vmatpush2.bf16.msra.mxu1 %v7967_v21  ;;  %v7975_v30 = vld [vmem:[#allocation29_spill] sm:$0xff]  ;;  %v7976_v21 = vld [vmem:[#allocation30_spill] sm:$0xff] }
 0x738   :  { %3391 = vmatprep.subr.bf16.mxu0 %v7968_v42  ;;  %3432 = vmatprep.subr.bf16.mxu1 %v7969_v28  ;;  %v7977_v42 = vld [vmem:[#allocation31_spill] sm:$0xff]  ;;  %v7978_v28 = vld [vmem:[#allocation32_spill] sm:$0xff] }
 0x73a   :  { %3264 = vmatmul.mubr.bf16.vlgmr.msra.gmra.mxu0 %v6626_v10  ;;  %3305 = vmatmul.mubr.bf16.vlgmr.msra.gmra.mxu1 %v6626_v10  ;;  %v7980_v10 = vld [vmem:[#allocation34_spill] sm:$0xff] }
 0x73b   :  { %3392 = vmatpush1.bf16.msra.mxu0 %v7970_v22  ;;  %3433 = vmatpush1.bf16.msra.mxu1 %v7971_v4  ;;  %v7981_v22 = vld [vmem:[#allocation35_spill] sm:$0xff]  ;;  %v7982_v4 = vld [vmem:[#allocation36_spill] sm:$0xff] }
 0x73c   :  { %3393 = vmatprep.subr.bf16.mxu0 %v7972_v60  ;;  %3434 = vmatprep.subr.bf16.mxu1 %v7973_v6  ;;  %v7983_v60 = vld [vmem:[#allocation37_spill] sm:$0xff]  ;;  %v7984_v6 = vld [vmem:[#allocation38_spill] sm:$0xff] }
 0x73f   :  { %3394 = vmatpush1.bf16.msra.mxu0 %v7974_v33  ;;  %3435 = vmatpush1.bf16.msra.mxu1 %v7975_v30  ;;  %v7985_v33 = vld [vmem:[#allocation39_spill] sm:$0xff]  ;;  %v7986_v30 = vld [vmem:[#allocation40_spill] sm:$0xff] }
 0x740   :  { %3395 = vmatprep.subr.bf16.mxu0 %v7976_v21  ;;  %3436 = vmatprep.subr.bf16.mxu1 %v7977_v42  ;;  %v7987_v21 = vld [vmem:[#allocation41_spill] sm:$0xff]  ;;  %v7988_v42 = vld [vmem:[#allocation42_spill] sm:$0xff] }
 0x743   :  { %3396 = vmatpush1.bf16.msra.mxu0 %v7978_v28  ;;  %3437 = vmatpush1.bf16.msra.mxu1 %v7979_v11  ;;  %v7989_v28 = vld [vmem:[#allocation43_spill] sm:$0xff]  ;;  %v7990_v11 = vld [vmem:[#allocation44_spill] sm:$0xff] }
 0x744   :  { %3397 = vmatprep.subr.bf16.mxu0 %v7980_v10  ;;  %3438 = vmatprep.subr.bf16.mxu1 %v7981_v22  ;;  %v7991_v10 = vld [vmem:[#allocation45_spill] sm:$0xff]  ;;  %v7992_v22 = vld [vmem:[#allocation46_spill] sm:$0xff] }
 0x747   :  { %3398 = vmatpush1.bf16.msra.mxu0 %v7982_v4  ;;  %3439 = vmatpush1.bf16.msra.mxu1 %v7983_v60  ;;  %v7993_v4 = vld [vmem:[#allocation47_spill] sm:$0xff]  ;;  %v7994_v60 = vld [vmem:[#allocation48_spill] sm:$0xff] }
 0x748   :  { %3399 = vmatprep.subr.bf16.mxu0 %v7984_v6  ;;  %3440 = vmatprep.subr.bf16.mxu1 %v7985_v33  ;;  %v7995_v6 = vld [vmem:[#allocation49_spill] sm:$0xff]  ;;  %v7996_v33 = vld [vmem:[#allocation50_spill] sm:$0xff] }
 0x74b   :  { %3400 = vmatpush1.bf16.msra.mxu0 %v7986_v30  ;;  %3441 = vmatpush1.bf16.msra.mxu1 %v7987_v21  ;;  %v7997_v30 = vld [vmem:[#allocation51_spill] sm:$0xff]  ;;  %v7998_v21 = vld [vmem:[#allocation52_spill] sm:$0xff] }
 0x74c   :  { %3401 = vmatprep.subr.bf16.mxu0 %v7988_v42  ;;  %3442 = vmatprep.subr.bf16.mxu1 %v7989_v28  ;;  %v7999_v42 = vld [vmem:[#allocation53_spill] sm:$0xff]  ;;  %v8000_v28 = vld [vmem:[#allocation54_spill] sm:$0xff] }
 0x74f   :  { %3402 = vmatpush1.bf16.msra.mxu0 %v7990_v11  ;;  %3443 = vmatpush1.bf16.msra.mxu1 %v7991_v10  ;;  %v8001_v11 = vld [vmem:[#allocation55_spill] sm:$0xff]  ;;  %v8002_v10 = vld [vmem:[#allocation56_spill] sm:$0xff] }
 0x750   :  { %3403 = vmatprep.subr.bf16.mxu0 %v7992_v22  ;;  %3444 = vmatprep.subr.bf16.mxu1 %v7993_v4  ;;  %v8003_v22 = vld [vmem:[#allocation57_spill] sm:$0xff]  ;;  %v8004_v4 = vld [vmem:[#allocation58_spill] sm:$0xff] }
 0x753   :  { %3404 = vmatpush1.bf16.msra.mxu0 %v7994_v60  ;;  %3445 = vmatpush1.bf16.msra.mxu1 %v7995_v6  ;;  %v8005_v60 = vld [vmem:[#allocation59_spill] sm:$0xff]  ;;  %v8006_v6 = vld [vmem:[#allocation60_spill] sm:$0xff] }
 0x754   :  { %3405 = vmatprep.subr.bf16.mxu0 %v7996_v33  ;;  %3446 = vmatprep.subr.bf16.mxu1 %v7997_v30  ;;  %v8007_v33 = vld [vmem:[#allocation61_spill] sm:$0xff]  ;;  %v8008_v30 = vld [vmem:[#allocation62_spill] sm:$0xff] }
 0x757   :  { %3406 = vmatpush1.bf16.msra.mxu0 %v7998_v21  ;;  %3447 = vmatpush1.bf16.msra.mxu1 %v7999_v42  ;;  %v8009_v21 = vld [vmem:[#allocation63_spill] sm:$0xff]  ;;  %v8010_v42 = vld [vmem:[#allocation64_spill] sm:$0xff] }
 0x758   :  { %3407 = vmatprep.subr.bf16.mxu0 %v8000_v28  ;;  %3448 = vmatprep.subr.bf16.mxu1 %v8001_v11  ;;  %v8011_v28 = vld [vmem:[#allocation65_spill] sm:$0xff]  ;;  %v8012_v11 = vld [vmem:[#allocation66_spill] sm:$0xff] }
 0x75b   :  { %3408 = vmatpush2.bf16.msra.mxu0 %v8002_v10  ;;  %3449 = vmatpush2.bf16.msra.mxu1 %v8003_v22  ;;  %v8013_v10 = vld [vmem:[#allocation67_spill] sm:$0xff]  ;;  %v8014_v22 = vld [vmem:[#allocation68_spill] sm:$0xff] }
 0x75c   :  { %3409 = vmatprep.subr.bf16.mxu0 %v8004_v4  ;;  %3450 = vmatprep.subr.bf16.mxu1 %v8005_v60  ;;  %v8015_v4 = vld [vmem:[#allocation69_spill] sm:$0xff]  ;;  %v8016_v60 = vld [vmem:[#allocation70_spill] sm:$0xff] }
 0x75f   :  { %3410 = vmatpush2.bf16.msra.mxu0 %v8006_v6  ;;  %3451 = vmatpush2.bf16.msra.mxu1 %v8007_v33  ;;  %v8017_v6 = vld [vmem:[#allocation71_spill] sm:$0xff]  ;;  %v8018_v33 = vld [vmem:[#allocation72_spill] sm:$0xff] }
 0x760   :  { %3411 = vmatprep.subr.bf16.mxu0 %v8008_v30  ;;  %3452 = vmatprep.subr.bf16.mxu1 %v8009_v21  ;;  %v8019_v30 = vld [vmem:[#allocation73_spill] sm:$0xff]  ;;  %v8020_v21 = vld [vmem:[#allocation74_spill] sm:$0xff] }
 0x763   :  { %3412 = vmatpush2.bf16.msra.mxu0 %v8010_v42  ;;  %3453 = vmatpush2.bf16.msra.mxu1 %v8011_v28  ;;  %v8021_v42 = vld [vmem:[#allocation75_spill] sm:$0xff]  ;;  %v8022_v28 = vld [vmem:[#allocation76_spill] sm:$0xff] }
 0x764   :  { %3413 = vmatprep.subr.bf16.mxu0 %v8012_v11  ;;  %3454 = vmatprep.subr.bf16.mxu1 %v8013_v10  ;;  %v8023_v11 = vld [vmem:[#allocation77_spill] sm:$0xff]  ;;  %v8024_v10 = vld [vmem:[#allocation78_spill] sm:$0xff] }
 0x767   :  { %3414 = vmatpush2.bf16.msra.mxu0 %v8014_v22  ;;  %3455 = vmatpush2.bf16.msra.mxu1 %v8015_v4  ;;  %v8025_v22 = vld [vmem:[#allocation79_spill] sm:$0xff]  ;;  %v8026_v4 = vld [vmem:[#allocation80_spill] sm:$0xff] }
 0x768   :  { %3415 = vmatprep.subr.bf16.mxu0 %v8016_v60  ;;  %3456 = vmatprep.subr.bf16.mxu1 %v8017_v6  ;;  %v8027_v60 = vld [vmem:[#allocation81_spill] sm:$0xff]  ;;  %v8028_v6 = vld [vmem:[#allocation82_spill] sm:$0xff] }
 0x76b   :  { %3416 = vmatpush2.bf16.msra.mxu0 %v8018_v33  ;;  %3457 = vmatpush2.bf16.msra.mxu1 %v8019_v30  ;;  %v8029_v33 = vld [vmem:[#allocation83_spill] sm:$0xff]  ;;  %v8030_v30 = vld [vmem:[#allocation84_spill] sm:$0xff] }
 0x76c   :  { %3417 = vmatprep.subr.bf16.mxu0 %v8020_v21  ;;  %3458 = vmatprep.subr.bf16.mxu1 %v8021_v42  ;;  %v8031_v21 = vld [vmem:[#allocation85_spill] sm:$0xff]  ;;  %v8032_v42 = vld [vmem:[#allocation86_spill] sm:$0xff] }
 0x76f   :  { %3418 = vmatpush2.bf16.msra.mxu0 %v8022_v28  ;;  %3459 = vmatpush2.bf16.msra.mxu1 %v8023_v11  ;;  %v8033_v28 = vld [vmem:[#allocation87_spill] sm:$0xff]  ;;  %v8034_v11 = vld [vmem:[#allocation158_spill] sm:$0xff] }
 0x770   :  { %3419 = vmatprep.subr.bf16.mxu0 %v8024_v10  ;;  %3460 = vmatprep.subr.bf16.mxu1 %v8025_v22  ;;  %v3317_v10 = vunpack.c.l.bf16 %v8034_v11  ;;  %v3319_v22 = vunpack.c.l.bf16 %v8035_v31 }
 0x773   :  { %3420 = vmatpush2.bf16.msra.mxu0 %v8026_v4  ;;  %3461 = vmatpush2.bf16.msra.mxu1 %v8027_v60 }
 0x774   :  { %3421 = vmatprep.subr.bf16.mxu0 %v8028_v6  ;;  %3462 = vmatprep.subr.bf16.mxu1 %v8029_v33  ;;  %v3318_v6 = vunpack.c.h.bf16 %v8034_v11  ;;  %v3320_v33 = vunpack.c.h.bf16 %v8035_v31 }
 0x777   :  { %3422 = vmatpush2.bf16.msra.mxu0 %v8030_v30  ;;  %3463 = vmatpush2.bf16.msra.mxu1 %v8031_v21 }
 0x778   :  { %3473 = vmatprep.subr.bf16.mxu0 %v8032_v42  ;;  %3514 = vmatprep.subr.bf16.mxu1 %v8033_v28 }
 0x7ba   :  { %v3183_v55 = vpop.f32.mrf.mxu0  ;;  %v3224_v4 = vpop.f32.mrf.mxu1 }
 0x7bb   :  { %v3321_v61 = vadd.f32 %v3317_v10, %v3183_v55  ;;  %v3323_v60 = vadd.f32 %v3319_v22, %v3224_v4 }
 0x7bc   :  { %v3185_v0 = vpop.f32.mrf.mxu0  ;;  %v3226_v30 = vpop.f32.mrf.mxu1 }
 0x7bd   :  { %v4530_v3 = vmul.f32 -1.442695, %v3321_v61  ;;  %v3322_v21 = vadd.f32 %v3318_v6, %v3185_v0  ;;  %v3324_v58 = vadd.f32 %v3320_v33, %v3226_v30  ;;  %v4532_v9 = vmul.f32 -1.442695, %v3323_v60  ;;  %v8036_v30 = vld [vmem:[#allocation168_spill] sm:$0xff] }
 0x7be   :  { %v3187_v42 = vpop.f32.mrf.mxu0  ;;  %v3228_v18 = vpop.f32.mrf.mxu1  ;;  %v3330_v4 = vunpack.c.h.bf16 %v8036_v30 }
 0x7bf   :  { %4968 = vpow2.f32 %v4530_v3  ;;  %v4531_v28 = vmul.f32 -1.442695, %v3322_v21  ;;  %v3329_v21 = vunpack.c.l.bf16 %v8036_v30 }
 0x7c0   :  { %v3188_v56 = vpop.f32.mrf.mxu0  ;;  %v3229_v23 = vpop.f32.mrf.mxu1 }
 0x7c1   :  { %4970 = vpow2.f32 %v4531_v28 }
 0x7c2   :  { %4972 = vpow2.f32 %v4532_v9 }
 0x7c3   :  { %4974 = vtanh.f32 %v3324_v58 }
 0x7cc   :  { %v4969_v50 = vpop.eup %4968 }
 0x7cd   :  { %v3346_v55 = vadd.f32 1.0, %v4969_v50 }
 0x7ce   :  { %v4971_v22 = vpop.eup %4970 }
 0x7cf   :  { %4976 = vrcp.f32 %v3346_v55  ;;  %v3347_v31 = vadd.f32 1.0, %v4971_v22  ;;  %v4973_v11 = vpop.eup %4972 }
 0x7d0   :  { %v4975_v61 = vpop.eup %4974  ;;  %v3348_v18 = vadd.f32 1.0, %v4973_v11 }
 0x7d1   :  { %4978 = vrcp.f32 %v3347_v31 }
 0x7d2   :  { %4980 = vrcp.f32 %v3348_v18 }
 0x7dc   :  { %v4977_v0 = vpop.eup %4976 }
 0x7dd   :  { %v3357_v6 = vmul.f32 %v4977_v0, %v4975_v61 }
 0x7de   :  { %v4979_v33 = vpop.eup %4978 }
 0x7df   :  { %v3356_v3 = vmul.f32 %v4979_v33, %v6599_v38  ;;  %v4981_v50 = vpop.eup %4980 }
 0x7e1   :  { %v6765_v56 = vadd.f32 %v3357_v6, %v3356_v3 }
 0x7e3   :  { %4982 = vtanh.f32 %v6765_v56 }
 0x7f0   :  { %v4983_v9 = vpop.eup %4982 }
 0x7f1   :  { %v6768_v23 = vmul.f32 %v4983_v9, %v4981_v50 }
 0x7f3   :  { %v6774_v60 = vadd.f32 %v6768_v23, %v6608_v57  ;;  %v8037_v57 = vld [vmem:[#allocation169_spill] sm:$0xff] }
 0x7f4   :  { %v3331_v18 = vunpack.c.l.bf16 %v8037_v57  ;;  %v3332_v50 = vunpack.c.h.bf16 %v8037_v57  ;;  %v8056_v57 = vld [vmem:[#allocation142_spill] sm:$0xff] }
 0x7fa   :  { %v3265_v42 = vpop.f32.mrf.mxu0  ;;  %v3306_v38 = vpop.f32.mrf.mxu1 }
 0x7fb   :  { %v3333_v28 = vadd.f32 %v3329_v21, %v3265_v42  ;;  %v3335_v3 = vadd.f32 %v3331_v18, %v3306_v38 }
 0x7fc   :  { %v3267_v10 = vpop.f32.mrf.mxu0  ;;  %v3308_v55 = vpop.f32.mrf.mxu1 }
 0x7fd   :  { %v4533_v22 = vmul.f32 -1.442695, %v3333_v28  ;;  %v3334_v31 = vadd.f32 %v3330_v4, %v3267_v10  ;;  %v4535_v9 = vmul.f32 -1.442695, %v3335_v3  ;;  %v3336_v21 = vadd.f32 %v3332_v50, %v3308_v55  ;;  %v8039_v3 = vld [vmem:[#allocation125_spill] sm:$0xff]  ;;  %v8040_v50 = vld [vmem:[#allocation126_spill] sm:$0xff] }
 0x7fe   :  { %v3269_v11 = vpop.f32.mrf.mxu0  ;;  %v3310_v61 = vpop.f32.mrf.mxu1 }
 0x7ff   :  { %4984 = vpow2.f32 %v4533_v22  ;;  %v4534_v0 = vmul.f32 -1.442695, %v3334_v31 }
 0x800   :  { %v3270_v6 = vpop.f32.mrf.mxu0  ;;  %v3311_v33 = vpop.f32.mrf.mxu1 }
 0x801   :  { %4986 = vpow2.f32 %v4534_v0 }
 0x802   :  { %4988 = vpow2.f32 %v4535_v9  ;;  %v8041_v9 = vld [vmem:[#allocation127_spill] sm:$0xff] }
 0x803   :  { %4990 = vtanh.f32 %v3336_v21  ;;  %v8042_v21 = vld [vmem:[#allocation128_spill] sm:$0xff] }
 0x80c   :  { %v4985_v42 = vpop.eup %4984 }
 0x80d   :  { %v3370_v30 = vadd.f32 1.0, %v4985_v42  ;;  %v8043_v42 = vld [vmem:[#allocation129_spill] sm:$0xff] }
 0x80e   :  { %v4987_v58 = vpop.eup %4986 }
 0x80f   :  { %4992 = vrcp.f32 %v3370_v30  ;;  %v3371_v28 = vadd.f32 1.0, %v4987_v58  ;;  %v4989_v4 = vpop.eup %4988  ;;  %v8044_v30 = vld [vmem:[#allocation130_spill] sm:$0xff] }
 0x810   :  { %v4991_v10 = vpop.eup %4990  ;;  %v3372_v61 = vadd.f32 1.0, %v4989_v4  ;;  %v8046_v4 = vld [vmem:[#allocation132_spill] sm:$0xff] }
 0x811   :  { %4994 = vrcp.f32 %v3371_v28  ;;  %v8045_v28 = vld [vmem:[#allocation131_spill] sm:$0xff] }
 0x812   :  { %4996 = vrcp.f32 %v3372_v61  ;;  %v8051_v61 = vld [vmem:[#allocation137_spill] sm:$0xff] }
 0x81c   :  { %v4993_v22 = vpop.eup %4992 }
 0x81d   :  { %v3381_v31 = vmul.f32 %v4993_v22, %v4991_v10  ;;  %v8047_v10 = vld [vmem:[#allocation133_spill] sm:$0xff]  ;;  %v8048_v22 = vld [vmem:[#allocation134_spill] sm:$0xff] }
 0x81e   :  { %v4995_v11 = vpop.eup %4994 }
 0x81f   :  { %v3380_v38 = vmul.f32 %v4995_v11, %v6615_v5  ;;  %v4997_v55 = vpop.eup %4996  ;;  %v6796_v5 = vpack.c.bf16 %v6768_v23, %v6768_v23  ;;  %v8050_v11 = vld [vmem:[#allocation136_spill] sm:$0xff] }
 0x821   :  { %v6781_v0 = vadd.f32 %v3381_v31, %v3380_v38  ;;  %v8049_v31 = vld [vmem:[#allocation135_spill] sm:$0xff]  ;;  %v8052_v38 = vld [vmem:[#allocation138_spill] sm:$0xff] }
 0x823   :  { %4998 = vtanh.f32 %v6781_v0 }
 0x830   :  { %v4999_v6 = vpop.eup %4998 }
 0x831   :  { %v6784_v33 = vmul.f32 %v4999_v6, %v4997_v55  ;;  %v8053_v55 = vld [vmem:[#allocation139_spill] sm:$0xff]  ;;  %v8054_v6 = vld [vmem:[#allocation140_spill] sm:$0xff] }
 0x833   :  { %v3390_v58 = vpack.c.bf16 %v6784_v33, %v6784_v33  ;;  %v6792_v18 = vadd.f32 %v6784_v33, %v6624_v1  ;;  %v8038_v1 = vld [vmem:[#allocation124_spill] sm:$0xff] }
 0x835   :  { %3423 = vmatprep.mubr.bf16.mxu0 %v3390_v58  ;;  %3464 = vmatprep.mubr.bf16.mxu1 %v3390_v58 }
 0x836   :  { %3424 = vmatmul.mubr.bf16.vlgmr.msra.gmra.mxu0 %v6796_v5  ;;  %3465 = vmatmul.mubr.bf16.vlgmr.msra.gmra.mxu1 %v6796_v5 }
 0x837   :  { %3474 = vmatpush1.bf16.msra.mxu0 %v7557_v15  ;;  %3515 = vmatpush1.bf16.msra.mxu1 %v7558_v46 }
 0x838   :  { %3505 = vmatprep.mubr.bf16.mxu0 %v3390_v58  ;;  %3546 = vmatprep.mubr.bf16.mxu1 %v3390_v58  ;;  %v8055_v58 = vld [vmem:[#allocation141_spill] sm:$0xff] }
 0x839   :  { %3475 = vmatprep.subr.bf16.mxu0 %v7559_v13  ;;  %3516 = vmatprep.subr.bf16.mxu1 %v7560_v62 }
 0x83b   :  { %3476 = vmatpush1.bf16.msra.mxu0 %v7561_v40  ;;  %3517 = vmatpush1.bf16.msra.mxu1 %v7562_v49 }
 0x83c   :  { %3477 = vmatprep.subr.bf16.mxu0 %v7563_v48  ;;  %3518 = vmatprep.subr.bf16.mxu1 %v7564_v39 }
 0x83f   :  { %3478 = vmatpush1.bf16.msra.mxu0 %v7565_v14  ;;  %3519 = vmatpush1.bf16.msra.mxu1 %v7566_v63 }
 0x840   :  { %3479 = vmatprep.subr.bf16.mxu0 %v7567_v12  ;;  %3520 = vmatprep.subr.bf16.mxu1 %v7568_v7 }
 0x843   :  { %3480 = vmatpush1.bf16.msra.mxu0 %v7569_v47  ;;  %3521 = vmatpush1.bf16.msra.mxu1 %v7652_v34 }
 0x844   :  { %3481 = vmatprep.subr.bf16.mxu0 %v7653_v27  ;;  %3522 = vmatprep.subr.bf16.mxu1 %v7654_v26 }
 0x847   :  { %3482 = vmatpush1.bf16.msra.mxu0 %v7655_v45  ;;  %3523 = vmatpush1.bf16.msra.mxu1 %v7656_v20 }
 0x848   :  { %3483 = vmatprep.subr.bf16.mxu0 %v7657_v51  ;;  %3524 = vmatprep.subr.bf16.mxu1 %v7658_v19 }
 0x84b   :  { %3484 = vmatpush1.bf16.msra.mxu0 %v7659_v52  ;;  %3525 = vmatpush1.bf16.msra.mxu1 %v7747_v36 }
 0x84c   :  { %3485 = vmatprep.subr.bf16.mxu0 %v7748_v8  ;;  %3526 = vmatprep.subr.bf16.mxu1 %v7749_v41 }
 0x84f   :  { %3486 = vmatpush1.bf16.msra.mxu0 %v7750_v44  ;;  %3527 = vmatpush1.bf16.msra.mxu1 %v7751_v32 }
 0x850   :  { %3487 = vmatprep.subr.bf16.mxu0 %v7665_v37  ;;  %3528 = vmatprep.subr.bf16.mxu1 %v7666_v59 }
 0x853   :  { %3488 = vmatpush1.bf16.msra.mxu0 %v7667_v16  ;;  %3529 = vmatpush1.bf16.msra.mxu1 %v7752_v29 }
 0x854   :  { %3489 = vmatprep.subr.bf16.mxu0 %v7753_v17  ;;  %3530 = vmatprep.subr.bf16.mxu1 %v7670_v35 }
 0x857   :  { %3490 = vmatpush2.bf16.msra.mxu0 %v7671_v53  ;;  %3531 = vmatpush2.bf16.msra.mxu1 %v7672_v54 }
 0x858   :  { %3491 = vmatprep.subr.bf16.mxu0 %v7673_v25  ;;  %3532 = vmatprep.subr.bf16.mxu1 %v7941_v2 }
 0x85b   :  { %3492 = vmatpush2.bf16.msra.mxu0 %v8038_v1  ;;  %3533 = vmatpush2.bf16.msra.mxu1 %v8039_v3 }
 0x85c   :  { %3493 = vmatprep.subr.bf16.mxu0 %v8040_v50  ;;  %3534 = vmatprep.subr.bf16.mxu1 %v8041_v9 }
 0x85f   :  { %3494 = vmatpush2.bf16.msra.mxu0 %v8042_v21  ;;  %3535 = vmatpush2.bf16.msra.mxu1 %v8043_v42 }
 0x860   :  { %3495 = vmatprep.subr.bf16.mxu0 %v8044_v30  ;;  %3536 = vmatprep.subr.bf16.mxu1 %v8045_v28 }
 0x863   :  { %3496 = vmatpush2.bf16.msra.mxu0 %v8046_v4  ;;  %3537 = vmatpush2.bf16.msra.mxu1 %v8047_v10  ;;  %v8057_v4 = vld [vmem:[#allocation143_spill] sm:$0xff]  ;;  %v8058_v10 = vld [vmem:[#allocation144_spill] sm:$0xff] }
 0x864   :  { %3497 = vmatprep.subr.bf16.mxu0 %v8048_v22  ;;  %3538 = vmatprep.subr.bf16.mxu1 %v8049_v31  ;;  %v8059_v22 = vld [vmem:[#allocation145_spill] sm:$0xff]  ;;  %v8060_v31 = vld [vmem:[#allocation146_spill] sm:$0xff] }
 0x867   :  { %3498 = vmatpush2.bf16.msra.mxu0 %v8050_v11  ;;  %3539 = vmatpush2.bf16.msra.mxu1 %v8051_v61  ;;  %v8061_v11 = vld [vmem:[#allocation147_spill] sm:$0xff]  ;;  %v8062_v61 = vld [vmem:[#allocation148_spill] sm:$0xff] }
 0x868   :  { %3499 = vmatprep.subr.bf16.mxu0 %v8052_v38  ;;  %3540 = vmatprep.subr.bf16.mxu1 %v8053_v55  ;;  %v8063_v38 = vld [vmem:[#allocation149_spill] sm:$0xff]  ;;  %v8064_v55 = vld [vmem:[#allocation22_spill] sm:$0xff] }
 0x86b   :  { %3500 = vmatpush2.bf16.msra.mxu0 %v8054_v6  ;;  %3541 = vmatpush2.bf16.msra.mxu1 %v8055_v58  ;;  %v8065_v6 = vld [vmem:[#allocation23_spill] sm:$0xff]  ;;  %v8131_v58 = vld [vmem:[#allocation161_spill] sm:$0xff] }
 0x86c   :  { %3501 = vmatprep.subr.bf16.mxu0 %v8056_v57  ;;  %3542 = vmatprep.subr.bf16.mxu1 %v8057_v4  ;;  %v8066_v4 = vld [vmem:[#allocation24_spill] sm:$0xff]  ;;  %v8075_v57 = vld [vmem:[#allocation33_spill] sm:$0xff] }
 0x86f   :  { %3502 = vmatpush2.bf16.msra.mxu0 %v8058_v10  ;;  %3543 = vmatpush2.bf16.msra.mxu1 %v8059_v22  ;;  %v8067_v10 = vld [vmem:[#allocation25_spill] sm:$0xff]  ;;  %v8068_v22 = vld [vmem:[#allocation26_spill] sm:$0xff] }
 0x870   :  { %3503 = vmatprep.subr.bf16.mxu0 %v8060_v31  ;;  %3544 = vmatprep.subr.bf16.mxu1 %v8061_v11  ;;  %v8069_v31 = vld [vmem:[#allocation27_spill] sm:$0xff]  ;;  %v8070_v11 = vld [vmem:[#allocation28_spill] sm:$0xff] }
 0x873   :  { %3504 = vmatpush2.bf16.msra.mxu0 %v8062_v61  ;;  %3545 = vmatpush2.bf16.msra.mxu1 %v8063_v38  ;;  %v8071_v61 = vld [vmem:[#allocation29_spill] sm:$0xff]  ;;  %v8072_v38 = vld [vmem:[#allocation30_spill] sm:$0xff] }
 0x874   :  { %3633 = vmatprep.subr.bf16.mxu0 %v8064_v55  ;;  %3674 = vmatprep.subr.bf16.mxu1 %v8065_v6  ;;  %v8073_v55 = vld [vmem:[#allocation31_spill] sm:$0xff]  ;;  %v8074_v6 = vld [vmem:[#allocation32_spill] sm:$0xff] }
 0x876   :  { %3506 = vmatmul.mubr.bf16.vlgmr.msra.gmra.mxu0 %v6796_v5  ;;  %3547 = vmatmul.mubr.bf16.vlgmr.msra.gmra.mxu1 %v6796_v5  ;;  %v8076_v5 = vld [vmem:[#allocation34_spill] sm:$0xff] }
 0x877   :  { %3634 = vmatpush1.bf16.msra.mxu0 %v8066_v4  ;;  %3675 = vmatpush1.bf16.msra.mxu1 %v8067_v10  ;;  %v8077_v4 = vld [vmem:[#allocation35_spill] sm:$0xff]  ;;  %v8078_v10 = vld [vmem:[#allocation36_spill] sm:$0xff] }
 0x878   :  { %3635 = vmatprep.subr.bf16.mxu0 %v8068_v22  ;;  %3676 = vmatprep.subr.bf16.mxu1 %v8069_v31  ;;  %v8079_v22 = vld [vmem:[#allocation37_spill] sm:$0xff]  ;;  %v8080_v31 = vld [vmem:[#allocation38_spill] sm:$0xff] }
 0x87b   :  { %3636 = vmatpush1.bf16.msra.mxu0 %v8070_v11  ;;  %3677 = vmatpush1.bf16.msra.mxu1 %v8071_v61  ;;  %v8081_v11 = vld [vmem:[#allocation39_spill] sm:$0xff]  ;;  %v8082_v61 = vld [vmem:[#allocation40_spill] sm:$0xff] }
 0x87c   :  { %3637 = vmatprep.subr.bf16.mxu0 %v8072_v38  ;;  %3678 = vmatprep.subr.bf16.mxu1 %v8073_v55  ;;  %v8083_v38 = vld [vmem:[#allocation41_spill] sm:$0xff]  ;;  %v8084_v55 = vld [vmem:[#allocation42_spill] sm:$0xff] }
 0x87f   :  { %3638 = vmatpush1.bf16.msra.mxu0 %v8074_v6  ;;  %3679 = vmatpush1.bf16.msra.mxu1 %v8075_v57  ;;  %v8085_v6 = vld [vmem:[#allocation43_spill] sm:$0xff]  ;;  %v8086_v57 = vld [vmem:[#allocation44_spill] sm:$0xff] }
 0x880   :  { %3639 = vmatprep.subr.bf16.mxu0 %v8076_v5  ;;  %3680 = vmatprep.subr.bf16.mxu1 %v8077_v4  ;;  %v8087_v5 = vld [vmem:[#allocation45_spill] sm:$0xff]  ;;  %v8088_v4 = vld [vmem:[#allocation46_spill] sm:$0xff] }
 0x883   :  { %3640 = vmatpush1.bf16.msra.mxu0 %v8078_v10  ;;  %3681 = vmatpush1.bf16.msra.mxu1 %v8079_v22  ;;  %v8089_v10 = vld [vmem:[#allocation47_spill] sm:$0xff]  ;;  %v8090_v22 = vld [vmem:[#allocation48_spill] sm:$0xff] }
 0x884   :  { %3641 = vmatprep.subr.bf16.mxu0 %v8080_v31  ;;  %3682 = vmatprep.subr.bf16.mxu1 %v8081_v11  ;;  %v8091_v31 = vld [vmem:[#allocation49_spill] sm:$0xff]  ;;  %v8092_v11 = vld [vmem:[#allocation50_spill] sm:$0xff] }
 0x887   :  { %3642 = vmatpush1.bf16.msra.mxu0 %v8082_v61  ;;  %3683 = vmatpush1.bf16.msra.mxu1 %v8083_v38  ;;  %v8093_v61 = vld [vmem:[#allocation51_spill] sm:$0xff]  ;;  %v8094_v38 = vld [vmem:[#allocation52_spill] sm:$0xff] }
 0x888   :  { %3643 = vmatprep.subr.bf16.mxu0 %v8084_v55  ;;  %3684 = vmatprep.subr.bf16.mxu1 %v8085_v6  ;;  %v8095_v55 = vld [vmem:[#allocation53_spill] sm:$0xff]  ;;  %v8096_v6 = vld [vmem:[#allocation54_spill] sm:$0xff] }
 0x88b   :  { %3644 = vmatpush1.bf16.msra.mxu0 %v8086_v57  ;;  %3685 = vmatpush1.bf16.msra.mxu1 %v8087_v5  ;;  %v8097_v57 = vld [vmem:[#allocation55_spill] sm:$0xff]  ;;  %v8098_v5 = vld [vmem:[#allocation56_spill] sm:$0xff] }
 0x88c   :  { %3645 = vmatprep.subr.bf16.mxu0 %v8088_v4  ;;  %3686 = vmatprep.subr.bf16.mxu1 %v8089_v10  ;;  %v8099_v4 = vld [vmem:[#allocation57_spill] sm:$0xff]  ;;  %v8100_v10 = vld [vmem:[#allocation58_spill] sm:$0xff] }
 0x88f   :  { %3646 = vmatpush1.bf16.msra.mxu0 %v8090_v22  ;;  %3687 = vmatpush1.bf16.msra.mxu1 %v8091_v31  ;;  %v8101_v22 = vld [vmem:[#allocation59_spill] sm:$0xff]  ;;  %v8102_v31 = vld [vmem:[#allocation60_spill] sm:$0xff] }
 0x890   :  { %3647 = vmatprep.subr.bf16.mxu0 %v8092_v11  ;;  %3688 = vmatprep.subr.bf16.mxu1 %v8093_v61  ;;  %v8103_v11 = vld [vmem:[#allocation61_spill] sm:$0xff]  ;;  %v8104_v61 = vld [vmem:[#allocation62_spill] sm:$0xff] }
 0x893   :  { %3648 = vmatpush1.bf16.msra.mxu0 %v8094_v38  ;;  %3689 = vmatpush1.bf16.msra.mxu1 %v8095_v55  ;;  %v8105_v38 = vld [vmem:[#allocation63_spill] sm:$0xff]  ;;  %v8106_v55 = vld [vmem:[#allocation64_spill] sm:$0xff] }
 0x894   :  { %3649 = vmatprep.subr.bf16.mxu0 %v8096_v6  ;;  %3690 = vmatprep.subr.bf16.mxu1 %v8097_v57  ;;  %v8107_v6 = vld [vmem:[#allocation65_spill] sm:$0xff]  ;;  %v8108_v57 = vld [vmem:[#allocation66_spill] sm:$0xff] }
 0x897   :  { %3650 = vmatpush2.bf16.msra.mxu0 %v8098_v5  ;;  %3691 = vmatpush2.bf16.msra.mxu1 %v8099_v4  ;;  %v8109_v5 = vld [vmem:[#allocation67_spill] sm:$0xff]  ;;  %v8110_v4 = vld [vmem:[#allocation68_spill] sm:$0xff] }
 0x898   :  { %3651 = vmatprep.subr.bf16.mxu0 %v8100_v10  ;;  %3692 = vmatprep.subr.bf16.mxu1 %v8101_v22  ;;  %v8111_v10 = vld [vmem:[#allocation69_spill] sm:$0xff]  ;;  %v8112_v22 = vld [vmem:[#allocation70_spill] sm:$0xff] }
 0x89b   :  { %3652 = vmatpush2.bf16.msra.mxu0 %v8102_v31  ;;  %3693 = vmatpush2.bf16.msra.mxu1 %v8103_v11  ;;  %v8113_v31 = vld [vmem:[#allocation71_spill] sm:$0xff]  ;;  %v8114_v11 = vld [vmem:[#allocation72_spill] sm:$0xff] }
 0x89c   :  { %3653 = vmatprep.subr.bf16.mxu0 %v8104_v61  ;;  %3694 = vmatprep.subr.bf16.mxu1 %v8105_v38  ;;  %v8115_v61 = vld [vmem:[#allocation73_spill] sm:$0xff]  ;;  %v8116_v38 = vld [vmem:[#allocation74_spill] sm:$0xff] }
 0x89f   :  { %3654 = vmatpush2.bf16.msra.mxu0 %v8106_v55  ;;  %3695 = vmatpush2.bf16.msra.mxu1 %v8107_v6  ;;  %v8117_v55 = vld [vmem:[#allocation75_spill] sm:$0xff]  ;;  %v8118_v6 = vld [vmem:[#allocation76_spill] sm:$0xff] }
 0x8a0   :  { %3655 = vmatprep.subr.bf16.mxu0 %v8108_v57  ;;  %3696 = vmatprep.subr.bf16.mxu1 %v8109_v5  ;;  %v8119_v57 = vld [vmem:[#allocation77_spill] sm:$0xff]  ;;  %v8120_v5 = vld [vmem:[#allocation78_spill] sm:$0xff] }
 0x8a3   :  { %3656 = vmatpush2.bf16.msra.mxu0 %v8110_v4  ;;  %3697 = vmatpush2.bf16.msra.mxu1 %v8111_v10  ;;  %v8121_v4 = vld [vmem:[#allocation79_spill] sm:$0xff]  ;;  %v8122_v10 = vld [vmem:[#allocation80_spill] sm:$0xff] }
 0x8a4   :  { %3657 = vmatprep.subr.bf16.mxu0 %v8112_v22  ;;  %3698 = vmatprep.subr.bf16.mxu1 %v8113_v31  ;;  %v8123_v22 = vld [vmem:[#allocation81_spill] sm:$0xff]  ;;  %v8124_v31 = vld [vmem:[#allocation82_spill] sm:$0xff] }
 0x8a7   :  { %3658 = vmatpush2.bf16.msra.mxu0 %v8114_v11  ;;  %3699 = vmatpush2.bf16.msra.mxu1 %v8115_v61  ;;  %v8125_v11 = vld [vmem:[#allocation83_spill] sm:$0xff]  ;;  %v8126_v61 = vld [vmem:[#allocation84_spill] sm:$0xff] }
 0x8a8   :  { %3659 = vmatprep.subr.bf16.mxu0 %v8116_v38  ;;  %3700 = vmatprep.subr.bf16.mxu1 %v8117_v55  ;;  %v8127_v38 = vld [vmem:[#allocation85_spill] sm:$0xff]  ;;  %v8128_v55 = vld [vmem:[#allocation86_spill] sm:$0xff] }
 0x8ab   :  { %3660 = vmatpush2.bf16.msra.mxu0 %v8118_v6  ;;  %3701 = vmatpush2.bf16.msra.mxu1 %v8119_v57  ;;  %v8129_v6 = vld [vmem:[#allocation87_spill] sm:$0xff]  ;;  %v8130_v57 = vld [vmem:[#allocation160_spill] sm:$0xff] }
 0x8ac   :  { %3661 = vmatprep.subr.bf16.mxu0 %v8120_v5  ;;  %3702 = vmatprep.subr.bf16.mxu1 %v8121_v4  ;;  %v3559_v5 = vunpack.c.l.bf16 %v8130_v57  ;;  %v3561_v4 = vunpack.c.l.bf16 %v8131_v58 }
 0x8af   :  { %3662 = vmatpush2.bf16.msra.mxu0 %v8122_v10  ;;  %3703 = vmatpush2.bf16.msra.mxu1 %v8123_v22 }
 0x8b0   :  { %3663 = vmatprep.subr.bf16.mxu0 %v8124_v31  ;;  %3704 = vmatprep.subr.bf16.mxu1 %v8125_v11  ;;  %v3560_v31 = vunpack.c.h.bf16 %v8130_v57  ;;  %v3562_v11 = vunpack.c.h.bf16 %v8131_v58 }
 0x8b3   :  { %3664 = vmatpush2.bf16.msra.mxu0 %v8126_v61  ;;  %3705 = vmatpush2.bf16.msra.mxu1 %v8127_v38 }
 0x8b4   :  { %3715 = vmatprep.subr.bf16.mxu0 %v8128_v55  ;;  %3756 = vmatprep.subr.bf16.mxu1 %v8129_v6 }
 0x8f6   :  { %v3425_v28 = vpop.f32.mrf.mxu0  ;;  %v3466_v10 = vpop.f32.mrf.mxu1 }
 0x8f7   :  { %v3563_v30 = vadd.f32 %v3559_v5, %v3425_v28  ;;  %v3565_v22 = vadd.f32 %v3561_v4, %v3466_v10 }
 0x8f8   :  { %v3427_v42 = vpop.f32.mrf.mxu0  ;;  %v3468_v61 = vpop.f32.mrf.mxu1 }
 0x8f9   :  { %v4536_v21 = vmul.f32 -1.442695, %v3563_v30  ;;  %v3564_v38 = vadd.f32 %v3560_v31, %v3427_v42  ;;  %v3566_v9 = vadd.f32 %v3562_v11, %v3468_v61  ;;  %v4538_v2 = vmul.f32 -1.442695, %v3565_v22  ;;  %v8133_v11 = vld [vmem:[#allocation166_spill] sm:$0xff] }
 0x8fa   :  { %v3429_v55 = vpop.f32.mrf.mxu0  ;;  %v3470_v50 = vpop.f32.mrf.mxu1  ;;  %v3571_v61 = vunpack.c.l.bf16 %v8133_v11 }
 0x8fb   :  { %5000 = vpow2.f32 %v4536_v21  ;;  %v4537_v6 = vmul.f32 -1.442695, %v3564_v38 }
 0x8fc   :  { %v3430_v3 = vpop.f32.mrf.mxu0  ;;  %v3471_v1 = vpop.f32.mrf.mxu1 }
 0x8fd   :  { %5002 = vpow2.f32 %v4537_v6  ;;  %v3572_v6 = vunpack.c.h.bf16 %v8133_v11 }
 0x8fe   :  { %5004 = vpow2.f32 %v4538_v2 }
 0x8ff   :  { %5006 = vtanh.f32 %v3566_v9  ;;  %v8132_v9 = vmax.f32 %v6605_v24, %v6768_v23 }
 0x908   :  { %v5001_v25 = vpop.eup %5000 }
 0x909   :  { %v3588_v28 = vadd.f32 1.0, %v5001_v25 }
 0x90a   :  { %v5003_v5 = vpop.eup %5002 }
 0x90b   :  { %5008 = vrcp.f32 %v3588_v28  ;;  %v3589_v58 = vadd.f32 1.0, %v5003_v5  ;;  %v5005_v57 = vpop.eup %5004 }
 0x90c   :  { %v5007_v30 = vpop.eup %5006  ;;  %v3590_v50 = vadd.f32 1.0, %v5005_v57 }
 0x90d   :  { %5010 = vrcp.f32 %v3589_v58 }
 0x90e   :  { %5012 = vrcp.f32 %v3590_v50 }
 0x918   :  { %v5009_v42 = vpop.eup %5008 }
 0x919   :  { %v3599_v4 = vmul.f32 %v5009_v42, %v5007_v30 }
 0x91a   :  { %v5011_v10 = vpop.eup %5010 }
 0x91b   :  { %v3598_v21 = vmul.f32 %v5011_v10, %v6765_v56  ;;  %v5013_v25 = vpop.eup %5012 }
 0x91d   :  { %v6935_v3 = vadd.f32 %v3599_v4, %v3598_v21 }
 0x91f   :  { %5014 = vtanh.f32 %v6935_v3 }
 0x92c   :  { %v5015_v2 = vpop.eup %5014 }
 0x92d   :  { %v3602_v1 = vmul.f32 %v5015_v2, %v5013_v25 }
 0x92f   :  { %v6941_v22 = vmax.f32 %v8132_v9, %v3602_v1  ;;  %v6944_v31 = vadd.f32 %v3602_v1, %v6774_v60  ;;  %v8134_v60 = vld [vmem:[#allocation167_spill] sm:$0xff] }
 0x930   :  { %v3573_v10 = vunpack.c.l.bf16 %v8134_v60  ;;  %v3574_v21 = vunpack.c.h.bf16 %v8134_v60  ;;  %v8135_v60 = vmax.f32 %v6621_v43, %v6784_v33  ;;  %v4782_v43 = vld [vmem:[#allocation14 + $0xf0] sm:$0xff]   ;;  %v4784_v33 = vld [vmem:[#allocation14 + $0x68] sm:$0xff]  }
 0x936   :  { %v3507_v38 = vpop.f32.mrf.mxu0  ;;  %v3548_v56 = vpop.f32.mrf.mxu1 }
 0x937   :  { %v3575_v55 = vadd.f32 %v3571_v61, %v3507_v38  ;;  %v3577_v50 = vadd.f32 %v3573_v10, %v3548_v56 }
 0x938   :  { %v3509_v28 = vpop.f32.mrf.mxu0  ;;  %v3550_v5 = vpop.f32.mrf.mxu1 }
 0x939   :  { %v4539_v58 = vmul.f32 -1.442695, %v3575_v55  ;;  %v3576_v57 = vadd.f32 %v3572_v6, %v3509_v28  ;;  %v4541_v25 = vmul.f32 -1.442695, %v3577_v50  ;;  %v3578_v2 = vadd.f32 %v3574_v21, %v3550_v5 }
 0x93a   :  { %v3511_v30 = vpop.f32.mrf.mxu0  ;;  %v3552_v42 = vpop.f32.mrf.mxu1  ;;  %v6962_v21 = vpack.c.bf16 %v3602_v1, %v3602_v1  ;;  %v4786_v1 = vld [vmem:[#allocation14 + $0xe8] sm:$0xff]  }
 0x93b   :  { %5016 = vpow2.f32 %v4539_v58  ;;  %v4540_v24 = vmul.f32 -1.442695, %v3576_v57 }
 0x93c   :  { %v3512_v23 = vpop.f32.mrf.mxu0  ;;  %v3553_v4 = vpop.f32.mrf.mxu1 }
 0x93d   :  { %5018 = vpow2.f32 %v4540_v24 }
 0x93e   :  { %5020 = vpow2.f32 %v4541_v25  ;;  %v4787_v25 = vld [vmem:[#allocation14 + $0xa8] sm:$0xff]  }
 0x93f   :  { %5022 = vtanh.f32 %v3578_v2  ;;  %v4788_v2 = vld [vmem:[#allocation14 + $0x60] sm:$0xff]  }
 0x948   :  { %v5017_v9 = vpop.eup %5016 }
 0x949   :  { %v3612_v11 = vadd.f32 1.0, %v5017_v9  ;;  %v4789_v9 = vld [vmem:[#allocation14 + $0x20] sm:$0xff]  }
 0x94a   :  { %v5019_v61 = vpop.eup %5018 }
 0x94b   :  { %5024 = vrcp.f32 %v3612_v11  ;;  %v3613_v38 = vadd.f32 1.0, %v5019_v61  ;;  %v5021_v55 = vpop.eup %5020  ;;  %v4790_v11 = vld [vmem:[#allocation14 + $0xe0] sm:$0xff]   ;;  %v4792_v61 = vld [vmem:[#allocation14 + $0x58] sm:$0xff]  }
 0x94c   :  { %v5023_v6 = vpop.eup %5022  ;;  %v3614_v30 = vadd.f32 1.0, %v5021_v55  ;;  %v4794_v55 = vld [vmem:[#allocation14 + $0xd8] sm:$0xff]  }
 0x94d   :  { %5026 = vrcp.f32 %v3613_v38  ;;  %v4791_v38 = vld [vmem:[#allocation14 + $0xa0] sm:$0xff]  }
 0x94e   :  { %5028 = vrcp.f32 %v3614_v30  ;;  %v4797_v30 = vld [vmem:[#allocation14 + $0x10] sm:$0xff]  }
 0x958   :  { %v5025_v28 = vpop.eup %5024 }
 0x959   :  { %v3623_v58 = vmul.f32 %v5025_v28, %v5023_v6  ;;  %v4793_v6 = vld [vmem:[#allocation14 + $0x18] sm:$0xff]   ;;  %v4796_v28 = vld [vmem:[#allocation14 + $0x50] sm:$0xff]  }
 0x95a   :  { %v5027_v57 = vpop.eup %5026 }
 0x95b   :  { %v3622_v56 = vmul.f32 %v5027_v57, %v6781_v0  ;;  %v5029_v5 = vpop.eup %5028  ;;  %v4783_v0 = vld [vmem:[#allocation14 + $0xb0] sm:$0xff]  }
 0x95c   :  { %v4798_v57 = vld [vmem:[#allocation14 + $0xd0] sm:$0xff]  }
 0x95d   :  { %v6951_v42 = vadd.f32 %v3623_v58, %v3622_v56  ;;  %v4795_v58 = vld [vmem:[#allocation14 + $0x98] sm:$0xff]   ;;  %v4800_v56 = vld [vmem:[#allocation14 + $0x48] sm:$0xff]  }
 0x95f   :  { %5030 = vtanh.f32 %v6951_v42 }
 0x96c   :  { %v5031_v24 = vpop.eup %5030 }
 0x96d   :  { %v3626_v23 = vmul.f32 %v5031_v24, %v5029_v5  ;;  %v4799_v5 = vld [vmem:[#allocation14 + $0x90] sm:$0xff]   ;;  %v4802_v24 = vld [vmem:[#allocation14 + $0xc8] sm:$0xff]  }
 0x96f   :  { %v3632_v4 = vpack.c.bf16 %v3626_v23, %v3626_v23  ;;  %v6957_v10 = vmax.f32 %v8135_v60, %v3626_v23  ;;  %v6960_v50 = vadd.f32 %v3626_v23, %v6792_v18  ;;  %v4785_v18 = vld [vmem:[#allocation14 + $0x28] sm:$0xff]  }
 0x970   :  { %v4801_v23 = vld [vmem:[#allocation14 + $0x8] sm:$0xff]  }
 0x971   :  { %3665 = vmatprep.mubr.bf16.mxu0 %v3632_v4  ;;  %3706 = vmatprep.mubr.bf16.mxu1 %v3632_v4  ;;  %v4803_v60 = vld [vmem:[#allocation14 + $0x88] sm:$0xff]  }
 0x972   :  { %3666 = vmatmul.mubr.bf16.vlgmr.msra.gmra.mxu0 %v6962_v21  ;;  %3707 = vmatmul.mubr.bf16.vlgmr.msra.gmra.mxu1 %v6962_v21 }
 0x973   :  { %3716 = vmatpush1.bf16.msra.mxu0 %v7557_v15  ;;  %3757 = vmatpush1.bf16.msra.mxu1 %v7558_v46  ;;  %v8136_v15 = vld [vmem:[#allocation122_spill] sm:$0xff]  ;;  %v8137_v46 = vld [vmem:[#allocation123_spill] sm:$0xff] }
 0x974   :  { %3747 = vmatprep.mubr.bf16.mxu0 %v3632_v4  ;;  %3788 = vmatprep.mubr.bf16.mxu1 %v3632_v4  ;;  %v4804_v4 = vld [vmem:[#allocation14 + $0x40] sm:$0xff]  }
 0x975   :  { %3717 = vmatprep.subr.bf16.mxu0 %v7559_v13  ;;  %3758 = vmatprep.subr.bf16.mxu1 %v7560_v62  ;;  %v8138_v13 = vld [vmem:[#allocation124_spill] sm:$0xff]  ;;  %v8139_v62 = vld [vmem:[#allocation125_spill] sm:$0xff] }
 0x977   :  { %3718 = vmatpush1.bf16.msra.mxu0 %v7561_v40  ;;  %3759 = vmatpush1.bf16.msra.mxu1 %v7562_v49  ;;  %v8140_v40 = vld [vmem:[#allocation126_spill] sm:$0xff]  ;;  %v8141_v49 = vld [vmem:[#allocation127_spill] sm:$0xff] }
 0x978   :  { %3719 = vmatprep.subr.bf16.mxu0 %v7563_v48  ;;  %3760 = vmatprep.subr.bf16.mxu1 %v7564_v39  ;;  %v8142_v48 = vld [vmem:[#allocation128_spill] sm:$0xff]  ;;  %v8143_v39 = vld [vmem:[#allocation129_spill] sm:$0xff] }
 0x97b   :  { %3720 = vmatpush1.bf16.msra.mxu0 %v7565_v14  ;;  %3761 = vmatpush1.bf16.msra.mxu1 %v7566_v63  ;;  %v8144_v14 = vld [vmem:[#allocation130_spill] sm:$0xff]  ;;  %v8145_v63 = vld [vmem:[#allocation131_spill] sm:$0xff] }
 0x97c   :  { %3721 = vmatprep.subr.bf16.mxu0 %v7567_v12  ;;  %3762 = vmatprep.subr.bf16.mxu1 %v7568_v7  ;;  %v8146_v12 = vld [vmem:[#allocation132_spill] sm:$0xff]  ;;  %v8147_v7 = vld [vmem:[#allocation133_spill] sm:$0xff] }
 0x97f   :  { %3722 = vmatpush1.bf16.msra.mxu0 %v7569_v47  ;;  %3763 = vmatpush1.bf16.msra.mxu1 %v7652_v34  ;;  %v8148_v47 = vld [vmem:[#allocation134_spill] sm:$0xff]  ;;  %v8149_v34 = vld [vmem:[#allocation135_spill] sm:$0xff] }
 0x980   :  { %3723 = vmatprep.subr.bf16.mxu0 %v7653_v27  ;;  %3764 = vmatprep.subr.bf16.mxu1 %v7654_v26  ;;  %v8150_v27 = vld [vmem:[#allocation136_spill] sm:$0xff]  ;;  %v8151_v26 = vld [vmem:[#allocation137_spill] sm:$0xff] }
 0x983   :  { %3724 = vmatpush1.bf16.msra.mxu0 %v7655_v45  ;;  %3765 = vmatpush1.bf16.msra.mxu1 %v7656_v20  ;;  %v8152_v45 = vld [vmem:[#allocation138_spill] sm:$0xff]  ;;  %v8153_v20 = vld [vmem:[#allocation139_spill] sm:$0xff] }
 0x984   :  { %3725 = vmatprep.subr.bf16.mxu0 %v7657_v51  ;;  %3766 = vmatprep.subr.bf16.mxu1 %v7658_v19  ;;  %v8154_v51 = vld [vmem:[#allocation140_spill] sm:$0xff]  ;;  %v8155_v19 = vld [vmem:[#allocation141_spill] sm:$0xff] }
 0x987   :  { %3726 = vmatpush1.bf16.msra.mxu0 %v7659_v52  ;;  %3767 = vmatpush1.bf16.msra.mxu1 %v7747_v36  ;;  %v8156_v52 = vld [vmem:[#allocation142_spill] sm:$0xff]  ;;  %v8163_v36 = vld [vmem:[#allocation149_spill] sm:$0xff] }
 0x988   :  { %3727 = vmatprep.subr.bf16.mxu0 %v7748_v8  ;;  %3768 = vmatprep.subr.bf16.mxu1 %v7749_v41  ;;  %v4776_v8 = vld [vmem:[#allocation14 + $0x78] sm:$0xff]  }
 0x989   :  { %v4777_v41 = vld [vmem:[#allocation14 + $0x38] sm:$0xff]  }
 0x98b   :  { %3728 = vmatpush1.bf16.msra.mxu0 %v7750_v44  ;;  %3769 = vmatpush1.bf16.msra.mxu1 %v7751_v32  ;;  %v4778_v44 = vld [vmem:[#allocation14 + $0xf8] sm:$0xff]  }
 0x98c   :  { %3729 = vmatprep.subr.bf16.mxu0 %v7665_v37  ;;  %3770 = vmatprep.subr.bf16.mxu1 %v7666_v59  ;;  %v8159_v37 = vld [vmem:[#allocation145_spill] sm:$0xff]  ;;  %v8160_v59 = vld [vmem:[#allocation146_spill] sm:$0xff]  ;;  %v4779_v32 = vld [vmem:[#allocation14 + $0xb8] sm:$0xff]  }
 0x98f   :  { %3730 = vmatpush1.bf16.msra.mxu0 %v7667_v16  ;;  %3771 = vmatpush1.bf16.msra.mxu1 %v7752_v29  ;;  %v8161_v16 = vld [vmem:[#allocation147_spill] sm:$0xff] }
 0x990   :  { %3731 = vmatprep.subr.bf16.mxu0 %v7753_v17  ;;  %3772 = vmatprep.subr.bf16.mxu1 %v7670_v35  ;;  %v8162_v35 = vld [vmem:[#allocation148_spill] sm:$0xff]  ;;  %v4780_v29 = vld [vmem:[#allocation14 + $0x70] sm:$0xff]  }
 0x991   :  { %v4781_v17 = vld [vmem:[#allocation14 + $0x30] sm:$0xff]  }
 0x993   :  { %3732 = vmatpush2.bf16.msra.mxu0 %v7671_v53  ;;  %3773 = vmatpush2.bf16.msra.mxu1 %v7672_v54  ;;  %v8157_v53 = vld [vmem:[#allocation143_spill] sm:$0xff]  ;;  %v8158_v54 = vld [vmem:[#allocation144_spill] sm:$0xff] }
 0x994   :  { %3733 = vmatprep.subr.bf16.mxu0 %v8136_v15  ;;  %3774 = vmatprep.subr.bf16.mxu1 %v8137_v46  ;;  %v4805_v15 = vld [vmem:[#allocation14] sm:$0xff]  }
 0x995   :  { %v4807_v46 = vld [vmem:[#allocation14 + $0x80] sm:$0xff]  }
 0x997   :  { %3734 = vmatpush2.bf16.msra.mxu0 %v8138_v13  ;;  %3775 = vmatpush2.bf16.msra.mxu1 %v8139_v62  ;;  %v8164_v13 = vld [vmem:[#allocation162_spill] sm:$0xff] }
 0x998   :  { %3735 = vmatprep.subr.bf16.mxu0 %v8140_v40  ;;  %3776 = vmatprep.subr.bf16.mxu1 %v8141_v49  ;;  %v3801_v62 = vunpack.c.l.bf16 %v8164_v13  ;;  %v8165_v40 = vld [vmem:[#allocation163_spill] sm:$0xff] }
 0x999   :  { %v3803_v49 = vunpack.c.l.bf16 %v8165_v40 }
 0x99b   :  { %3736 = vmatpush2.bf16.msra.mxu0 %v8142_v48  ;;  %3777 = vmatpush2.bf16.msra.mxu1 %v8143_v39 }
 0x99c   :  { %3737 = vmatprep.subr.bf16.mxu0 %v8144_v14  ;;  %3778 = vmatprep.subr.bf16.mxu1 %v8145_v63 }
 0x99f   :  { %3738 = vmatpush2.bf16.msra.mxu0 %v8146_v12  ;;  %3779 = vmatpush2.bf16.msra.mxu1 %v8147_v7  ;;  %v3802_v12 = vunpack.c.h.bf16 %v8164_v13  ;;  %v3804_v7 = vunpack.c.h.bf16 %v8165_v40 }
 0x9a0   :  { %3739 = vmatprep.subr.bf16.mxu0 %v8148_v47  ;;  %3780 = vmatprep.subr.bf16.mxu1 %v8149_v34 }
 0x9a3   :  { %3740 = vmatpush2.bf16.msra.mxu0 %v8150_v27  ;;  %3781 = vmatpush2.bf16.msra.mxu1 %v8151_v26 }
 0x9a4   :  { %3741 = vmatprep.subr.bf16.mxu0 %v8152_v45  ;;  %3782 = vmatprep.subr.bf16.mxu1 %v8153_v20 }
 0x9a7   :  { %3742 = vmatpush2.bf16.msra.mxu0 %v8154_v51  ;;  %3783 = vmatpush2.bf16.msra.mxu1 %v8155_v19 }
 0x9a8   :  { %3743 = vmatprep.subr.bf16.mxu0 %v8156_v52  ;;  %3784 = vmatprep.subr.bf16.mxu1 %v8157_v53 }
 0x9ab   :  { %3744 = vmatpush2.bf16.msra.mxu0 %v8158_v54  ;;  %3785 = vmatpush2.bf16.msra.mxu1 %v8159_v37 }
 0x9ac   :  { %3745 = vmatprep.subr.bf16.mxu0 %v8160_v59  ;;  %3786 = vmatprep.subr.bf16.mxu1 %v8161_v16 }
 0x9af   :  { %3746 = vmatpush2.bf16.msra.mxu0 %v8162_v35  ;;  %3787 = vmatpush2.bf16.msra.mxu1 %v8163_v36 }
 0x9b0   :  { %4613 = vmatprep.subr.bf16.mxu0 %v4776_v8  ;;  %4635 = vmatprep.subr.bf16.mxu1 %v4778_v44 }
 0x9b2   :  { %3748 = vmatmul.mubr.bf16.vlgmr.msra.gmra.mxu0 %v6962_v21  ;;  %3789 = vmatmul.mubr.bf16.vlgmr.msra.gmra.mxu1 %v6962_v21  ;;  %v4806_v21 = vld [vmem:[#allocation14 + $0xc0] sm:$0xff]  }
 0x9b3   :  { %4614 = vmatpush3.bf16.msra.mxu0 %v4777_v41  ;;  %4636 = vmatpush3.bf16.msra.mxu1 %v4779_v32 }
 0x9b4   :  { %4615 = vmatprep.subr.bf16.mxu0 %v4780_v29  ;;  %4637 = vmatprep.subr.bf16.mxu1 %v4782_v43 }
 0x9b7   :  { %4616 = vmatpush3.bf16.msra.mxu0 %v4781_v17  ;;  %4638 = vmatpush3.bf16.msra.mxu1 %v4783_v0 }
 0x9b8   :  { %4617 = vmatprep.subr.bf16.mxu0 %v4784_v33  ;;  %4639 = vmatprep.subr.bf16.mxu1 %v4786_v1 }
 0x9bb   :  { %4618 = vmatpush3.bf16.msra.mxu0 %v4785_v18  ;;  %4640 = vmatpush3.bf16.msra.mxu1 %v4787_v25 }
 0x9bc   :  { %4619 = vmatprep.subr.bf16.mxu0 %v4788_v2  ;;  %4641 = vmatprep.subr.bf16.mxu1 %v4790_v11  ;;  %v8166_v2 = vld [vmem:[#allocation164_spill] sm:$0xff] }
 0x9bf   :  { %4620 = vmatpush3.bf16.msra.mxu0 %v4789_v9  ;;  %4642 = vmatpush3.bf16.msra.mxu1 %v4791_v38  ;;  %v3813_v9 = vunpack.c.l.bf16 %v8166_v2 }
 0x9c0   :  { %4621 = vmatprep.subr.bf16.mxu0 %v4792_v61  ;;  %4643 = vmatprep.subr.bf16.mxu1 %v4794_v55  ;;  %v3814_v55 = vunpack.c.h.bf16 %v8166_v2 }
 0x9c3   :  { %4622 = vmatpush3.bf16.msra.mxu0 %v4793_v6  ;;  %4644 = vmatpush3.bf16.msra.mxu1 %v4795_v58 }
 0x9c4   :  { %4623 = vmatprep.subr.bf16.mxu0 %v4796_v28  ;;  %4645 = vmatprep.subr.bf16.mxu1 %v4798_v57 }
 0x9c7   :  { %4624 = vmatpush3.bf16.msra.mxu0 %v4797_v30  ;;  %4646 = vmatpush3.bf16.msra.mxu1 %v4799_v5 }
 0x9c8   :  { %4625 = vmatprep.subr.bf16.mxu0 %v4800_v56  ;;  %4647 = vmatprep.subr.bf16.mxu1 %v4802_v24 }
 0x9cb   :  { %4626 = vmatpush3.bf16.msra.mxu0 %v4801_v23  ;;  %4648 = vmatpush3.bf16.msra.mxu1 %v4803_v60 }
 0x9cc   :  { %4627 = vmatprep.subr.bf16.mxu0 %v4804_v4  ;;  %4649 = vmatprep.subr.bf16.mxu1 %v4806_v21 }
 0x9cf   :  { %4628 = vmatpush3.bf16.msra.mxu0 %v4805_v15  ;;  %4650 = vmatpush3.bf16.msra.mxu1 %v4807_v46 }
 0xa32   :  { %v3667_v48 = vpop.f32.mrf.mxu0  ;;  %v3708_v39 = vpop.f32.mrf.mxu1 }
 0xa33   :  { %v3805_v14 = vadd.f32 %v3801_v62, %v3667_v48  ;;  %v3807_v63 = vadd.f32 %v3803_v49, %v3708_v39 }
 0xa34   :  { %v3669_v47 = vpop.f32.mrf.mxu0  ;;  %v3710_v34 = vpop.f32.mrf.mxu1 }
 0xa35   :  { %v4542_v27 = vmul.f32 -1.442695, %v3805_v14  ;;  %v3806_v26 = vadd.f32 %v3802_v12, %v3669_v47  ;;  %v3808_v45 = vadd.f32 %v3804_v7, %v3710_v34  ;;  %v4544_v54 = vmul.f32 -1.442695, %v3807_v63 }
 0xa36   :  { %v3671_v20 = vpop.f32.mrf.mxu0  ;;  %v3712_v51 = vpop.f32.mrf.mxu1 }
 0xa37   :  { %5032 = vpow2.f32 %v4542_v27  ;;  %v4543_v19 = vmul.f32 -1.442695, %v3806_v26 }
 0xa38   :  { %v3672_v52 = vpop.f32.mrf.mxu0  ;;  %v3713_v53 = vpop.f32.mrf.mxu1 }
 0xa39   :  { %5034 = vpow2.f32 %v4543_v19 }
 0xa3a   :  { %5036 = vpow2.f32 %v4544_v54 }
 0xa3b   :  { %5038 = vtanh.f32 %v3808_v45 }
 0xa44   :  { %v5033_v37 = vpop.eup %5032 }
 0xa45   :  { %v3830_v59 = vadd.f32 1.0, %v5033_v37  ;;  %v4548_v37 = vld [vmem:[%s7058_s8] ss:$0 sm:$0xff] }
 0xa46   :  { %v5035_v16 = vpop.eup %5034 }
 0xa47   :  { %5040 = vrcp.f32 %v3830_v59  ;;  %v3831_v35 = vadd.f32 1.0, %v5035_v16  ;;  %v5037_v36 = vpop.eup %5036 }
 0xa48   :  { %v5039_v8 = vpop.eup %5038  ;;  %v3832_v29 = vadd.f32 1.0, %v5037_v36 }
 0xa49   :  { %5042 = vrcp.f32 %v3831_v35 }
 0xa4a   :  { %5044 = vrcp.f32 %v3832_v29 }
 0xa54   :  { %v5041_v41 = vpop.eup %5040 }
 0xa55   :  { %v3841_v44 = vmul.f32 %v5041_v41, %v5039_v8 }
 0xa56   :  { %v5043_v32 = vpop.eup %5042 }
 0xa57   :  { %v3840_v17 = vmul.f32 %v5043_v32, %v6935_v3  ;;  %v5045_v0 = vpop.eup %5044 }
 0xa59   :  { %v3842_v43 = vadd.f32 %v3841_v44, %v3840_v17 }
 0xa5b   :  { %5046 = vtanh.f32 %v3842_v43 }
 0xa68   :  { %v5047_v33 = vpop.eup %5046 }
 0xa69   :  { %v3844_v18 = vmul.f32 %v5047_v33, %v5045_v0 }
 0xa6b   :  { %v3870_v1 = vmax.f32 %v6941_v22, %v3844_v18  ;;  %v3869_v25 = vadd.f32 %v3844_v18, %v6944_v31  ;;  %v8167_v22 = vld [vmem:[#allocation165_spill] sm:$0xff] }
 0xa6c   :  { %v3815_v31 = vunpack.c.l.bf16 %v8167_v22  ;;  %v3816_v4 = vunpack.c.h.bf16 %v8167_v22 }
 0xa6d   :  { %v3884_v20 = vmul.f32 0.125, %v3869_v25  ;;  %v3886_v52 = vpack.c.bf16 %v3870_v1, %v3870_v1 }
 0xa6f   :  { %v3888_v54 = vpack.c.bf16 %v3884_v20, %v3884_v20 }
 0xa72   :  { %v3749_v11 = vpop.f32.mrf.mxu0  ;;  %v3790_v61 = vpop.f32.mrf.mxu1 }
 0xa73   :  { %v3817_v38 = vadd.f32 %v3813_v9, %v3749_v11  ;;  %v3819_v23 = vadd.f32 %v3815_v31, %v3790_v61 }
 0xa74   :  { %v3751_v6 = vpop.f32.mrf.mxu0  ;;  %v3792_v28 = vpop.f32.mrf.mxu1 }
 0xa75   :  { %v4545_v3 = vmul.f32 -1.442695, %v3817_v38  ;;  %v3818_v58 = vadd.f32 %v3814_v55, %v3751_v6  ;;  %v4547_v60 = vmul.f32 -1.442695, %v3819_v23  ;;  %v3820_v21 = vadd.f32 %v3816_v4, %v3792_v28 }
 0xa76   :  { %v3753_v57 = vpop.f32.mrf.mxu0  ;;  %v3794_v30 = vpop.f32.mrf.mxu1 }
 0xa77   :  { %5048 = vpow2.f32 %v4545_v3  ;;  %v4546_v56 = vmul.f32 -1.442695, %v3818_v58 }
 0xa78   :  { %v3754_v5 = vpop.f32.mrf.mxu0  ;;  %v3795_v24 = vpop.f32.mrf.mxu1 }
 0xa79   :  { %5050 = vpow2.f32 %v4546_v56 }
 0xa7a   :  { %5052 = vpow2.f32 %v4547_v60 }
 0xa7b   :  { %5054 = vtanh.f32 %v3820_v21 }
 0xa84   :  { %v5049_v15 = vpop.eup %5048 }
 0xa85   :  { %v3854_v46 = vadd.f32 1.0, %v5049_v15 }
 0xa86   :  { %v5051_v13 = vpop.eup %5050 }
 0xa87   :  { %5056 = vrcp.f32 %v3854_v46  ;;  %v3855_v62 = vadd.f32 1.0, %v5051_v13  ;;  %v5053_v40 = vpop.eup %5052 }
 0xa88   :  { %v5055_v49 = vpop.eup %5054  ;;  %v3856_v63 = vadd.f32 1.0, %v5053_v40 }
 0xa89   :  { %5058 = vrcp.f32 %v3855_v62 }
 0xa8a   :  { %5060 = vrcp.f32 %v3856_v63 }
 0xa94   :  { %v5057_v48 = vpop.eup %5056 }
 0xa95   :  { %v3865_v39 = vmul.f32 %v5057_v48, %v5055_v49 }
 0xa96   :  { %v5059_v14 = vpop.eup %5058 }
 0xa97   :  { %v3864_v12 = vmul.f32 %v5059_v14, %v6951_v42  ;;  %v5061_v47 = vpop.eup %5060 }
 0xa99   :  { %v3866_v7 = vadd.f32 %v3865_v39, %v3864_v12 }
 0xa9b   :  { %5062 = vtanh.f32 %v3866_v7 }
 0xaa8   :  { %v5063_v34 = vpop.eup %5062 }
 0xaa9   :  { %v3868_v27 = vmul.f32 %v5063_v34, %v5061_v47 }
 0xaab   :  { %v3872_v26 = vmax.f32 %v6957_v10, %v3868_v27  ;;  %v3871_v45 = vadd.f32 %v3868_v27, %v6960_v50 }
 0xaad   :  { %v3887_v51 = vpack.c.bf16 %v3872_v26, %v3872_v26  ;;  %v3885_v19 = vmul.f32 0.125, %v3871_v45 }
 0xaaf   :  { %4185 = vmatprep.mubr.bf16.mxu0 %v3887_v51  ;;  %v3889_v53 = vpack.c.bf16 %v3885_v19, %v3885_v19 }
 0xab0   :  { %4186 = vmatmul.mubr.bf16.vlgmr.msra.gmra.mxu0 %v3886_v52 }
 0xab1   :  { %4225 = vmatprep.mubr.bf16.mxu1 %v3889_v53 }
 0xab2   :  { %4226 = vmatmul.mubr.bf16.vlgmr.msra.gmra.mxu1 %v3888_v54 }
 0xb70   :  { %v4629_v42 = vpop.f32.mrf.mxu0 }
 0xb72   :  { %v4630_v59 = vpop.f32.mrf.mxu0  ;;  %v4651_v16 = vpop.f32.mrf.mxu1 }
 0xb73   :  { %v4631_v10 = vadd.f32 %v4630_v59, %v4629_v42 }
 0xb74   :  { %v4632_v35 = vpop.f32.mrf.mxu0  ;;  %v4652_v50 = vpop.f32.mrf.mxu1 }
 0xb75   :  { %v4188_v36 = vadd.f32 %v4631_v10, %v4548_v37  ;;  %v4653_v8 = vadd.f32 %v4652_v50, %v4651_v16 }
 0xb76   :  { %v4633_v41 = vpop.f32.mrf.mxu0  ;;  %v4654_v44 = vpop.f32.mrf.mxu1 }
 0xb77   :  { %v4228_v32 = vadd.f32 %v4653_v8, %v4188_v36 }
 0xb78   :  { %v4655_v29 = vpop.f32.mrf.mxu1 }
 0xb79   :  { %4233 = vst [vmem:[#allocation16] sm:$0xff] %v4228_v32 }
 0xb7a   :  { %5195 = shalt.err (!%p5192_p6)
}
 0xb7b   :  { %4243 = dma.vmem_to_hbm [thread:$0]  %s4241_s23, 128, %s7059_s9, [#allocation7]  }
 0xb7c   :  { %5212 = dma.done.wait [#allocation7], 128  }
 0xb7d   :  { %5213 = vsyncadd [#allocation7], 4294967168 }
 0xb7e   :  { %4247 = vsyncpa [#allocation6], 1 }
 0xb7f   :  { %4248 = vsyncpa [#allocation9], 1 }
 0xb80   :  { %4249 = vsyncpa [#allocation12], 1 }
 0xb81   :  { %4250 = vsyncpa [#allocation15], 1 }
 0xb82   :  { %4251 = vsyncpa [#allocation7], 1 }

</bundles_post_ra>
